<compile_context>
chip_gen: v7x
topology: tpu7x:2x2x1
jax: 0.10.0
libtpu: 0.0.40
codegen_flags: <defaults>
</compile_context>

<pallas_src>
import functools
import math

import jax
import jax.numpy as jnp
from jax import lax
from jax.experimental import pallas as pl
from jax.experimental.pallas import tpu as pltpu


LN_EPS = 1e-5
MASK_VALUE = -1e30


# ----------------------------------------------------------------------------
# In-kernel helpers (operate on values already resident in vregs)
# ----------------------------------------------------------------------------

def _layer_norm(x):
    """Parameter-free LayerNorm over the last axis (f32 math)."""
    mu = jnp.mean(x, axis=-1, keepdims=True)
    xc = x - mu
    var = jnp.mean(xc * xc, axis=-1, keepdims=True)
    return xc * lax.rsqrt(var + LN_EPS)


def _attention(x_q, x_kv, wq, wk, wv, wo, *, n_heads, masked):
    """Head-fused multi-head attention.

    x_q:  (Sq, D) f32 activations
    x_kv: (Sk, D) f32 activations
    wq/wk/wv: (D, D) bf16, head-fused column layout [head0 | head1 | ...]
    wo:       (D, D) bf16, head-fused row layout    [head0 ; head1 ; ...]
    Returns (Sq, D) f32.
    """
    Sq, D = x_q.shape
    Sk = x_kv.shape[0]
    m = D // n_heads
    scale = 1.0 / math.sqrt(m)

    xq_b = x_q.astype(jnp.bfloat16)
    xkv_b = x_kv.astype(jnp.bfloat16)

    # Single lane-dense (S, D) x (D, D) projections for all heads at once.
    q = jnp.dot(xq_b, wq, preferred_element_type=jnp.float32)   # (Sq, D)
    k = jnp.dot(xkv_b, wk, preferred_element_type=jnp.float32)  # (Sk, D)
    v = jnp.dot(xkv_b, wv, preferred_element_type=jnp.float32)  # (Sk, D)

    if masked:  # hoisted: build the causal predicate once, not per head
        row = lax.broadcasted_iota(jnp.int32, (Sq, Sk), 0)
        col = lax.broadcasted_iota(jnp.int32, (Sq, Sk), 1)
        causal = col <= row

    # TODO(synk): for large head_dim, relayout to a head-batched form (one
    # batched dot_general) instead of the statically unrolled per-head loop.
    heads = []
    for h in range(n_heads):  # statically unrolled; everything stays in vregs
        qh = q[:, h * m:(h + 1) * m].astype(jnp.bfloat16)   # (Sq, m)
        kh = k[:, h * m:(h + 1) * m].astype(jnp.bfloat16)   # (Sk, m)
        vh = v[:, h * m:(h + 1) * m].astype(jnp.bfloat16)   # (Sk, m)

        # scores = qh @ kh^T (contract over m on both, no explicit transpose)
        s = lax.dot_general(qh, kh, (((1,), (1,)), ((), ())),
                            preferred_element_type=jnp.float32) * scale  # (Sq, Sk)
        if masked:
            s = jnp.where(causal, s, jnp.float32(MASK_VALUE))

        s = s - jnp.max(s, axis=-1, keepdims=True)
        p = jnp.exp(s)
        p = p / jnp.sum(p, axis=-1, keepdims=True)   # exact softmax denominator

        heads.append(jnp.dot(p.astype(jnp.bfloat16), vh,
                             preferred_element_type=jnp.float32))        # (Sq, m)

    # concat(per-head outputs) @ W_o_fused  ==  sum_h oh_h @ W_o[h]
    o = jnp.concatenate(heads, axis=-1).astype(jnp.bfloat16)             # (Sq, D)
    return jnp.dot(o, wo, preferred_element_type=jnp.float32)            # (Sq, D)


def _ffn(x, w1, b1, w2, b2):
    """ReLU MLP: bf16 matmuls with f32 accumulation, f32 elementwise."""
    h = jnp.dot(x.astype(jnp.bfloat16), w1, preferred_element_type=jnp.float32) + b1
    h = jnp.maximum(h, 0.0)
    return jnp.dot(h.astype(jnp.bfloat16), w2, preferred_element_type=jnp.float32) + b2


# ----------------------------------------------------------------------------
# Fused-stack Pallas kernels (grid over layers, activation resident in VMEM)
# ----------------------------------------------------------------------------

def _encoder_stack_kernel(x_ref, wq_ref, wk_ref, wv_ref, wo_ref,
                          w1_ref, b1_ref, w2_ref, b2_ref,
                          o_ref, h_scr, *, n_heads):
    l = pl.program_id(0)

    @pl.when(l == 0)
    def _():
        h_scr[...] = x_ref[...]

    x = h_scr[...]
    attn = _attention(x, x, wq_ref[...], wk_ref[...], wv_ref[...], wo_ref[...],
                      n_heads=n_heads, masked=False)
    h = _layer_norm(attn + x)                      # dropout == identity (eval)
    f = _ffn(h, w1_ref[...], b1_ref[...], w2_ref[...], b2_ref[...])
    out = _layer_norm(f + h)
    h_scr[...] = out

    @pl.when(l == pl.num_programs(0) - 1)
    def _():
        o_ref[...] = out


def _decoder_stack_kernel(src_ref, y_ref,
                          sa_wq_ref, sa_wk_ref, sa_wv_ref, sa_wo_ref,
                          ca_wq_ref, ca_wk_ref, ca_wv_ref, ca_wo_ref,
                          w1_ref, b1_ref, w2_ref, b2_ref, et_ref,
                          o_ref, y_scr, *, n_heads):
    l = pl.program_id(0)

    @pl.when(l == 0)
    def _():
        y_scr[...] = y_ref[...]

    src = src_ref[...]
    y = y_scr[...]
    s = _attention(y, y, sa_wq_ref[...], sa_wk_ref[...], sa_wv_ref[...], sa_wo_ref[...],
                   n_heads=n_heads, masked=True)
    h = _layer_norm(s + y)
    c = _attention(h, src, ca_wq_ref[...], ca_wk_ref[...], ca_wv_ref[...], ca_wo_ref[...],
                   n_heads=n_heads, masked=False)
    q = _layer_norm(c + h)
    f = _ffn(q, w1_ref[...], b1_ref[...], w2_ref[...], b2_ref[...])
    out = _layer_norm(f + q)
    y_scr[...] = out

    # Fused output-vocab projection (only at the last layer): lane-dense
    # (S, v_pad) output against the pre-transposed (D, v_pad) bf16 table.
    @pl.when(l == pl.num_programs(0) - 1)
    def _():
        o_ref[...] = jnp.dot(out.astype(jnp.bfloat16), et_ref[...],
                             preferred_element_type=jnp.float32)


# ----------------------------------------------------------------------------
# pallas_call wrappers
# ----------------------------------------------------------------------------

def encoder_stack(x, w, *, n_heads, n_layers):
    S, D = x.shape
    kernel = functools.partial(_encoder_stack_kernel, n_heads=n_heads)
    w_spec = pl.BlockSpec((None, D, D), lambda l: (l, 0, 0))
    b_spec = pl.BlockSpec((None, 1, D), lambda l: (l, 0, 0))
    act_spec = pl.BlockSpec((S, D), lambda l: (0, 0))
    return pl.pallas_call(
        kernel,
        out_shape=jax.ShapeDtypeStruct((S, D), jnp.float32),
        grid_spec=pltpu.PrefetchScalarGridSpec(
            num_scalar_prefetch=0,
            grid=(n_layers,),
            in_specs=[act_spec,
                      w_spec, w_spec, w_spec, w_spec,
                      w_spec, b_spec, w_spec, b_spec],
            out_specs=act_spec,
            scratch_shapes=[pltpu.VMEM((S, D), jnp.float32)]),
        compiler_params=pltpu.CompilerParams(
            dimension_semantics=("arbitrary",)),
    )(x, w["Wq"], w["Wk"], w["Wv"], w["Wo"],
      w["W1"], w["b1"], w["W2"], w["b2"])


def decoder_stack(src, y, w, out_proj_t, *, n_heads, n_layers):
    S, D = y.shape
    v_pad = out_proj_t.shape[1]
    kernel = functools.partial(_decoder_stack_kernel, n_heads=n_heads)
    w_spec = pl.BlockSpec((None, D, D), lambda l: (l, 0, 0))
    b_spec = pl.BlockSpec((None, 1, D), lambda l: (l, 0, 0))
    act_spec = pl.BlockSpec((S, D), lambda l: (0, 0))
    return pl.pallas_call(
        kernel,
        out_shape=jax.ShapeDtypeStruct((S, v_pad), jnp.float32),
        grid_spec=pltpu.PrefetchScalarGridSpec(
            num_scalar_prefetch=0,
            grid=(n_layers,),
            in_specs=[act_spec, act_spec,
                      w_spec, w_spec, w_spec, w_spec,
                      w_spec, w_spec, w_spec, w_spec,
                      w_spec, b_spec, w_spec, b_spec,
                      pl.BlockSpec((D, v_pad), lambda l: (0, 0))],
            out_specs=pl.BlockSpec((S, v_pad), lambda l: (0, 0)),
            scratch_shapes=[pltpu.VMEM((S, D), jnp.float32)]),
        compiler_params=pltpu.CompilerParams(
            dimension_semantics=("arbitrary",)),
    )(src, y,
      w["sa_Wq"], w["sa_Wk"], w["sa_Wv"], w["sa_Wo"],
      w["ca_Wq"], w["ca_Wk"], w["ca_Wv"], w["ca_Wo"],
      w["W1"], w["b1"], w["W2"], w["b2"], out_proj_t)


# ----------------------------------------------------------------------------
# Plain-JAX glue: embeddings, positional encoding, init, weight prep, graph
# ----------------------------------------------------------------------------

def positional_encoding(x):
    S, D = x.shape
    pos = jnp.arange(S, dtype=jnp.float32)[:, None]
    i = jnp.arange(D, dtype=jnp.float32)[None, :]
    angle = pos / jnp.power(10000.0, (2.0 * jnp.floor(i / 2.0)) / D)
    pe = jnp.where((jnp.arange(D)[None, :] % 2) == 0, jnp.sin(angle), jnp.cos(angle))
    return x + pe


def _uniform(key, shape, bound):
    return jax.random.uniform(key, shape, jnp.float32, minval=-bound, maxval=bound)


def init_attention_params(key, n_heads, d_model):
    m = d_model // n_heads
    bound = 1.0 / math.sqrt(d_model * m)   # kaiming_uniform_(a=sqrt(5)) on (H, D, m)
    ks = jax.random.split(key, 4)
    return {
        "Wq": _uniform(ks[0], (n_heads, d_model, m), bound),
        "Wk": _uniform(ks[1], (n_heads, d_model, m), bound),
        "Wv": _uniform(ks[2], (n_heads, d_model, m), bound),
        "Wo": _uniform(ks[3], (n_heads, m, d_model), bound),
    }


def init_ffn_params(key, d_model):
    bound = 1.0 / math.sqrt(d_model)
    ks = jax.random.split(key, 4)
    return {
        "W1": _uniform(ks[0], (d_model, d_model), bound),
        "b1": _uniform(ks[1], (d_model,), bound),
        "W2": _uniform(ks[2], (d_model, d_model), bound),
        "b2": _uniform(ks[3], (d_model,), bound),
    }


def init_transformer_params(key, in_vocab, out_vocab, n_enc, n_dec, n_heads, d_model):
    keys = jax.random.split(key, 2 + n_enc + n_dec)
    bound_e = 1.0 / math.sqrt(d_model)
    params = {
        "in_emb": _uniform(keys[0], (in_vocab, d_model), bound_e),
        "out_emb": _uniform(keys[1], (out_vocab, d_model), bound_e),
        "encoder": [],
        "decoder": [],
    }
    for i in range(n_enc):
        k1, k2 = jax.random.split(keys[2 + i])
        params["encoder"].append({
            "attn": init_attention_params(k1, n_heads, d_model),
            "ffn": init_ffn_params(k2, d_model),
        })
    for i in range(n_dec):
        k1, k2, k3 = jax.random.split(keys[2 + n_enc + i], 3)
        params["decoder"].append({
            "self_attn": init_attention_params(k1, n_heads, d_model),
            "cross_attn": init_attention_params(k2, n_heads, d_model),
            "ffn": init_ffn_params(k3, d_model),
        })
    return params


def _fuse_qkv(w):
    # (H, D, m) -> (D, H*m); column h*m + j == w[h, :, j]
    H, D, m = w.shape
    return jnp.transpose(w, (1, 0, 2)).reshape(D, H * m).astype(jnp.bfloat16)


def _fuse_o(w):
    # (H, m, D) -> (H*m, D); row h*m + j == w[h, j, :]
    H, m, D = w.shape
    return w.reshape(H * m, D).astype(jnp.bfloat16)


def prepare_params(params, d_model, output_vocab_size):
    """One-time weight re-layout:
      * head-fused bf16 matmul operands (Q/K/V columns, O rows),
      * per-layer weights stacked with a leading (L, ...) axis for the
        grid-over-layers fused stack kernels,
      * 128-padded, pre-transposed (D, v_pad) bf16 output-projection table."""
    def stack(fn, blocks):
        return jnp.stack([fn(b) for b in blocks])

    enc = params["encoder"]
    dec = params["decoder"]
    v_pad = ((output_vocab_size + 127) // 128) * 128
    out_proj_t = jnp.pad(
        params["out_emb"], ((0, v_pad - output_vocab_size), (0, 0))
    ).T.astype(jnp.bfloat16)                                       # (D, v_pad)

    prepped = {
        "in_emb": params["in_emb"],
        "out_emb": params["out_emb"],
        "out_proj_t": out_proj_t,
        "enc": {
            "Wq": stack(lambda b: _fuse_qkv(b["attn"]["Wq"]), enc),
            "Wk": stack(lambda b: _fuse_qkv(b["attn"]["Wk"]), enc),
            "Wv": stack(lambda b: _fuse_qkv(b["attn"]["Wv"]), enc),
            "Wo": stack(lambda b: _fuse_o(b["attn"]["Wo"]), enc),
            "W1": stack(lambda b: b["ffn"]["W1"].astype(jnp.bfloat16), enc),
            "b1": stack(lambda b: b["ffn"]["b1"].reshape(1, d_model), enc),
            "W2": stack(lambda b: b["ffn"]["W2"].astype(jnp.bfloat16), enc),
            "b2": stack(lambda b: b["ffn"]["b2"].reshape(1, d_model), enc),
        },
        "dec": {
            "sa_Wq": stack(lambda b: _fuse_qkv(b["self_attn"]["Wq"]), dec),
            "sa_Wk": stack(lambda b: _fuse_qkv(b["self_attn"]["Wk"]), dec),
            "sa_Wv": stack(lambda b: _fuse_qkv(b["self_attn"]["Wv"]), dec),
            "sa_Wo": stack(lambda b: _fuse_o(b["self_attn"]["Wo"]), dec),
            "ca_Wq": stack(lambda b: _fuse_qkv(b["cross_attn"]["Wq"]), dec),
            "ca_Wk": stack(lambda b: _fuse_qkv(b["cross_attn"]["Wk"]), dec),
            "ca_Wv": stack(lambda b: _fuse_qkv(b["cross_attn"]["Wv"]), dec),
            "ca_Wo": stack(lambda b: _fuse_o(b["cross_attn"]["Wo"]), dec),
            "W1": stack(lambda b: b["ffn"]["W1"].astype(jnp.bfloat16), dec),
            "b1": stack(lambda b: b["ffn"]["b1"].reshape(1, d_model), dec),
            "W2": stack(lambda b: b["ffn"]["W2"].astype(jnp.bfloat16), dec),
            "b2": stack(lambda b: b["ffn"]["b2"].reshape(1, d_model), dec),
        },
    }
    return prepped


def transformer_forward(prepped, src_tokens, tgt_tokens, *, d_model, n_heads,
                        n_enc, n_dec, output_vocab_size):
    norm = math.sqrt(d_model)
    # Embedding lookup + positional encoding (glue); dropout == identity (eval).
    X = positional_encoding(norm * jnp.take(prepped["in_emb"], src_tokens, axis=0))
    Y = positional_encoding(norm * jnp.take(prepped["out_emb"], tgt_tokens, axis=0))
    H = encoder_stack(X, prepped["enc"], n_heads=n_heads, n_layers=n_enc)
    logits_pad = decoder_stack(H, Y, prepped["dec"], prepped["out_proj_t"],
                               n_heads=n_heads, n_layers=n_dec)
    return logits_pad[:, :output_vocab_size]


# ----------------------------------------------------------------------------
# Main
# ----------------------------------------------------------------------------

if __name__ == "__main__":
    d_model = 32
    n_heads = 4
    n_encoder_blocks = 2
    n_decoder_blocks = 2
    input_vocab_size = 16
    output_vocab_size = 16
    src_len = 8
    tgt_len = 8

    key = jax.random.PRNGKey(0)
    kp, ks, kt = jax.random.split(key, 3)

    params = init_transformer_params(
        kp, input_vocab_size, output_vocab_size,
        n_encoder_blocks, n_decoder_blocks, n_heads, d_model)
    prepped = prepare_params(params, d_model, output_vocab_size)

    src_tokens = jax.random.randint(ks, (src_len,), 0, input_vocab_size)
    tgt_tokens = jax.random.randint(kt, (tgt_len,), 0, output_vocab_size)

    fwd = jax.jit(functools.partial(
        transformer_forward, d_model=d_model, n_heads=n_heads,
        n_enc=n_encoder_blocks, n_dec=n_decoder_blocks,
        output_vocab_size=output_vocab_size))
    out = fwd(prepped, src_tokens, tgt_tokens)
    jax.block_until_ready(out)

    assert out.shape == (tgt_len, output_vocab_size)
    assert bool(jnp.all(jnp.isfinite(out)))
    print("KERNEL_OK")
</pallas_src>

<mosaic_0001>
module attributes {stable_mosaic.version = 11 : i64} {
  func.func @_decoder_stack_kernel(%arg0: i32, %arg1: memref<8x32xf32, #tpu.memory_space<vmem>>, %arg2: memref<8x32xf32, #tpu.memory_space<vmem>>, %arg3: memref<1x32x32xbf16, #tpu.memory_space<vmem>>, %arg4: memref<1x32x32xbf16, #tpu.memory_space<vmem>>, %arg5: memref<1x32x32xbf16, #tpu.memory_space<vmem>>, %arg6: memref<1x32x32xbf16, #tpu.memory_space<vmem>>, %arg7: memref<1x32x32xbf16, #tpu.memory_space<vmem>>, %arg8: memref<1x32x32xbf16, #tpu.memory_space<vmem>>, %arg9: memref<1x32x32xbf16, #tpu.memory_space<vmem>>, %arg10: memref<1x32x32xbf16, #tpu.memory_space<vmem>>, %arg11: memref<1x32x32xbf16, #tpu.memory_space<vmem>>, %arg12: memref<1x1x32xf32, #tpu.memory_space<vmem>>, %arg13: memref<1x32x32xbf16, #tpu.memory_space<vmem>>, %arg14: memref<1x1x32xf32, #tpu.memory_space<vmem>>, %arg15: memref<32x128xbf16, #tpu.memory_space<vmem>>, %arg16: memref<8x128xf32, #tpu.memory_space<vmem>>, %arg17: memref<8x32xf32, #tpu.memory_space<vmem>>) attributes {dimension_semantics = [#tpu.dimension_semantics<arbitrary>], iteration_bounds = array<i64: 2>, scalar_prefetch = 0 : i64, scratch_operands = 1 : i64, tpu.core_type = #tpu.core_type<tc>, window_params = [{pipeline_mode = #tpu.pipeline_mode<synchronous>, transform_indices = @transform_0, window_bounds = array<i64: 8, 32>}, {pipeline_mode = #tpu.pipeline_mode<synchronous>, transform_indices = @transform_1, window_bounds = array<i64: 8, 32>}, {transform_indices = @transform_2, window_bounds = array<i64: 1, 32, 32>}, {transform_indices = @transform_3, window_bounds = array<i64: 1, 32, 32>}, {transform_indices = @transform_4, window_bounds = array<i64: 1, 32, 32>}, {transform_indices = @transform_5, window_bounds = array<i64: 1, 32, 32>}, {transform_indices = @transform_6, window_bounds = array<i64: 1, 32, 32>}, {transform_indices = @transform_7, window_bounds = array<i64: 1, 32, 32>}, {transform_indices = @transform_8, window_bounds = array<i64: 1, 32, 32>}, {transform_indices = @transform_9, window_bounds = array<i64: 1, 32, 32>}, {transform_indices = @transform_10, window_bounds = array<i64: 1, 32, 32>}, {transform_indices = @transform_11, window_bounds = array<i64: 1, 1, 32>}, {transform_indices = @transform_12, window_bounds = array<i64: 1, 32, 32>}, {transform_indices = @transform_13, window_bounds = array<i64: 1, 1, 32>}, {pipeline_mode = #tpu.pipeline_mode<synchronous>, transform_indices = @transform_14, window_bounds = array<i64: 32, 128>}, {pipeline_mode = #tpu.pipeline_mode<synchronous>, transform_indices = @transform_15, window_bounds = array<i64: 8, 128>}]} {
    %c0_i32 = arith.constant 0 : i32
    %0 = arith.cmpi eq, %arg0, %c0_i32 : i32
    %1 = arith.extui %0 : i1 to i32
    %c0_i32_0 = arith.constant 0 : i32
    %2 = arith.cmpi ne, %1, %c0_i32_0 : i32
    scf.if %2 {
      %c0_112 = arith.constant 0 : index
      %c0_113 = arith.constant 0 : index
      %281 = vector.load %arg2[%c0_112, %c0_113] : memref<8x32xf32, #tpu.memory_space<vmem>>, vector<8x32xf32>
      %c0_114 = arith.constant 0 : index
      %c0_115 = arith.constant 0 : index
      %282 = vector.load %arg17[%c0_114, %c0_115] : memref<8x32xf32, #tpu.memory_space<vmem>>, vector<8x32xf32>
      tpu.vector_store %arg17[%c0_114, %c0_115], %281 {strides = array<i32>} : memref<8x32xf32, #tpu.memory_space<vmem>>, vector<8x32xf32>,
    } else {
    }
    %c0 = arith.constant 0 : index
    %c0_1 = arith.constant 0 : index
    %3 = vector.load %arg1[%c0, %c0_1] : memref<8x32xf32, #tpu.memory_space<vmem>>, vector<8x32xf32>
    %c0_2 = arith.constant 0 : index
    %c0_3 = arith.constant 0 : index
    %4 = vector.load %arg17[%c0_2, %c0_3] : memref<8x32xf32, #tpu.memory_space<vmem>>, vector<8x32xf32>
    %c0_4 = arith.constant 0 : index
    %c0_5 = arith.constant 0 : index
    %c0_6 = arith.constant 0 : index
    %5 = vector.load %arg3[%c0_4, %c0_5, %c0_6] : memref<1x32x32xbf16, #tpu.memory_space<vmem>>, vector<1x32x32xbf16>
    %6 = vector.shape_cast %5 : vector<1x32x32xbf16> to vector<32x32xbf16>
    %c0_7 = arith.constant 0 : index
    %c0_8 = arith.constant 0 : index
    %c0_9 = arith.constant 0 : index
    %7 = vector.load %arg4[%c0_7, %c0_8, %c0_9] : memref<1x32x32xbf16, #tpu.memory_space<vmem>>, vector<1x32x32xbf16>
    %8 = vector.shape_cast %7 : vector<1x32x32xbf16> to vector<32x32xbf16>
    %c0_10 = arith.constant 0 : index
    %c0_11 = arith.constant 0 : index
    %c0_12 = arith.constant 0 : index
    %9 = vector.load %arg5[%c0_10, %c0_11, %c0_12] : memref<1x32x32xbf16, #tpu.memory_space<vmem>>, vector<1x32x32xbf16>
    %10 = vector.shape_cast %9 : vector<1x32x32xbf16> to vector<32x32xbf16>
    %c0_13 = arith.constant 0 : index
    %c0_14 = arith.constant 0 : index
    %c0_15 = arith.constant 0 : index
    %11 = vector.load %arg6[%c0_13, %c0_14, %c0_15] : memref<1x32x32xbf16, #tpu.memory_space<vmem>>, vector<1x32x32xbf16>
    %12 = vector.shape_cast %11 : vector<1x32x32xbf16> to vector<32x32xbf16>
    %13 = arith.truncf %4 : vector<8x32xf32> to vector<8x32xbf16>
    %14 = arith.truncf %4 : vector<8x32xf32> to vector<8x32xbf16>
    %cst = arith.constant dense<0.000000e+00> : vector<8x32xf32>
    %15 = tpu.matmul %13, %6, %cst {dimension_numbers = #tpu.dot_dimension_numbers<[1], [0], [0], [1], [0, 0, 1, 1], [], []>} : vector<8x32xbf16>, vector<32x32xbf16>, vector<8x32xf32> -> vector<8x32xf32>
    %cst_16 = arith.constant dense<0.000000e+00> : vector<8x32xf32>
    %16 = tpu.matmul %14, %8, %cst_16 {dimension_numbers = #tpu.dot_dimension_numbers<[1], [0], [0], [1], [0, 0, 1, 1], [], []>} : vector<8x32xbf16>, vector<32x32xbf16>, vector<8x32xf32> -> vector<8x32xf32>
    %cst_17 = arith.constant dense<0.000000e+00> : vector<8x32xf32>
    %17 = tpu.matmul %14, %10, %cst_17 {dimension_numbers = #tpu.dot_dimension_numbers<[1], [0], [0], [1], [0, 0, 1, 1], [], []>} : vector<8x32xbf16>, vector<32x32xbf16>, vector<8x32xf32> -> vector<8x32xf32>
    %18 = tpu.iota {dimensions = array<i32: 0>} : vector<8x8xi32>
    %19 = tpu.iota {dimensions = array<i32: 1>} : vector<8x8xi32>
    %20 = arith.cmpi sle, %19, %18 : vector<8x8xi32>
    %21 = vector.extract_strided_slice %15 {offsets = [0, 0], sizes = [8, 8], strides = [1, 1]} : vector<8x32xf32> to vector<8x8xf32>
    %22 = arith.truncf %21 : vector<8x8xf32> to vector<8x8xbf16>
    %23 = vector.extract_strided_slice %16 {offsets = [0, 0], sizes = [8, 8], strides = [1, 1]} : vector<8x32xf32> to vector<8x8xf32>
    %24 = arith.truncf %23 : vector<8x8xf32> to vector<8x8xbf16>
    %25 = vector.extract_strided_slice %17 {offsets = [0, 0], sizes = [8, 8], strides = [1, 1]} : vector<8x32xf32> to vector<8x8xf32>
    %26 = arith.truncf %25 : vector<8x8xf32> to vector<8x8xbf16>
    %cst_18 = arith.constant dense<0.000000e+00> : vector<8x8xf32>
    %27 = tpu.matmul %22, %24, %cst_18 {dimension_numbers = #tpu.dot_dimension_numbers<[1], [1], [0], [0], [0, 0, 1, 0], [], []>} : vector<8x8xbf16>, vector<8x8xbf16>, vector<8x8xf32> -> vector<8x8xf32>
    %cst_19 = arith.constant 0.353553385 : f32
    %28 = vector.broadcast %cst_19 : f32 to vector<8x8xf32>
    %29 = arith.mulf %27, %28 : vector<8x8xf32>
    %cst_20 = arith.constant -1.000000e+30 : f32
    %30 = vector.broadcast %cst_20 : f32 to vector<8x8xf32>
    %31 = arith.select %20, %29, %30 : vector<8x8xi1>, vector<8x8xf32>
    %cst_21 = arith.constant dense<0xFF800000> : vector<8xf32>
    %32 = vector.multi_reduction <maximumf>, %31, %cst_21 [1] : vector<8x8xf32> to vector<8xf32>
    %33 = vector.shape_cast %32 : vector<8xf32> to vector<8x1xf32>
    %34 = vector.broadcast %33 : vector<8x1xf32> to vector<8x8xf32>
    %35 = arith.subf %31, %34 : vector<8x8xf32>
    %36 = math.exp %35 : vector<8x8xf32>
    %cst_22 = arith.constant dense<0.000000e+00> : vector<8xf32>
    %37 = vector.multi_reduction <add>, %36, %cst_22 [1] : vector<8x8xf32> to vector<8xf32>
    %38 = vector.shape_cast %37 : vector<8xf32> to vector<8x1xf32>
    %39 = vector.broadcast %38 : vector<8x1xf32> to vector<8x8xf32>
    %40 = arith.divf %36, %39 : vector<8x8xf32>
    %41 = arith.truncf %40 : vector<8x8xf32> to vector<8x8xbf16>
    %cst_23 = arith.constant dense<0.000000e+00> : vector<8x8xf32>
    %42 = tpu.matmul %41, %26, %cst_23 {dimension_numbers = #tpu.dot_dimension_numbers<[1], [0], [0], [1], [0, 0, 1, 1], [], []>} : vector<8x8xbf16>, vector<8x8xbf16>, vector<8x8xf32> -> vector<8x8xf32>
    %43 = vector.extract_strided_slice %15 {offsets = [0, 8], sizes = [8, 8], strides = [1, 1]} : vector<8x32xf32> to vector<8x8xf32>
    %44 = arith.truncf %43 : vector<8x8xf32> to vector<8x8xbf16>
    %45 = vector.extract_strided_slice %16 {offsets = [0, 8], sizes = [8, 8], strides = [1, 1]} : vector<8x32xf32> to vector<8x8xf32>
    %46 = arith.truncf %45 : vector<8x8xf32> to vector<8x8xbf16>
    %47 = vector.extract_strided_slice %17 {offsets = [0, 8], sizes = [8, 8], strides = [1, 1]} : vector<8x32xf32> to vector<8x8xf32>
    %48 = arith.truncf %47 : vector<8x8xf32> to vector<8x8xbf16>
    %cst_24 = arith.constant dense<0.000000e+00> : vector<8x8xf32>
    %49 = tpu.matmul %44, %46, %cst_24 {dimension_numbers = #tpu.dot_dimension_numbers<[1], [1], [0], [0], [0, 0, 1, 0], [], []>} : vector<8x8xbf16>, vector<8x8xbf16>, vector<8x8xf32> -> vector<8x8xf32>
    %cst_25 = arith.constant 0.353553385 : f32
    %50 = vector.broadcast %cst_25 : f32 to vector<8x8xf32>
    %51 = arith.mulf %49, %50 : vector<8x8xf32>
    %cst_26 = arith.constant -1.000000e+30 : f32
    %52 = vector.broadcast %cst_26 : f32 to vector<8x8xf32>
    %53 = arith.select %20, %51, %52 : vector<8x8xi1>, vector<8x8xf32>
    %cst_27 = arith.constant dense<0xFF800000> : vector<8xf32>
    %54 = vector.multi_reduction <maximumf>, %53, %cst_27 [1] : vector<8x8xf32> to vector<8xf32>
    %55 = vector.shape_cast %54 : vector<8xf32> to vector<8x1xf32>
    %56 = vector.broadcast %55 : vector<8x1xf32> to vector<8x8xf32>
    %57 = arith.subf %53, %56 : vector<8x8xf32>
    %58 = math.exp %57 : vector<8x8xf32>
    %cst_28 = arith.constant dense<0.000000e+00> : vector<8xf32>
    %59 = vector.multi_reduction <add>, %58, %cst_28 [1] : vector<8x8xf32> to vector<8xf32>
    %60 = vector.shape_cast %59 : vector<8xf32> to vector<8x1xf32>
    %61 = vector.broadcast %60 : vector<8x1xf32> to vector<8x8xf32>
    %62 = arith.divf %58, %61 : vector<8x8xf32>
    %63 = arith.truncf %62 : vector<8x8xf32> to vector<8x8xbf16>
    %cst_29 = arith.constant dense<0.000000e+00> : vector<8x8xf32>
    %64 = tpu.matmul %63, %48, %cst_29 {dimension_numbers = #tpu.dot_dimension_numbers<[1], [0], [0], [1], [0, 0, 1, 1], [], []>} : vector<8x8xbf16>, vector<8x8xbf16>, vector<8x8xf32> -> vector<8x8xf32>
    %65 = vector.extract_strided_slice %15 {offsets = [0, 16], sizes = [8, 8], strides = [1, 1]} : vector<8x32xf32> to vector<8x8xf32>
    %66 = arith.truncf %65 : vector<8x8xf32> to vector<8x8xbf16>
    %67 = vector.extract_strided_slice %16 {offsets = [0, 16], sizes = [8, 8], strides = [1, 1]} : vector<8x32xf32> to vector<8x8xf32>
    %68 = arith.truncf %67 : vector<8x8xf32> to vector<8x8xbf16>
    %69 = vector.extract_strided_slice %17 {offsets = [0, 16], sizes = [8, 8], strides = [1, 1]} : vector<8x32xf32> to vector<8x8xf32>
    %70 = arith.truncf %69 : vector<8x8xf32> to vector<8x8xbf16>
    %cst_30 = arith.constant dense<0.000000e+00> : vector<8x8xf32>
    %71 = tpu.matmul %66, %68, %cst_30 {dimension_numbers = #tpu.dot_dimension_numbers<[1], [1], [0], [0], [0, 0, 1, 0], [], []>} : vector<8x8xbf16>, vector<8x8xbf16>, vector<8x8xf32> -> vector<8x8xf32>
    %cst_31 = arith.constant 0.353553385 : f32
    %72 = vector.broadcast %cst_31 : f32 to vector<8x8xf32>
    %73 = arith.mulf %71, %72 : vector<8x8xf32>
    %cst_32 = arith.constant -1.000000e+30 : f32
    %74 = vector.broadcast %cst_32 : f32 to vector<8x8xf32>
    %75 = arith.select %20, %73, %74 : vector<8x8xi1>, vector<8x8xf32>
    %cst_33 = arith.constant dense<0xFF800000> : vector<8xf32>
    %76 = vector.multi_reduction <maximumf>, %75, %cst_33 [1] : vector<8x8xf32> to vector<8xf32>
    %77 = vector.shape_cast %76 : vector<8xf32> to vector<8x1xf32>
    %78 = vector.broadcast %77 : vector<8x1xf32> to vector<8x8xf32>
    %79 = arith.subf %75, %78 : vector<8x8xf32>
    %80 = math.exp %79 : vector<8x8xf32>
    %cst_34 = arith.constant dense<0.000000e+00> : vector<8xf32>
    %81 = vector.multi_reduction <add>, %80, %cst_34 [1] : vector<8x8xf32> to vector<8xf32>
    %82 = vector.shape_cast %81 : vector<8xf32> to vector<8x1xf32>
    %83 = vector.broadcast %82 : vector<8x1xf32> to vector<8x8xf32>
    %84 = arith.divf %80, %83 : vector<8x8xf32>
    %85 = arith.truncf %84 : vector<8x8xf32> to vector<8x8xbf16>
    %cst_35 = arith.constant dense<0.000000e+00> : vector<8x8xf32>
    %86 = tpu.matmul %85, %70, %cst_35 {dimension_numbers = #tpu.dot_dimension_numbers<[1], [0], [0], [1], [0, 0, 1, 1], [], []>} : vector<8x8xbf16>, vector<8x8xbf16>, vector<8x8xf32> -> vector<8x8xf32>
    %87 = vector.extract_strided_slice %15 {offsets = [0, 24], sizes = [8, 8], strides = [1, 1]} : vector<8x32xf32> to vector<8x8xf32>
    %88 = arith.truncf %87 : vector<8x8xf32> to vector<8x8xbf16>
    %89 = vector.extract_strided_slice %16 {offsets = [0, 24], sizes = [8, 8], strides = [1, 1]} : vector<8x32xf32> to vector<8x8xf32>
    %90 = arith.truncf %89 : vector<8x8xf32> to vector<8x8xbf16>
    %91 = vector.extract_strided_slice %17 {offsets = [0, 24], sizes = [8, 8], strides = [1, 1]} : vector<8x32xf32> to vector<8x8xf32>
    %92 = arith.truncf %91 : vector<8x8xf32> to vector<8x8xbf16>
    %cst_36 = arith.constant dense<0.000000e+00> : vector<8x8xf32>
    %93 = tpu.matmul %88, %90, %cst_36 {dimension_numbers = #tpu.dot_dimension_numbers<[1], [1], [0], [0], [0, 0, 1, 0], [], []>} : vector<8x8xbf16>, vector<8x8xbf16>, vector<8x8xf32> -> vector<8x8xf32>
    %cst_37 = arith.constant 0.353553385 : f32
    %94 = vector.broadcast %cst_37 : f32 to vector<8x8xf32>
    %95 = arith.mulf %93, %94 : vector<8x8xf32>
    %cst_38 = arith.constant -1.000000e+30 : f32
    %96 = vector.broadcast %cst_38 : f32 to vector<8x8xf32>
    %97 = arith.select %20, %95, %96 : vector<8x8xi1>, vector<8x8xf32>
    %cst_39 = arith.constant dense<0xFF800000> : vector<8xf32>
    %98 = vector.multi_reduction <maximumf>, %97, %cst_39 [1] : vector<8x8xf32> to vector<8xf32>
    %99 = vector.shape_cast %98 : vector<8xf32> to vector<8x1xf32>
    %100 = vector.broadcast %99 : vector<8x1xf32> to vector<8x8xf32>
    %101 = arith.subf %97, %100 : vector<8x8xf32>
    %102 = math.exp %101 : vector<8x8xf32>
    %cst_40 = arith.constant dense<0.000000e+00> : vector<8xf32>
    %103 = vector.multi_reduction <add>, %102, %cst_40 [1] : vector<8x8xf32> to vector<8xf32>
    %104 = vector.shape_cast %103 : vector<8xf32> to vector<8x1xf32>
    %105 = vector.broadcast %104 : vector<8x1xf32> to vector<8x8xf32>
    %106 = arith.divf %102, %105 : vector<8x8xf32>
    %107 = arith.truncf %106 : vector<8x8xf32> to vector<8x8xbf16>
    %cst_41 = arith.constant dense<0.000000e+00> : vector<8x8xf32>
    %108 = tpu.matmul %107, %92, %cst_41 {dimension_numbers = #tpu.dot_dimension_numbers<[1], [0], [0], [1], [0, 0, 1, 1], [], []>} : vector<8x8xbf16>, vector<8x8xbf16>, vector<8x8xf32> -> vector<8x8xf32>
    %109 = tpu.concatenate %42, %64, %86, %108 in 1 : vector<8x8xf32>, vector<8x8xf32>, vector<8x8xf32>, vector<8x8xf32> -> vector<8x32xf32>
    %110 = arith.truncf %109 : vector<8x32xf32> to vector<8x32xbf16>
    %cst_42 = arith.constant dense<0.000000e+00> : vector<8x32xf32>
    %111 = tpu.matmul %110, %12, %cst_42 {dimension_numbers = #tpu.dot_dimension_numbers<[1], [0], [0], [1], [0, 0, 1, 1], [], []>} : vector<8x32xbf16>, vector<32x32xbf16>, vector<8x32xf32> -> vector<8x32xf32>
    %112 = arith.addf %111, %4 : vector<8x32xf32>
    %cst_43 = arith.constant dense<0.000000e+00> : vector<8xf32>
    %113 = vector.multi_reduction <add>, %112, %cst_43 [1] : vector<8x32xf32> to vector<8xf32>
    %114 = vector.shape_cast %113 : vector<8xf32> to vector<8x1xf32>
    %cst_44 = arith.constant 3.200000e+01 : f32
    %115 = vector.broadcast %cst_44 : f32 to vector<8x1xf32>
    %116 = arith.divf %114, %115 : vector<8x1xf32>
    %117 = vector.broadcast %116 : vector<8x1xf32> to vector<8x32xf32>
    %118 = arith.subf %112, %117 : vector<8x32xf32>
    %119 = arith.mulf %118, %118 : vector<8x32xf32>
    %cst_45 = arith.constant dense<0.000000e+00> : vector<8xf32>
    %120 = vector.multi_reduction <add>, %119, %cst_45 [1] : vector<8x32xf32> to vector<8xf32>
    %121 = vector.shape_cast %120 : vector<8xf32> to vector<8x1xf32>
    %cst_46 = arith.constant 3.200000e+01 : f32
    %122 = vector.broadcast %cst_46 : f32 to vector<8x1xf32>
    %123 = arith.divf %121, %122 : vector<8x1xf32>
    %cst_47 = arith.constant 9.99999974E-6 : f32
    %124 = vector.broadcast %cst_47 : f32 to vector<8x1xf32>
    %125 = arith.addf %123, %124 : vector<8x1xf32>
    %126 = math.rsqrt %125 : vector<8x1xf32>
    %127 = vector.broadcast %126 : vector<8x1xf32> to vector<8x32xf32>
    %128 = arith.mulf %118, %127 : vector<8x32xf32>
    %c0_48 = arith.constant 0 : index
    %c0_49 = arith.constant 0 : index
    %c0_50 = arith.constant 0 : index
    %129 = vector.load %arg7[%c0_48, %c0_49, %c0_50] : memref<1x32x32xbf16, #tpu.memory_space<vmem>>, vector<1x32x32xbf16>
    %130 = vector.shape_cast %129 : vector<1x32x32xbf16> to vector<32x32xbf16>
    %c0_51 = arith.constant 0 : index
    %c0_52 = arith.constant 0 : index
    %c0_53 = arith.constant 0 : index
    %131 = vector.load %arg8[%c0_51, %c0_52, %c0_53] : memref<1x32x32xbf16, #tpu.memory_space<vmem>>, vector<1x32x32xbf16>
    %132 = vector.shape_cast %131 : vector<1x32x32xbf16> to vector<32x32xbf16>
    %c0_54 = arith.constant 0 : index
    %c0_55 = arith.constant 0 : index
    %c0_56 = arith.constant 0 : index
    %133 = vector.load %arg9[%c0_54, %c0_55, %c0_56] : memref<1x32x32xbf16, #tpu.memory_space<vmem>>, vector<1x32x32xbf16>
    %134 = vector.shape_cast %133 : vector<1x32x32xbf16> to vector<32x32xbf16>
    %c0_57 = arith.constant 0 : index
    %c0_58 = arith.constant 0 : index
    %c0_59 = arith.constant 0 : index
    %135 = vector.load %arg10[%c0_57, %c0_58, %c0_59] : memref<1x32x32xbf16, #tpu.memory_space<vmem>>, vector<1x32x32xbf16>
    %136 = vector.shape_cast %135 : vector<1x32x32xbf16> to vector<32x32xbf16>
    %137 = arith.truncf %128 : vector<8x32xf32> to vector<8x32xbf16>
    %138 = arith.truncf %3 : vector<8x32xf32> to vector<8x32xbf16>
    %cst_60 = arith.constant dense<0.000000e+00> : vector<8x32xf32>
    %139 = tpu.matmul %137, %130, %cst_60 {dimension_numbers = #tpu.dot_dimension_numbers<[1], [0], [0], [1], [0, 0, 1, 1], [], []>} : vector<8x32xbf16>, vector<32x32xbf16>, vector<8x32xf32> -> vector<8x32xf32>
    %cst_61 = arith.constant dense<0.000000e+00> : vector<8x32xf32>
    %140 = tpu.matmul %138, %132, %cst_61 {dimension_numbers = #tpu.dot_dimension_numbers<[1], [0], [0], [1], [0, 0, 1, 1], [], []>} : vector<8x32xbf16>, vector<32x32xbf16>, vector<8x32xf32> -> vector<8x32xf32>
    %cst_62 = arith.constant dense<0.000000e+00> : vector<8x32xf32>
    %141 = tpu.matmul %138, %134, %cst_62 {dimension_numbers = #tpu.dot_dimension_numbers<[1], [0], [0], [1], [0, 0, 1, 1], [], []>} : vector<8x32xbf16>, vector<32x32xbf16>, vector<8x32xf32> -> vector<8x32xf32>
    %142 = vector.extract_strided_slice %139 {offsets = [0, 0], sizes = [8, 8], strides = [1, 1]} : vector<8x32xf32> to vector<8x8xf32>
    %143 = arith.truncf %142 : vector<8x8xf32> to vector<8x8xbf16>
    %144 = vector.extract_strided_slice %140 {offsets = [0, 0], sizes = [8, 8], strides = [1, 1]} : vector<8x32xf32> to vector<8x8xf32>
    %145 = arith.truncf %144 : vector<8x8xf32> to vector<8x8xbf16>
    %146 = vector.extract_strided_slice %141 {offsets = [0, 0], sizes = [8, 8], strides = [1, 1]} : vector<8x32xf32> to vector<8x8xf32>
    %147 = arith.truncf %146 : vector<8x8xf32> to vector<8x8xbf16>
    %cst_63 = arith.constant dense<0.000000e+00> : vector<8x8xf32>
    %148 = tpu.matmul %143, %145, %cst_63 {dimension_numbers = #tpu.dot_dimension_numbers<[1], [1], [0], [0], [0, 0, 1, 0], [], []>} : vector<8x8xbf16>, vector<8x8xbf16>, vector<8x8xf32> -> vector<8x8xf32>
    %cst_64 = arith.constant 0.353553385 : f32
    %149 = vector.broadcast %cst_64 : f32 to vector<8x8xf32>
    %150 = arith.mulf %148, %149 : vector<8x8xf32>
    %cst_65 = arith.constant dense<0xFF800000> : vector<8xf32>
    %151 = vector.multi_reduction <maximumf>, %150, %cst_65 [1] : vector<8x8xf32> to vector<8xf32>
    %152 = vector.shape_cast %151 : vector<8xf32> to vector<8x1xf32>
    %153 = vector.broadcast %152 : vector<8x1xf32> to vector<8x8xf32>
    %154 = arith.subf %150, %153 : vector<8x8xf32>
    %155 = math.exp %154 : vector<8x8xf32>
    %cst_66 = arith.constant dense<0.000000e+00> : vector<8xf32>
    %156 = vector.multi_reduction <add>, %155, %cst_66 [1] : vector<8x8xf32> to vector<8xf32>
    %157 = vector.shape_cast %156 : vector<8xf32> to vector<8x1xf32>
    %158 = vector.broadcast %157 : vector<8x1xf32> to vector<8x8xf32>
    %159 = arith.divf %155, %158 : vector<8x8xf32>
    %160 = arith.truncf %159 : vector<8x8xf32> to vector<8x8xbf16>
    %cst_67 = arith.constant dense<0.000000e+00> : vector<8x8xf32>
    %161 = tpu.matmul %160, %147, %cst_67 {dimension_numbers = #tpu.dot_dimension_numbers<[1], [0], [0], [1], [0, 0, 1, 1], [], []>} : vector<8x8xbf16>, vector<8x8xbf16>, vector<8x8xf32> -> vector<8x8xf32>
    %162 = vector.extract_strided_slice %139 {offsets = [0, 8], sizes = [8, 8], strides = [1, 1]} : vector<8x32xf32> to vector<8x8xf32>
    %163 = arith.truncf %162 : vector<8x8xf32> to vector<8x8xbf16>
    %164 = vector.extract_strided_slice %140 {offsets = [0, 8], sizes = [8, 8], strides = [1, 1]} : vector<8x32xf32> to vector<8x8xf32>
    %165 = arith.truncf %164 : vector<8x8xf32> to vector<8x8xbf16>
    %166 = vector.extract_strided_slice %141 {offsets = [0, 8], sizes = [8, 8], strides = [1, 1]} : vector<8x32xf32> to vector<8x8xf32>
    %167 = arith.truncf %166 : vector<8x8xf32> to vector<8x8xbf16>
    %cst_68 = arith.constant dense<0.000000e+00> : vector<8x8xf32>
    %168 = tpu.matmul %163, %165, %cst_68 {dimension_numbers = #tpu.dot_dimension_numbers<[1], [1], [0], [0], [0, 0, 1, 0], [], []>} : vector<8x8xbf16>, vector<8x8xbf16>, vector<8x8xf32> -> vector<8x8xf32>
    %cst_69 = arith.constant 0.353553385 : f32
    %169 = vector.broadcast %cst_69 : f32 to vector<8x8xf32>
    %170 = arith.mulf %168, %169 : vector<8x8xf32>
    %cst_70 = arith.constant dense<0xFF800000> : vector<8xf32>
    %171 = vector.multi_reduction <maximumf>, %170, %cst_70 [1] : vector<8x8xf32> to vector<8xf32>
    %172 = vector.shape_cast %171 : vector<8xf32> to vector<8x1xf32>
    %173 = vector.broadcast %172 : vector<8x1xf32> to vector<8x8xf32>
    %174 = arith.subf %170, %173 : vector<8x8xf32>
    %175 = math.exp %174 : vector<8x8xf32>
    %cst_71 = arith.constant dense<0.000000e+00> : vector<8xf32>
    %176 = vector.multi_reduction <add>, %175, %cst_71 [1] : vector<8x8xf32> to vector<8xf32>
    %177 = vector.shape_cast %176 : vector<8xf32> to vector<8x1xf32>
    %178 = vector.broadcast %177 : vector<8x1xf32> to vector<8x8xf32>
    %179 = arith.divf %175, %178 : vector<8x8xf32>
    %180 = arith.truncf %179 : vector<8x8xf32> to vector<8x8xbf16>
    %cst_72 = arith.constant dense<0.000000e+00> : vector<8x8xf32>
    %181 = tpu.matmul %180, %167, %cst_72 {dimension_numbers = #tpu.dot_dimension_numbers<[1], [0], [0], [1], [0, 0, 1, 1], [], []>} : vector<8x8xbf16>, vector<8x8xbf16>, vector<8x8xf32> -> vector<8x8xf32>
    %182 = vector.extract_strided_slice %139 {offsets = [0, 16], sizes = [8, 8], strides = [1, 1]} : vector<8x32xf32> to vector<8x8xf32>
    %183 = arith.truncf %182 : vector<8x8xf32> to vector<8x8xbf16>
    %184 = vector.extract_strided_slice %140 {offsets = [0, 16], sizes = [8, 8], strides = [1, 1]} : vector<8x32xf32> to vector<8x8xf32>
    %185 = arith.truncf %184 : vector<8x8xf32> to vector<8x8xbf16>
    %186 = vector.extract_strided_slice %141 {offsets = [0, 16], sizes = [8, 8], strides = [1, 1]} : vector<8x32xf32> to vector<8x8xf32>
    %187 = arith.truncf %186 : vector<8x8xf32> to vector<8x8xbf16>
    %cst_73 = arith.constant dense<0.000000e+00> : vector<8x8xf32>
    %188 = tpu.matmul %183, %185, %cst_73 {dimension_numbers = #tpu.dot_dimension_numbers<[1], [1], [0], [0], [0, 0, 1, 0], [], []>} : vector<8x8xbf16>, vector<8x8xbf16>, vector<8x8xf32> -> vector<8x8xf32>
    %cst_74 = arith.constant 0.353553385 : f32
    %189 = vector.broadcast %cst_74 : f32 to vector<8x8xf32>
    %190 = arith.mulf %188, %189 : vector<8x8xf32>
    %cst_75 = arith.constant dense<0xFF800000> : vector<8xf32>
    %191 = vector.multi_reduction <maximumf>, %190, %cst_75 [1] : vector<8x8xf32> to vector<8xf32>
    %192 = vector.shape_cast %191 : vector<8xf32> to vector<8x1xf32>
    %193 = vector.broadcast %192 : vector<8x1xf32> to vector<8x8xf32>
    %194 = arith.subf %190, %193 : vector<8x8xf32>
    %195 = math.exp %194 : vector<8x8xf32>
    %cst_76 = arith.constant dense<0.000000e+00> : vector<8xf32>
    %196 = vector.multi_reduction <add>, %195, %cst_76 [1] : vector<8x8xf32> to vector<8xf32>
    %197 = vector.shape_cast %196 : vector<8xf32> to vector<8x1xf32>
    %198 = vector.broadcast %197 : vector<8x1xf32> to vector<8x8xf32>
    %199 = arith.divf %195, %198 : vector<8x8xf32>
    %200 = arith.truncf %199 : vector<8x8xf32> to vector<8x8xbf16>
    %cst_77 = arith.constant dense<0.000000e+00> : vector<8x8xf32>
    %201 = tpu.matmul %200, %187, %cst_77 {dimension_numbers = #tpu.dot_dimension_numbers<[1], [0], [0], [1], [0, 0, 1, 1], [], []>} : vector<8x8xbf16>, vector<8x8xbf16>, vector<8x8xf32> -> vector<8x8xf32>
    %202 = vector.extract_strided_slice %139 {offsets = [0, 24], sizes = [8, 8], strides = [1, 1]} : vector<8x32xf32> to vector<8x8xf32>
    %203 = arith.truncf %202 : vector<8x8xf32> to vector<8x8xbf16>
    %204 = vector.extract_strided_slice %140 {offsets = [0, 24], sizes = [8, 8], strides = [1, 1]} : vector<8x32xf32> to vector<8x8xf32>
    %205 = arith.truncf %204 : vector<8x8xf32> to vector<8x8xbf16>
    %206 = vector.extract_strided_slice %141 {offsets = [0, 24], sizes = [8, 8], strides = [1, 1]} : vector<8x32xf32> to vector<8x8xf32>
    %207 = arith.truncf %206 : vector<8x8xf32> to vector<8x8xbf16>
    %cst_78 = arith.constant dense<0.000000e+00> : vector<8x8xf32>
    %208 = tpu.matmul %203, %205, %cst_78 {dimension_numbers = #tpu.dot_dimension_numbers<[1], [1], [0], [0], [0, 0, 1, 0], [], []>} : vector<8x8xbf16>, vector<8x8xbf16>, vector<8x8xf32> -> vector<8x8xf32>
    %cst_79 = arith.constant 0.353553385 : f32
    %209 = vector.broadcast %cst_79 : f32 to vector<8x8xf32>
    %210 = arith.mulf %208, %209 : vector<8x8xf32>
    %cst_80 = arith.constant dense<0xFF800000> : vector<8xf32>
    %211 = vector.multi_reduction <maximumf>, %210, %cst_80 [1] : vector<8x8xf32> to vector<8xf32>
    %212 = vector.shape_cast %211 : vector<8xf32> to vector<8x1xf32>
    %213 = vector.broadcast %212 : vector<8x1xf32> to vector<8x8xf32>
    %214 = arith.subf %210, %213 : vector<8x8xf32>
    %215 = math.exp %214 : vector<8x8xf32>
    %cst_81 = arith.constant dense<0.000000e+00> : vector<8xf32>
    %216 = vector.multi_reduction <add>, %215, %cst_81 [1] : vector<8x8xf32> to vector<8xf32>
    %217 = vector.shape_cast %216 : vector<8xf32> to vector<8x1xf32>
    %218 = vector.broadcast %217 : vector<8x1xf32> to vector<8x8xf32>
    %219 = arith.divf %215, %218 : vector<8x8xf32>
    %220 = arith.truncf %219 : vector<8x8xf32> to vector<8x8xbf16>
    %cst_82 = arith.constant dense<0.000000e+00> : vector<8x8xf32>
    %221 = tpu.matmul %220, %207, %cst_82 {dimension_numbers = #tpu.dot_dimension_numbers<[1], [0], [0], [1], [0, 0, 1, 1], [], []>} : vector<8x8xbf16>, vector<8x8xbf16>, vector<8x8xf32> -> vector<8x8xf32>
    %222 = tpu.concatenate %161, %181, %201, %221 in 1 : vector<8x8xf32>, vector<8x8xf32>, vector<8x8xf32>, vector<8x8xf32> -> vector<8x32xf32>
    %223 = arith.truncf %222 : vector<8x32xf32> to vector<8x32xbf16>
    %cst_83 = arith.constant dense<0.000000e+00> : vector<8x32xf32>
    %224 = tpu.matmul %223, %136, %cst_83 {dimension_numbers = #tpu.dot_dimension_numbers<[1], [0], [0], [1], [0, 0, 1, 1], [], []>} : vector<8x32xbf16>, vector<32x32xbf16>, vector<8x32xf32> -> vector<8x32xf32>
    %225 = arith.addf %224, %128 : vector<8x32xf32>
    %cst_84 = arith.constant dense<0.000000e+00> : vector<8xf32>
    %226 = vector.multi_reduction <add>, %225, %cst_84 [1] : vector<8x32xf32> to vector<8xf32>
    %227 = vector.shape_cast %226 : vector<8xf32> to vector<8x1xf32>
    %cst_85 = arith.constant 3.200000e+01 : f32
    %228 = vector.broadcast %cst_85 : f32 to vector<8x1xf32>
    %229 = arith.divf %227, %228 : vector<8x1xf32>
    %230 = vector.broadcast %229 : vector<8x1xf32> to vector<8x32xf32>
    %231 = arith.subf %225, %230 : vector<8x32xf32>
    %232 = arith.mulf %231, %231 : vector<8x32xf32>
    %cst_86 = arith.constant dense<0.000000e+00> : vector<8xf32>
    %233 = vector.multi_reduction <add>, %232, %cst_86 [1] : vector<8x32xf32> to vector<8xf32>
    %234 = vector.shape_cast %233 : vector<8xf32> to vector<8x1xf32>
    %cst_87 = arith.constant 3.200000e+01 : f32
    %235 = vector.broadcast %cst_87 : f32 to vector<8x1xf32>
    %236 = arith.divf %234, %235 : vector<8x1xf32>
    %cst_88 = arith.constant 9.99999974E-6 : f32
    %237 = vector.broadcast %cst_88 : f32 to vector<8x1xf32>
    %238 = arith.addf %236, %237 : vector<8x1xf32>
    %239 = math.rsqrt %238 : vector<8x1xf32>
    %240 = vector.broadcast %239 : vector<8x1xf32> to vector<8x32xf32>
    %241 = arith.mulf %231, %240 : vector<8x32xf32>
    %c0_89 = arith.constant 0 : index
    %c0_90 = arith.constant 0 : index
    %c0_91 = arith.constant 0 : index
    %242 = vector.load %arg11[%c0_89, %c0_90, %c0_91] : memref<1x32x32xbf16, #tpu.memory_space<vmem>>, vector<1x32x32xbf16>
    %243 = vector.shape_cast %242 : vector<1x32x32xbf16> to vector<32x32xbf16>
    %c0_92 = arith.constant 0 : index
    %c0_93 = arith.constant 0 : index
    %c0_94 = arith.constant 0 : index
    %244 = vector.load %arg12[%c0_92, %c0_93, %c0_94] : memref<1x1x32xf32, #tpu.memory_space<vmem>>, vector<1x1x32xf32>
    %245 = vector.shape_cast %244 : vector<1x1x32xf32> to vector<1x32xf32>
    %c0_95 = arith.constant 0 : index
    %c0_96 = arith.constant 0 : index
    %c0_97 = arith.constant 0 : index
    %246 = vector.load %arg13[%c0_95, %c0_96, %c0_97] : memref<1x32x32xbf16, #tpu.memory_space<vmem>>, vector<1x32x32xbf16>
    %247 = vector.shape_cast %246 : vector<1x32x32xbf16> to vector<32x32xbf16>
    %c0_98 = arith.constant 0 : index
    %c0_99 = arith.constant 0 : index
    %c0_100 = arith.constant 0 : index
    %248 = vector.load %arg14[%c0_98, %c0_99, %c0_100] : memref<1x1x32xf32, #tpu.memory_space<vmem>>, vector<1x1x32xf32>
    %249 = vector.shape_cast %248 : vector<1x1x32xf32> to vector<1x32xf32>
    %250 = arith.truncf %241 : vector<8x32xf32> to vector<8x32xbf16>
    %cst_101 = arith.constant dense<0.000000e+00> : vector<8x32xf32>
    %251 = tpu.matmul %250, %243, %cst_101 {dimension_numbers = #tpu.dot_dimension_numbers<[1], [0], [0], [1], [0, 0, 1, 1], [], []>} : vector<8x32xbf16>, vector<32x32xbf16>, vector<8x32xf32> -> vector<8x32xf32>
    %252 = vector.broadcast %245 : vector<1x32xf32> to vector<8x32xf32>
    %253 = arith.addf %251, %252 : vector<8x32xf32>
    %cst_102 = arith.constant 0.000000e+00 : f32
    %254 = vector.broadcast %cst_102 : f32 to vector<8x32xf32>
    %255 = arith.maximumf %253, %254 : vector<8x32xf32>
    %256 = arith.truncf %255 : vector<8x32xf32> to vector<8x32xbf16>
    %cst_103 = arith.constant dense<0.000000e+00> : vector<8x32xf32>
    %257 = tpu.matmul %256, %247, %cst_103 {dimension_numbers = #tpu.dot_dimension_numbers<[1], [0], [0], [1], [0, 0, 1, 1], [], []>} : vector<8x32xbf16>, vector<32x32xbf16>, vector<8x32xf32> -> vector<8x32xf32>
    %258 = vector.broadcast %249 : vector<1x32xf32> to vector<8x32xf32>
    %259 = arith.addf %257, %258 : vector<8x32xf32>
    %260 = arith.addf %259, %241 : vector<8x32xf32>
    %cst_104 = arith.constant dense<0.000000e+00> : vector<8xf32>
    %261 = vector.multi_reduction <add>, %260, %cst_104 [1] : vector<8x32xf32> to vector<8xf32>
    %262 = vector.shape_cast %261 : vector<8xf32> to vector<8x1xf32>
    %cst_105 = arith.constant 3.200000e+01 : f32
    %263 = vector.broadcast %cst_105 : f32 to vector<8x1xf32>
    %264 = arith.divf %262, %263 : vector<8x1xf32>
    %265 = vector.broadcast %264 : vector<8x1xf32> to vector<8x32xf32>
    %266 = arith.subf %260, %265 : vector<8x32xf32>
    %267 = arith.mulf %266, %266 : vector<8x32xf32>
    %cst_106 = arith.constant dense<0.000000e+00> : vector<8xf32>
    %268 = vector.multi_reduction <add>, %267, %cst_106 [1] : vector<8x32xf32> to vector<8xf32>
    %269 = vector.shape_cast %268 : vector<8xf32> to vector<8x1xf32>
    %cst_107 = arith.constant 3.200000e+01 : f32
    %270 = vector.broadcast %cst_107 : f32 to vector<8x1xf32>
    %271 = arith.divf %269, %270 : vector<8x1xf32>
    %cst_108 = arith.constant 9.99999974E-6 : f32
    %272 = vector.broadcast %cst_108 : f32 to vector<8x1xf32>
    %273 = arith.addf %271, %272 : vector<8x1xf32>
    %274 = math.rsqrt %273 : vector<8x1xf32>
    %275 = vector.broadcast %274 : vector<8x1xf32> to vector<8x32xf32>
    %276 = arith.mulf %266, %275 : vector<8x32xf32>
    %c0_109 = arith.constant 0 : index
    %c0_110 = arith.constant 0 : index
    %277 = vector.load %arg17[%c0_109, %c0_110] : memref<8x32xf32, #tpu.memory_space<vmem>>, vector<8x32xf32>
    tpu.vector_store %arg17[%c0_109, %c0_110], %276 {strides = array<i32>} : memref<8x32xf32, #tpu.memory_space<vmem>>, vector<8x32xf32>,
    %c1_i32 = arith.constant 1 : i32
    %278 = arith.cmpi eq, %arg0, %c1_i32 : i32
    %279 = arith.extui %278 : i1 to i32
    %c0_i32_111 = arith.constant 0 : i32
    %280 = arith.cmpi ne, %279, %c0_i32_111 : i32
    scf.if %280 {
      %281 = arith.truncf %276 : vector<8x32xf32> to vector<8x32xbf16>
      %c0_112 = arith.constant 0 : index
      %c0_113 = arith.constant 0 : index
      %282 = vector.load %arg15[%c0_112, %c0_113] : memref<32x128xbf16, #tpu.memory_space<vmem>>, vector<32x128xbf16>
      %cst_114 = arith.constant dense<0.000000e+00> : vector<8x128xf32>
      %283 = tpu.matmul %281, %282, %cst_114 {dimension_numbers = #tpu.dot_dimension_numbers<[1], [0], [0], [1], [0, 0, 1, 1], [], []>} : vector<8x32xbf16>, vector<32x128xbf16>, vector<8x128xf32> -> vector<8x128xf32>
      %c0_115 = arith.constant 0 : index
      %c0_116 = arith.constant 0 : index
      %284 = vector.load %arg16[%c0_115, %c0_116] : memref<8x128xf32, #tpu.memory_space<vmem>>, vector<8x128xf32>
      tpu.vector_store %arg16[%c0_115, %c0_116], %283 {strides = array<i32>} : memref<8x128xf32, #tpu.memory_space<vmem>>, vector<8x128xf32>,
    } else {
    }
    return
  }
  func.func @transform_0(%arg0: i32) -> (i32, i32) {
    %c0_i32 = arith.constant 0 : i32
    %c0_i32_0 = arith.constant 0 : i32
    %c0_i32_1 = arith.constant 0 : i32
    return %c0_i32, %c0_i32_0 : i32, i32
  }
  func.func @transform_1(%arg0: i32) -> (i32, i32) {
    %c0_i32 = arith.constant 0 : i32
    %c0_i32_0 = arith.constant 0 : i32
    %c0_i32_1 = arith.constant 0 : i32
    return %c0_i32, %c0_i32_0 : i32, i32
  }
  func.func @transform_2(%arg0: i32) -> (i32, i32, i32) {
    %c0_i32 = arith.constant 0 : i32
    %c0_i32_0 = arith.constant 0 : i32
    %c0_i32_1 = arith.constant 0 : i32
    return %arg0, %c0_i32, %c0_i32_0 : i32, i32, i32
  }
  func.func @transform_3(%arg0: i32) -> (i32, i32, i32) {
    %c0_i32 = arith.constant 0 : i32
    %c0_i32_0 = arith.constant 0 : i32
    %c0_i32_1 = arith.constant 0 : i32
    return %arg0, %c0_i32, %c0_i32_0 : i32, i32, i32
  }
  func.func @transform_4(%arg0: i32) -> (i32, i32, i32) {
    %c0_i32 = arith.constant 0 : i32
    %c0_i32_0 = arith.constant 0 : i32
    %c0_i32_1 = arith.constant 0 : i32
    return %arg0, %c0_i32, %c0_i32_0 : i32, i32, i32
  }
  func.func @transform_5(%arg0: i32) -> (i32, i32, i32) {
    %c0_i32 = arith.constant 0 : i32
    %c0_i32_0 = arith.constant 0 : i32
    %c0_i32_1 = arith.constant 0 : i32
    return %arg0, %c0_i32, %c0_i32_0 : i32, i32, i32
  }
  func.func @transform_6(%arg0: i32) -> (i32, i32, i32) {
    %c0_i32 = arith.constant 0 : i32
    %c0_i32_0 = arith.constant 0 : i32
    %c0_i32_1 = arith.constant 0 : i32
    return %arg0, %c0_i32, %c0_i32_0 : i32, i32, i32
  }
  func.func @transform_7(%arg0: i32) -> (i32, i32, i32) {
    %c0_i32 = arith.constant 0 : i32
    %c0_i32_0 = arith.constant 0 : i32
    %c0_i32_1 = arith.constant 0 : i32
    return %arg0, %c0_i32, %c0_i32_0 : i32, i32, i32
  }
  func.func @transform_8(%arg0: i32) -> (i32, i32, i32) {
    %c0_i32 = arith.constant 0 : i32
    %c0_i32_0 = arith.constant 0 : i32
    %c0_i32_1 = arith.constant 0 : i32
    return %arg0, %c0_i32, %c0_i32_0 : i32, i32, i32
  }
  func.func @transform_9(%arg0: i32) -> (i32, i32, i32) {
    %c0_i32 = arith.constant 0 : i32
    %c0_i32_0 = arith.constant 0 : i32
    %c0_i32_1 = arith.constant 0 : i32
    return %arg0, %c0_i32, %c0_i32_0 : i32, i32, i32
  }
  func.func @transform_10(%arg0: i32) -> (i32, i32, i32) {
    %c0_i32 = arith.constant 0 : i32
    %c0_i32_0 = arith.constant 0 : i32
    %c0_i32_1 = arith.constant 0 : i32
    return %arg0, %c0_i32, %c0_i32_0 : i32, i32, i32
  }
  func.func @transform_11(%arg0: i32) -> (i32, i32, i32) {
    %c0_i32 = arith.constant 0 : i32
    %c0_i32_0 = arith.constant 0 : i32
    %c0_i32_1 = arith.constant 0 : i32
    return %arg0, %c0_i32, %c0_i32_0 : i32, i32, i32
  }
  func.func @transform_12(%arg0: i32) -> (i32, i32, i32) {
    %c0_i32 = arith.constant 0 : i32
    %c0_i32_0 = arith.constant 0 : i32
    %c0_i32_1 = arith.constant 0 : i32
    return %arg0, %c0_i32, %c0_i32_0 : i32, i32, i32
  }
  func.func @transform_13(%arg0: i32) -> (i32, i32, i32) {
    %c0_i32 = arith.constant 0 : i32
    %c0_i32_0 = arith.constant 0 : i32
    %c0_i32_1 = arith.constant 0 : i32
    return %arg0, %c0_i32, %c0_i32_0 : i32, i32, i32
  }
  func.func @transform_14(%arg0: i32) -> (i32, i32) {
    %c0_i32 = arith.constant 0 : i32
    %c0_i32_0 = arith.constant 0 : i32
    %c0_i32_1 = arith.constant 0 : i32
    return %c0_i32, %c0_i32_0 : i32, i32
  }
  func.func @transform_15(%arg0: i32) -> (i32, i32) {
    %c0_i32 = arith.constant 0 : i32
    %c0_i32_0 = arith.constant 0 : i32
    %c0_i32_1 = arith.constant 0 : i32
    return %c0_i32, %c0_i32_0 : i32, i32
  }
}

module attributes {stable_mosaic.version = 11 : i64} {
  func.func @_encoder_stack_kernel(%arg0: i32, %arg1: memref<8x32xf32, #tpu.memory_space<vmem>>, %arg2: memref<1x32x32xbf16, #tpu.memory_space<vmem>>, %arg3: memref<1x32x32xbf16, #tpu.memory_space<vmem>>, %arg4: memref<1x32x32xbf16, #tpu.memory_space<vmem>>, %arg5: memref<1x32x32xbf16, #tpu.memory_space<vmem>>, %arg6: memref<1x32x32xbf16, #tpu.memory_space<vmem>>, %arg7: memref<1x1x32xf32, #tpu.memory_space<vmem>>, %arg8: memref<1x32x32xbf16, #tpu.memory_space<vmem>>, %arg9: memref<1x1x32xf32, #tpu.memory_space<vmem>>, %arg10: memref<8x32xf32, #tpu.memory_space<vmem>>, %arg11: memref<8x32xf32, #tpu.memory_space<vmem>>) attributes {dimension_semantics = [#tpu.dimension_semantics<arbitrary>], iteration_bounds = array<i64: 2>, scalar_prefetch = 0 : i64, scratch_operands = 1 : i64, tpu.core_type = #tpu.core_type<tc>, window_params = [{pipeline_mode = #tpu.pipeline_mode<synchronous>, transform_indices = @transform_0, window_bounds = array<i64: 8, 32>}, {transform_indices = @transform_1, window_bounds = array<i64: 1, 32, 32>}, {transform_indices = @transform_2, window_bounds = array<i64: 1, 32, 32>}, {transform_indices = @transform_3, window_bounds = array<i64: 1, 32, 32>}, {transform_indices = @transform_4, window_bounds = array<i64: 1, 32, 32>}, {transform_indices = @transform_5, window_bounds = array<i64: 1, 32, 32>}, {transform_indices = @transform_6, window_bounds = array<i64: 1, 1, 32>}, {transform_indices = @transform_7, window_bounds = array<i64: 1, 32, 32>}, {transform_indices = @transform_8, window_bounds = array<i64: 1, 1, 32>}, {pipeline_mode = #tpu.pipeline_mode<synchronous>, transform_indices = @transform_9, window_bounds = array<i64: 8, 32>}]} {
    %c0_i32 = arith.constant 0 : i32
    %0 = arith.cmpi eq, %arg0, %c0_i32 : i32
    %1 = arith.extui %0 : i1 to i32
    %c0_i32_0 = arith.constant 0 : i32
    %2 = arith.cmpi ne, %1, %c0_i32_0 : i32
    scf.if %2 {
      %c0_65 = arith.constant 0 : index
      %c0_66 = arith.constant 0 : index
      %156 = vector.load %arg1[%c0_65, %c0_66] : memref<8x32xf32, #tpu.memory_space<vmem>>, vector<8x32xf32>
      %c0_67 = arith.constant 0 : index
      %c0_68 = arith.constant 0 : index
      %157 = vector.load %arg11[%c0_67, %c0_68] : memref<8x32xf32, #tpu.memory_space<vmem>>, vector<8x32xf32>
      tpu.vector_store %arg11[%c0_67, %c0_68], %156 {strides = array<i32>} : memref<8x32xf32, #tpu.memory_space<vmem>>, vector<8x32xf32>,
    } else {
    }
    %c0 = arith.constant 0 : index
    %c0_1 = arith.constant 0 : index
    %3 = vector.load %arg11[%c0, %c0_1] : memref<8x32xf32, #tpu.memory_space<vmem>>, vector<8x32xf32>
    %c0_2 = arith.constant 0 : index
    %c0_3 = arith.constant 0 : index
    %c0_4 = arith.constant 0 : index
    %4 = vector.load %arg2[%c0_2, %c0_3, %c0_4] : memref<1x32x32xbf16, #tpu.memory_space<vmem>>, vector<1x32x32xbf16>
    %5 = vector.shape_cast %4 : vector<1x32x32xbf16> to vector<32x32xbf16>
    %c0_5 = arith.constant 0 : index
    %c0_6 = arith.constant 0 : index
    %c0_7 = arith.constant 0 : index
    %6 = vector.load %arg3[%c0_5, %c0_6, %c0_7] : memref<1x32x32xbf16, #tpu.memory_space<vmem>>, vector<1x32x32xbf16>
    %7 = vector.shape_cast %6 : vector<1x32x32xbf16> to vector<32x32xbf16>
    %c0_8 = arith.constant 0 : index
    %c0_9 = arith.constant 0 : index
    %c0_10 = arith.constant 0 : index
    %8 = vector.load %arg4[%c0_8, %c0_9, %c0_10] : memref<1x32x32xbf16, #tpu.memory_space<vmem>>, vector<1x32x32xbf16>
    %9 = vector.shape_cast %8 : vector<1x32x32xbf16> to vector<32x32xbf16>
    %c0_11 = arith.constant 0 : index
    %c0_12 = arith.constant 0 : index
    %c0_13 = arith.constant 0 : index
    %10 = vector.load %arg5[%c0_11, %c0_12, %c0_13] : memref<1x32x32xbf16, #tpu.memory_space<vmem>>, vector<1x32x32xbf16>
    %11 = vector.shape_cast %10 : vector<1x32x32xbf16> to vector<32x32xbf16>
    %12 = arith.truncf %3 : vector<8x32xf32> to vector<8x32xbf16>
    %13 = arith.truncf %3 : vector<8x32xf32> to vector<8x32xbf16>
    %cst = arith.constant dense<0.000000e+00> : vector<8x32xf32>
    %14 = tpu.matmul %12, %5, %cst {dimension_numbers = #tpu.dot_dimension_numbers<[1], [0], [0], [1], [0, 0, 1, 1], [], []>} : vector<8x32xbf16>, vector<32x32xbf16>, vector<8x32xf32> -> vector<8x32xf32>
    %cst_14 = arith.constant dense<0.000000e+00> : vector<8x32xf32>
    %15 = tpu.matmul %13, %7, %cst_14 {dimension_numbers = #tpu.dot_dimension_numbers<[1], [0], [0], [1], [0, 0, 1, 1], [], []>} : vector<8x32xbf16>, vector<32x32xbf16>, vector<8x32xf32> -> vector<8x32xf32>
    %cst_15 = arith.constant dense<0.000000e+00> : vector<8x32xf32>
    %16 = tpu.matmul %13, %9, %cst_15 {dimension_numbers = #tpu.dot_dimension_numbers<[1], [0], [0], [1], [0, 0, 1, 1], [], []>} : vector<8x32xbf16>, vector<32x32xbf16>, vector<8x32xf32> -> vector<8x32xf32>
    %17 = vector.extract_strided_slice %14 {offsets = [0, 0], sizes = [8, 8], strides = [1, 1]} : vector<8x32xf32> to vector<8x8xf32>
    %18 = arith.truncf %17 : vector<8x8xf32> to vector<8x8xbf16>
    %19 = vector.extract_strided_slice %15 {offsets = [0, 0], sizes = [8, 8], strides = [1, 1]} : vector<8x32xf32> to vector<8x8xf32>
    %20 = arith.truncf %19 : vector<8x8xf32> to vector<8x8xbf16>
    %21 = vector.extract_strided_slice %16 {offsets = [0, 0], sizes = [8, 8], strides = [1, 1]} : vector<8x32xf32> to vector<8x8xf32>
    %22 = arith.truncf %21 : vector<8x8xf32> to vector<8x8xbf16>
    %cst_16 = arith.constant dense<0.000000e+00> : vector<8x8xf32>
    %23 = tpu.matmul %18, %20, %cst_16 {dimension_numbers = #tpu.dot_dimension_numbers<[1], [1], [0], [0], [0, 0, 1, 0], [], []>} : vector<8x8xbf16>, vector<8x8xbf16>, vector<8x8xf32> -> vector<8x8xf32>
    %cst_17 = arith.constant 0.353553385 : f32
    %24 = vector.broadcast %cst_17 : f32 to vector<8x8xf32>
    %25 = arith.mulf %23, %24 : vector<8x8xf32>
    %cst_18 = arith.constant dense<0xFF800000> : vector<8xf32>
    %26 = vector.multi_reduction <maximumf>, %25, %cst_18 [1] : vector<8x8xf32> to vector<8xf32>
    %27 = vector.shape_cast %26 : vector<8xf32> to vector<8x1xf32>
    %28 = vector.broadcast %27 : vector<8x1xf32> to vector<8x8xf32>
    %29 = arith.subf %25, %28 : vector<8x8xf32>
    %30 = math.exp %29 : vector<8x8xf32>
    %cst_19 = arith.constant dense<0.000000e+00> : vector<8xf32>
    %31 = vector.multi_reduction <add>, %30, %cst_19 [1] : vector<8x8xf32> to vector<8xf32>
    %32 = vector.shape_cast %31 : vector<8xf32> to vector<8x1xf32>
    %33 = vector.broadcast %32 : vector<8x1xf32> to vector<8x8xf32>
    %34 = arith.divf %30, %33 : vector<8x8xf32>
    %35 = arith.truncf %34 : vector<8x8xf32> to vector<8x8xbf16>
    %cst_20 = arith.constant dense<0.000000e+00> : vector<8x8xf32>
    %36 = tpu.matmul %35, %22, %cst_20 {dimension_numbers = #tpu.dot_dimension_numbers<[1], [0], [0], [1], [0, 0, 1, 1], [], []>} : vector<8x8xbf16>, vector<8x8xbf16>, vector<8x8xf32> -> vector<8x8xf32>
    %37 = vector.extract_strided_slice %14 {offsets = [0, 8], sizes = [8, 8], strides = [1, 1]} : vector<8x32xf32> to vector<8x8xf32>
    %38 = arith.truncf %37 : vector<8x8xf32> to vector<8x8xbf16>
    %39 = vector.extract_strided_slice %15 {offsets = [0, 8], sizes = [8, 8], strides = [1, 1]} : vector<8x32xf32> to vector<8x8xf32>
    %40 = arith.truncf %39 : vector<8x8xf32> to vector<8x8xbf16>
    %41 = vector.extract_strided_slice %16 {offsets = [0, 8], sizes = [8, 8], strides = [1, 1]} : vector<8x32xf32> to vector<8x8xf32>
    %42 = arith.truncf %41 : vector<8x8xf32> to vector<8x8xbf16>
    %cst_21 = arith.constant dense<0.000000e+00> : vector<8x8xf32>
    %43 = tpu.matmul %38, %40, %cst_21 {dimension_numbers = #tpu.dot_dimension_numbers<[1], [1], [0], [0], [0, 0, 1, 0], [], []>} : vector<8x8xbf16>, vector<8x8xbf16>, vector<8x8xf32> -> vector<8x8xf32>
    %cst_22 = arith.constant 0.353553385 : f32
    %44 = vector.broadcast %cst_22 : f32 to vector<8x8xf32>
    %45 = arith.mulf %43, %44 : vector<8x8xf32>
    %cst_23 = arith.constant dense<0xFF800000> : vector<8xf32>
    %46 = vector.multi_reduction <maximumf>, %45, %cst_23 [1] : vector<8x8xf32> to vector<8xf32>
    %47 = vector.shape_cast %46 : vector<8xf32> to vector<8x1xf32>
    %48 = vector.broadcast %47 : vector<8x1xf32> to vector<8x8xf32>
    %49 = arith.subf %45, %48 : vector<8x8xf32>
    %50 = math.exp %49 : vector<8x8xf32>
    %cst_24 = arith.constant dense<0.000000e+00> : vector<8xf32>
    %51 = vector.multi_reduction <add>, %50, %cst_24 [1] : vector<8x8xf32> to vector<8xf32>
    %52 = vector.shape_cast %51 : vector<8xf32> to vector<8x1xf32>
    %53 = vector.broadcast %52 : vector<8x1xf32> to vector<8x8xf32>
    %54 = arith.divf %50, %53 : vector<8x8xf32>
    %55 = arith.truncf %54 : vector<8x8xf32> to vector<8x8xbf16>
    %cst_25 = arith.constant dense<0.000000e+00> : vector<8x8xf32>
    %56 = tpu.matmul %55, %42, %cst_25 {dimension_numbers = #tpu.dot_dimension_numbers<[1], [0], [0], [1], [0, 0, 1, 1], [], []>} : vector<8x8xbf16>, vector<8x8xbf16>, vector<8x8xf32> -> vector<8x8xf32>
    %57 = vector.extract_strided_slice %14 {offsets = [0, 16], sizes = [8, 8], strides = [1, 1]} : vector<8x32xf32> to vector<8x8xf32>
    %58 = arith.truncf %57 : vector<8x8xf32> to vector<8x8xbf16>
    %59 = vector.extract_strided_slice %15 {offsets = [0, 16], sizes = [8, 8], strides = [1, 1]} : vector<8x32xf32> to vector<8x8xf32>
    %60 = arith.truncf %59 : vector<8x8xf32> to vector<8x8xbf16>
    %61 = vector.extract_strided_slice %16 {offsets = [0, 16], sizes = [8, 8], strides = [1, 1]} : vector<8x32xf32> to vector<8x8xf32>
    %62 = arith.truncf %61 : vector<8x8xf32> to vector<8x8xbf16>
    %cst_26 = arith.constant dense<0.000000e+00> : vector<8x8xf32>
    %63 = tpu.matmul %58, %60, %cst_26 {dimension_numbers = #tpu.dot_dimension_numbers<[1], [1], [0], [0], [0, 0, 1, 0], [], []>} : vector<8x8xbf16>, vector<8x8xbf16>, vector<8x8xf32> -> vector<8x8xf32>
    %cst_27 = arith.constant 0.353553385 : f32
    %64 = vector.broadcast %cst_27 : f32 to vector<8x8xf32>
    %65 = arith.mulf %63, %64 : vector<8x8xf32>
    %cst_28 = arith.constant dense<0xFF800000> : vector<8xf32>
    %66 = vector.multi_reduction <maximumf>, %65, %cst_28 [1] : vector<8x8xf32> to vector<8xf32>
    %67 = vector.shape_cast %66 : vector<8xf32> to vector<8x1xf32>
    %68 = vector.broadcast %67 : vector<8x1xf32> to vector<8x8xf32>
    %69 = arith.subf %65, %68 : vector<8x8xf32>
    %70 = math.exp %69 : vector<8x8xf32>
    %cst_29 = arith.constant dense<0.000000e+00> : vector<8xf32>
    %71 = vector.multi_reduction <add>, %70, %cst_29 [1] : vector<8x8xf32> to vector<8xf32>
    %72 = vector.shape_cast %71 : vector<8xf32> to vector<8x1xf32>
    %73 = vector.broadcast %72 : vector<8x1xf32> to vector<8x8xf32>
    %74 = arith.divf %70, %73 : vector<8x8xf32>
    %75 = arith.truncf %74 : vector<8x8xf32> to vector<8x8xbf16>
    %cst_30 = arith.constant dense<0.000000e+00> : vector<8x8xf32>
    %76 = tpu.matmul %75, %62, %cst_30 {dimension_numbers = #tpu.dot_dimension_numbers<[1], [0], [0], [1], [0, 0, 1, 1], [], []>} : vector<8x8xbf16>, vector<8x8xbf16>, vector<8x8xf32> -> vector<8x8xf32>
    %77 = vector.extract_strided_slice %14 {offsets = [0, 24], sizes = [8, 8], strides = [1, 1]} : vector<8x32xf32> to vector<8x8xf32>
    %78 = arith.truncf %77 : vector<8x8xf32> to vector<8x8xbf16>
    %79 = vector.extract_strided_slice %15 {offsets = [0, 24], sizes = [8, 8], strides = [1, 1]} : vector<8x32xf32> to vector<8x8xf32>
    %80 = arith.truncf %79 : vector<8x8xf32> to vector<8x8xbf16>
    %81 = vector.extract_strided_slice %16 {offsets = [0, 24], sizes = [8, 8], strides = [1, 1]} : vector<8x32xf32> to vector<8x8xf32>
    %82 = arith.truncf %81 : vector<8x8xf32> to vector<8x8xbf16>
    %cst_31 = arith.constant dense<0.000000e+00> : vector<8x8xf32>
    %83 = tpu.matmul %78, %80, %cst_31 {dimension_numbers = #tpu.dot_dimension_numbers<[1], [1], [0], [0], [0, 0, 1, 0], [], []>} : vector<8x8xbf16>, vector<8x8xbf16>, vector<8x8xf32> -> vector<8x8xf32>
    %cst_32 = arith.constant 0.353553385 : f32
    %84 = vector.broadcast %cst_32 : f32 to vector<8x8xf32>
    %85 = arith.mulf %83, %84 : vector<8x8xf32>
    %cst_33 = arith.constant dense<0xFF800000> : vector<8xf32>
    %86 = vector.multi_reduction <maximumf>, %85, %cst_33 [1] : vector<8x8xf32> to vector<8xf32>
    %87 = vector.shape_cast %86 : vector<8xf32> to vector<8x1xf32>
    %88 = vector.broadcast %87 : vector<8x1xf32> to vector<8x8xf32>
    %89 = arith.subf %85, %88 : vector<8x8xf32>
    %90 = math.exp %89 : vector<8x8xf32>
    %cst_34 = arith.constant dense<0.000000e+00> : vector<8xf32>
    %91 = vector.multi_reduction <add>, %90, %cst_34 [1] : vector<8x8xf32> to vector<8xf32>
    %92 = vector.shape_cast %91 : vector<8xf32> to vector<8x1xf32>
    %93 = vector.broadcast %92 : vector<8x1xf32> to vector<8x8xf32>
    %94 = arith.divf %90, %93 : vector<8x8xf32>
    %95 = arith.truncf %94 : vector<8x8xf32> to vector<8x8xbf16>
    %cst_35 = arith.constant dense<0.000000e+00> : vector<8x8xf32>
    %96 = tpu.matmul %95, %82, %cst_35 {dimension_numbers = #tpu.dot_dimension_numbers<[1], [0], [0], [1], [0, 0, 1, 1], [], []>} : vector<8x8xbf16>, vector<8x8xbf16>, vector<8x8xf32> -> vector<8x8xf32>
    %97 = tpu.concatenate %36, %56, %76, %96 in 1 : vector<8x8xf32>, vector<8x8xf32>, vector<8x8xf32>, vector<8x8xf32> -> vector<8x32xf32>
    %98 = arith.truncf %97 : vector<8x32xf32> to vector<8x32xbf16>
    %cst_36 = arith.constant dense<0.000000e+00> : vector<8x32xf32>
    %99 = tpu.matmul %98, %11, %cst_36 {dimension_numbers = #tpu.dot_dimension_numbers<[1], [0], [0], [1], [0, 0, 1, 1], [], []>} : vector<8x32xbf16>, vector<32x32xbf16>, vector<8x32xf32> -> vector<8x32xf32>
    %100 = arith.addf %99, %3 : vector<8x32xf32>
    %cst_37 = arith.constant dense<0.000000e+00> : vector<8xf32>
    %101 = vector.multi_reduction <add>, %100, %cst_37 [1] : vector<8x32xf32> to vector<8xf32>
    %102 = vector.shape_cast %101 : vector<8xf32> to vector<8x1xf32>
    %cst_38 = arith.constant 3.200000e+01 : f32
    %103 = vector.broadcast %cst_38 : f32 to vector<8x1xf32>
    %104 = arith.divf %102, %103 : vector<8x1xf32>
    %105 = vector.broadcast %104 : vector<8x1xf32> to vector<8x32xf32>
    %106 = arith.subf %100, %105 : vector<8x32xf32>
    %107 = arith.mulf %106, %106 : vector<8x32xf32>
    %cst_39 = arith.constant dense<0.000000e+00> : vector<8xf32>
    %108 = vector.multi_reduction <add>, %107, %cst_39 [1] : vector<8x32xf32> to vector<8xf32>
    %109 = vector.shape_cast %108 : vector<8xf32> to vector<8x1xf32>
    %cst_40 = arith.constant 3.200000e+01 : f32
    %110 = vector.broadcast %cst_40 : f32 to vector<8x1xf32>
    %111 = arith.divf %109, %110 : vector<8x1xf32>
    %cst_41 = arith.constant 9.99999974E-6 : f32
    %112 = vector.broadcast %cst_41 : f32 to vector<8x1xf32>
    %113 = arith.addf %111, %112 : vector<8x1xf32>
    %114 = math.rsqrt %113 : vector<8x1xf32>
    %115 = vector.broadcast %114 : vector<8x1xf32> to vector<8x32xf32>
    %116 = arith.mulf %106, %115 : vector<8x32xf32>
    %c0_42 = arith.constant 0 : index
    %c0_43 = arith.constant 0 : index
    %c0_44 = arith.constant 0 : index
    %117 = vector.load %arg6[%c0_42, %c0_43, %c0_44] : memref<1x32x32xbf16, #tpu.memory_space<vmem>>, vector<1x32x32xbf16>
    %118 = vector.shape_cast %117 : vector<1x32x32xbf16> to vector<32x32xbf16>
    %c0_45 = arith.constant 0 : index
    %c0_46 = arith.constant 0 : index
    %c0_47 = arith.constant 0 : index
    %119 = vector.load %arg7[%c0_45, %c0_46, %c0_47] : memref<1x1x32xf32, #tpu.memory_space<vmem>>, vector<1x1x32xf32>
    %120 = vector.shape_cast %119 : vector<1x1x32xf32> to vector<1x32xf32>
    %c0_48 = arith.constant 0 : index
    %c0_49 = arith.constant 0 : index
    %c0_50 = arith.constant 0 : index
    %121 = vector.load %arg8[%c0_48, %c0_49, %c0_50] : memref<1x32x32xbf16, #tpu.memory_space<vmem>>, vector<1x32x32xbf16>
    %122 = vector.shape_cast %121 : vector<1x32x32xbf16> to vector<32x32xbf16>
    %c0_51 = arith.constant 0 : index
    %c0_52 = arith.constant 0 : index
    %c0_53 = arith.constant 0 : index
    %123 = vector.load %arg9[%c0_51, %c0_52, %c0_53] : memref<1x1x32xf32, #tpu.memory_space<vmem>>, vector<1x1x32xf32>
    %124 = vector.shape_cast %123 : vector<1x1x32xf32> to vector<1x32xf32>
    %125 = arith.truncf %116 : vector<8x32xf32> to vector<8x32xbf16>
    %cst_54 = arith.constant dense<0.000000e+00> : vector<8x32xf32>
    %126 = tpu.matmul %125, %118, %cst_54 {dimension_numbers = #tpu.dot_dimension_numbers<[1], [0], [0], [1], [0, 0, 1, 1], [], []>} : vector<8x32xbf16>, vector<32x32xbf16>, vector<8x32xf32> -> vector<8x32xf32>
    %127 = vector.broadcast %120 : vector<1x32xf32> to vector<8x32xf32>
    %128 = arith.addf %126, %127 : vector<8x32xf32>
    %cst_55 = arith.constant 0.000000e+00 : f32
    %129 = vector.broadcast %cst_55 : f32 to vector<8x32xf32>
    %130 = arith.maximumf %128, %129 : vector<8x32xf32>
    %131 = arith.truncf %130 : vector<8x32xf32> to vector<8x32xbf16>
    %cst_56 = arith.constant dense<0.000000e+00> : vector<8x32xf32>
    %132 = tpu.matmul %131, %122, %cst_56 {dimension_numbers = #tpu.dot_dimension_numbers<[1], [0], [0], [1], [0, 0, 1, 1], [], []>} : vector<8x32xbf16>, vector<32x32xbf16>, vector<8x32xf32> -> vector<8x32xf32>
    %133 = vector.broadcast %124 : vector<1x32xf32> to vector<8x32xf32>
    %134 = arith.addf %132, %133 : vector<8x32xf32>
    %135 = arith.addf %134, %116 : vector<8x32xf32>
    %cst_57 = arith.constant dense<0.000000e+00> : vector<8xf32>
    %136 = vector.multi_reduction <add>, %135, %cst_57 [1] : vector<8x32xf32> to vector<8xf32>
    %137 = vector.shape_cast %136 : vector<8xf32> to vector<8x1xf32>
    %cst_58 = arith.constant 3.200000e+01 : f32
    %138 = vector.broadcast %cst_58 : f32 to vector<8x1xf32>
    %139 = arith.divf %137, %138 : vector<8x1xf32>
    %140 = vector.broadcast %139 : vector<8x1xf32> to vector<8x32xf32>
    %141 = arith.subf %135, %140 : vector<8x32xf32>
    %142 = arith.mulf %141, %141 : vector<8x32xf32>
    %cst_59 = arith.constant dense<0.000000e+00> : vector<8xf32>
    %143 = vector.multi_reduction <add>, %142, %cst_59 [1] : vector<8x32xf32> to vector<8xf32>
    %144 = vector.shape_cast %143 : vector<8xf32> to vector<8x1xf32>
    %cst_60 = arith.constant 3.200000e+01 : f32
    %145 = vector.broadcast %cst_60 : f32 to vector<8x1xf32>
    %146 = arith.divf %144, %145 : vector<8x1xf32>
    %cst_61 = arith.constant 9.99999974E-6 : f32
    %147 = vector.broadcast %cst_61 : f32 to vector<8x1xf32>
    %148 = arith.addf %146, %147 : vector<8x1xf32>
    %149 = math.rsqrt %148 : vector<8x1xf32>
    %150 = vector.broadcast %149 : vector<8x1xf32> to vector<8x32xf32>
    %151 = arith.mulf %141, %150 : vector<8x32xf32>
    %c0_62 = arith.constant 0 : index
    %c0_63 = arith.constant 0 : index
    %152 = vector.load %arg11[%c0_62, %c0_63] : memref<8x32xf32, #tpu.memory_space<vmem>>, vector<8x32xf32>
    tpu.vector_store %arg11[%c0_62, %c0_63], %151 {strides = array<i32>} : memref<8x32xf32, #tpu.memory_space<vmem>>, vector<8x32xf32>,
    %c1_i32 = arith.constant 1 : i32
    %153 = arith.cmpi eq, %arg0, %c1_i32 : i32
    %154 = arith.extui %153 : i1 to i32
    %c0_i32_64 = arith.constant 0 : i32
    %155 = arith.cmpi ne, %154, %c0_i32_64 : i32
    scf.if %155 {
      %c0_65 = arith.constant 0 : index
      %c0_66 = arith.constant 0 : index
      %156 = vector.load %arg10[%c0_65, %c0_66] : memref<8x32xf32, #tpu.memory_space<vmem>>, vector<8x32xf32>
      tpu.vector_store %arg10[%c0_65, %c0_66], %151 {strides = array<i32>} : memref<8x32xf32, #tpu.memory_space<vmem>>, vector<8x32xf32>,
    } else {
    }
    return
  }
  func.func @transform_0(%arg0: i32) -> (i32, i32) {
    %c0_i32 = arith.constant 0 : i32
    %c0_i32_0 = arith.constant 0 : i32
    %c0_i32_1 = arith.constant 0 : i32
    return %c0_i32, %c0_i32_0 : i32, i32
  }
  func.func @transform_1(%arg0: i32) -> (i32, i32, i32) {
    %c0_i32 = arith.constant 0 : i32
    %c0_i32_0 = arith.constant 0 : i32
    %c0_i32_1 = arith.constant 0 : i32
    return %arg0, %c0_i32, %c0_i32_0 : i32, i32, i32
  }
  func.func @transform_2(%arg0: i32) -> (i32, i32, i32) {
    %c0_i32 = arith.constant 0 : i32
    %c0_i32_0 = arith.constant 0 : i32
    %c0_i32_1 = arith.constant 0 : i32
    return %arg0, %c0_i32, %c0_i32_0 : i32, i32, i32
  }
  func.func @transform_3(%arg0: i32) -> (i32, i32, i32) {
    %c0_i32 = arith.constant 0 : i32
    %c0_i32_0 = arith.constant 0 : i32
    %c0_i32_1 = arith.constant 0 : i32
    return %arg0, %c0_i32, %c0_i32_0 : i32, i32, i32
  }
  func.func @transform_4(%arg0: i32) -> (i32, i32, i32) {
    %c0_i32 = arith.constant 0 : i32
    %c0_i32_0 = arith.constant 0 : i32
    %c0_i32_1 = arith.constant 0 : i32
    return %arg0, %c0_i32, %c0_i32_0 : i32, i32, i32
  }
  func.func @transform_5(%arg0: i32) -> (i32, i32, i32) {
    %c0_i32 = arith.constant 0 : i32
    %c0_i32_0 = arith.constant 0 : i32
    %c0_i32_1 = arith.constant 0 : i32
    return %arg0, %c0_i32, %c0_i32_0 : i32, i32, i32
  }
  func.func @transform_6(%arg0: i32) -> (i32, i32, i32) {
    %c0_i32 = arith.constant 0 : i32
    %c0_i32_0 = arith.constant 0 : i32
    %c0_i32_1 = arith.constant 0 : i32
    return %arg0, %c0_i32, %c0_i32_0 : i32, i32, i32
  }
  func.func @transform_7(%arg0: i32) -> (i32, i32, i32) {
    %c0_i32 = arith.constant 0 : i32
    %c0_i32_0 = arith.constant 0 : i32
    %c0_i32_1 = arith.constant 0 : i32
    return %arg0, %c0_i32, %c0_i32_0 : i32, i32, i32
  }
  func.func @transform_8(%arg0: i32) -> (i32, i32, i32) {
    %c0_i32 = arith.constant 0 : i32
    %c0_i32_0 = arith.constant 0 : i32
    %c0_i32_1 = arith.constant 0 : i32
    return %arg0, %c0_i32, %c0_i32_0 : i32, i32, i32
  }
  func.func @transform_9(%arg0: i32) -> (i32, i32) {
    %c0_i32 = arith.constant 0 : i32
    %c0_i32_0 = arith.constant 0 : i32
    %c0_i32_1 = arith.constant 0 : i32
    return %c0_i32, %c0_i32_0 : i32, i32
  }
}

</mosaic_0001>

<bundles_post_ra>
// kernel: transformer_forward.2
= control target key start
LH: loop header
LB: loop body
LE: loop exit
PB: predicated region body
PF: predicated region fallthrough
CT: control target
= control target key end

     0   :  { %s2226_s0 = inlined_call_operand.vmem [shape: f32[8,32], index: 0, kind: input, shape index: {}]   ;;  %s2227_s1 = inlined_call_operand.vmem [shape: bf16[2,32,32], index: 1, kind: input, shape index: {}]   ;;  %s2228_s2 = inlined_call_operand.vmem [shape: bf16[2,32,32], index: 2, kind: input, shape index: {}]   ;;  %s2229_s3 = inlined_call_operand.vmem [shape: bf16[2,32,32], index: 3, kind: input, shape index: {}]   ;;  %s2230_s4 = inlined_call_operand.vmem [shape: bf16[2,32,32], index: 4, kind: input, shape index: {}]   ;;  %s2231_s5 = inlined_call_operand.vmem [shape: bf16[2,32,32], index: 5, kind: input, shape index: {}]   ;;  %s2232_s6 = inlined_call_operand.vmem [shape: f32[2,1,32], index: 6, kind: input, shape index: {}]   ;;  %s2233_s7 = inlined_call_operand.hbm [shape: bf16[2,32,32], index: 7, kind: input, shape index: {}]   ;;  %s2234_s8 = inlined_call_operand.hbm [shape: f32[2,1,32], index: 8, kind: input, shape index: {}]   ;;  %s2235_s9 = inlined_call_operand.vmem [shape: f32[8,32], index: 9, kind: output, shape index: {}]  }
   0x1   :  { %2237 = sst [smem:[#allocation10_spill]] %s2233_s7 }
   0x2   :  { %2238 = sst [smem:[#allocation11_spill]] %s2234_s8 }
   0x3   :  { %14 = vsyncpa [#allocation4], 0 }
   0x4   :  { %16 = vsyncpa [#allocation4 + $0x1], 0 }
   0x5   :  { %17 = vsyncpa [#allocation6], 0 }
   0x6   :  { %19 = vsyncpa [#allocation6 + $0x1], 0  ;;  %s1923_s30 = smov 0   ;;  %s1925_s10 = smov 0  }
   0x7   :  { %s1927_s11 = smov 0   ;;  %s1929_s12 = smov 0  }
   0x8 LB: > { %s1942_s13 = sadd.s32 4294967295, %s1859_s12   ;;  %s1945_s14 = sadd.s32 1, %s1859_s12   ;;  %s1859_s12 = sphi %s1929_s12, %s2254_s12   ;;  %s1855_s11 = sphi %s1927_s11, %s2253_s11   ;;  %s1851_s10 = sphi %s1925_s10, %s2252_s10   ;;  %s1847_s30 = sphi %s1923_s30, %s2251_s30  }
   0x9   : > { %s206_s15 = ssub.s32 %s1859_s12, %s1945_s14  ;;  %s209_s16 = sadd.s32 1, %s1855_s11 }
   0xa   : > { %p207_p0 = scmp.eq.s32.totalorder %s206_s15, 0  ;;  %p216_p1 = scmp.ne.s32.totalorder %s1855_s11, %s1851_s10 }
   0xb   : > { %p217_p2 = scmp.eq.s32.totalorder %s1859_s12, 0  ;;  %p222_p3 = scmp.ne.s32.totalorder %s1851_s10, %s1847_s30 }
   0xc   : > { %s1955_s17 = scalar_select %p207_p0, %s1855_s11, %s209_s16  }
   0xd   : > { %p218_p4 = por %p217_p2, %p216_p1  ;;  %p223_p5 = scmp.eq.s32.totalorder %s1942_s13, 0 }
   0xe   : > { %2239 = sst [smem:[#allocation9_spill]] %s1955_s17  ;;  %p1686_p6 = scmp.lt.s32.totalorder %s1859_s12, 2 }
   0xf   : > { %p1959_p7 = por %p223_p5, %p222_p3  ;;  %s1964_s19 = sand.u32 1, %s1855_s11  }
  0x10   : > { %s1491_s20 = sshll.u32 %s1964_s19, 4  ;;  %s1539_s21 = sshll.u32 %s1859_s12, 8 }
  0x11   : > { %s2240_s18 = scalar_select %p1959_p7, 1, 0 }
  0x12   : > { %s2241_s7 = sld [smem:[#allocation10_spill]]  ;;  %s346_s25 = scalar_lea.vmem [#allocation3], %s1491_s20 }
  0x13   : > { %s353_s26 = sshll.u32 %s346_s25, 4  ;;  %p1975_p8 = pnand %p1686_p6, %p218_p4  ;;  %s1973_s26 = int_to_ptr.vmem [resolvable:$true] %s353_s26 }
  0x14   : > { %s343_s28 = scalar_lea.sflag [#allocation4], %s1964_s19 }
  0x15   : > { %p1763_p11 = pneg %p1975_p8 }
  0x18   : > { %s1971_s24 = scalar_lea.hbm %s2241_s7, %s1539_s21  ;;  %s1766_s16 = scalar_lea.hbm %s2241_s7, 512 }
  0x19   : > { %s1761_s29 = scalar_lea.hbm %s1971_s24, 256  ;;  %p1767_p0 = scmp.lt.u32.totalorder %s1971_s24, %s2241_s7 }
  0x1a   : > { %p1762_p10 = scmp.ne.s32.totalorder %s1971_s24, %s1761_s29  ;;  %p1768_p1 = scmp.lt.u32.totalorder %s1766_s16, %s1761_s29 }
  0x1b   : > { %p1770_p3 = scmp.lt.u32.totalorder %s1761_s29, %s1971_s24 }
  0x1c   : > { %p1764_p12 = pnand %p1763_p11, %p1762_p10  ;;  %p1769_p2 = por %p1768_p1, %p1767_p0 }
  0x1e   : > { %p1765_p13 = pneg %p1764_p12  ;;  %p1771_p4 = por %p1770_p3, %p1769_p2 }
  0x20   : > { %p1772_p5 = pnand %p1771_p4, %p1765_p13 }
  0x22   : > { %1775 = shalt.err (!%p1772_p5)
}
  0x23   : > { %s1776_s22 = scalar_lea.vmem %s1973_s26, 256  ;;  %s1861_s23 = smov [#allocation3]  }
  0x24   : > { %p1777_p6 = scmp.ne.s32.totalorder %s1973_s26, %s1776_s22  ;;  %s1781_s25 = sshll.u32 %s1861_s23, 4  ;;  %s1782_s25 = int_to_ptr.vmem [resolvable:$false] %s1781_s25 }
  0x25   : > { %s1783_s30 = scalar_lea.vmem %s1782_s25, 512  ;;  %p1784_p9 = scmp.lt.s32.totalorder %s1973_s26, %s1782_s25 }
  0x26   : > { %p1779_p10 = pnand %p1777_p6, %p1763_p11  ;;  %p1785_p0 = scmp.lt.s32.totalorder %s1783_s30, %s1776_s22 }
  0x28   : > { %p1780_p12 = pneg %p1779_p10  ;;  %p1786_p1 = por %p1785_p0, %p1784_p9 }
  0x2a   : > { %p1787_p2 = pnand %p1786_p1, %p1780_p12 }
  0x2c   : > { %1790 = shalt.err (!%p1787_p2)
}
  0x2d   : > { %s1862_s29 = smov 64   ;;  %s1863_s15 = smov 4  }
  0x2e   : > { %1682 = dma.hbm_to_vmem [thread:$0]  (!%p1975_p8), %s1971_s24, 256, %s1973_s26, %s343_s28, %s1862_s29, %s1862_s29, %s1863_s15  }
  0x2f   : > { %p378_p13 = scmp.lt.s32.totalorder %s1859_s12, 3  ;;  %s1494_s16 = sshll.u32 %s1859_s12, 4 }
  0x30   : > { %p2243_p9 = scmp.ge.s32.totalorder %s1859_s12, 1  ;;  %s2245_s8 = sld [smem:[#allocation11_spill]] }
  0x31   : > { %s366_s25 = scalar_lea.vmem [#allocation5], %s1964_s19  ;;  %s364_s24 = scalar_lea.sflag [#allocation6], %s1964_s19 }
  0x32   : > { %p2012_p3 = pnand %p2243_p9, %p378_p13  ;;  %s373_s30 = sshll.u32 %s366_s25, 4  ;;  %s374_s30 = int_to_ptr.vmem [resolvable:$true] %s373_s30 }
  0x34   : > { %s2244_s20 = scalar_select %p2012_p3, 1, 0 }
  0x36   : > { %s2019_s23 = scalar_lea.hbm %s2245_s8, %s1494_s16  ;;  %s1796_s29 = scalar_lea.hbm %s2245_s8, 32 }
  0x37   : > { %s1791_s26 = scalar_lea.hbm %s2019_s23, 16  ;;  %p1797_p10 = scmp.lt.u32.totalorder %s2019_s23, %s2245_s8 }
  0x38   : > { %p1792_p4 = scmp.ne.s32.totalorder %s2019_s23, %s1791_s26  ;;  %p1798_p12 = scmp.lt.u32.totalorder %s1796_s29, %s1791_s26 }
  0x39   : > { %p1800_p1 = scmp.lt.u32.totalorder %s1791_s26, %s2019_s23 }
  0x3a   : > { %p1794_p5 = pnand %p1792_p4, %p1763_p11  ;;  %p1799_p0 = por %p1798_p12, %p1797_p10 }
  0x3c   : > { %p1795_p6 = pneg %p1794_p5  ;;  %p1801_p2 = por %p1800_p1, %p1799_p0 }
  0x3e   : > { %p1802_p13 = pnand %p1801_p2, %p1795_p6 }
  0x40   : > { %1805 = shalt.err (!%p1802_p13)
}
  0x41   : > { %s1806_s19 = scalar_lea.vmem %s374_s30, 16  ;;  %s1864_s21 = smov [#allocation5]  }
  0x42   : > { %p1807_p9 = scmp.ne.s32.totalorder %s374_s30, %s1806_s19  ;;  %s1811_s22 = sshll.u32 %s1864_s21, 4  ;;  %s1812_s22 = int_to_ptr.vmem [resolvable:$false] %s1811_s22 }
  0x43   : > { %s1813_s25 = scalar_lea.vmem %s1812_s22, 32  ;;  %p1814_p7 = scmp.lt.s32.totalorder %s374_s30, %s1812_s22 }
  0x44   : > { %p1809_p4 = pnand %p1807_p9, %p1763_p11  ;;  %p1815_p3 = scmp.lt.s32.totalorder %s1813_s25, %s1806_s19 }
  0x46   : > { %p1810_p5 = pneg %p1809_p4  ;;  %p1816_p10 = por %p1815_p3, %p1814_p7 }
  0x48   : > { %p1817_p12 = pnand %p1816_p10, %p1810_p5 }
  0x4a   : > { %1820 = shalt.err (!%p1817_p12)
}
  0x4b   : > { %1685 = dma.hbm_to_vmem [thread:$0]  (!%p1975_p8), %s2019_s23, 16, %s374_s30, %s364_s24  }
  0x4c   : > { %p2246_p6 = scmp.ne.s32.totalorder %s2244_s20, 0 }
  0x4d   : > { %s2045_s26 = sand.u32 (!%p2246_p6), 1, %s1851_s10   ;;  %p2247_p7 = scmp.ne.s32.totalorder (!%p2246_p6), %s2240_s18, 0 }
  0x4e   : > { %382 = sbr.rel (%p2246_p6) target bundleno = 2590 (0xa1e), region = 56  ;;  %s1496_s12 = sshll.u32 (!%p2246_p6), %s2045_s26, 4 }
  0x4f   : > { %s385_s28 = scalar_lea.sflag (!%p2246_p6), [#allocation4], %s2045_s26  ;;  %s2049_s29 = scalar_lea.vmem (!%p2246_p6), [#allocation3], %s1496_s12 }
  0x55   : > { %1838 = dma.done.wait (%p2247_p7), %s385_s28, 256  }
  0x56   : > { %1840 = vsyncadd (%p2247_p7), %s385_s28, 4294967040  ;;  %s394_s27 = scalar_lea.sflag [#allocation6], %s2045_s26 }
  0x57   : > { %1842 = dma.done.wait (%p2247_p7), %s394_s27, 16  }
  0x58   : > { %1844 = vsyncadd (%p2247_p7), %s394_s27, 4294967280  ;;  %p458_p8 = scmp.lt.s32.totalorder %s1942_s13, 1  ;;  %p1507_p11 = scmp.ne.s32.totalorder %s1942_s13, 0 }
  0x59   : > { %v491_v0 = vld [vmem:[%s2226_s0] sm:$0xff] (!%p1507_p11)  ;;  %vm492_vm0 = vcmask (!%p1507_p11), 261120  }
  0x5a   : > { %s2063_s23 = scalar_select %p458_p8, %s1942_s13, 1 }
  0x5b   : > { %490 = sbr.rel (%p1507_p11) target bundleno = 98 (0x62), region = 68  ;;  %493 = vst.msk [vmem:[#allocation2] sm:$0xff] (!%p1507_p11), %vm492_vm0, %v491_v0 }
  0x5c   : > { %s1540_s30 = sshll.u32 %s2063_s23, 4 }
  0x5d   : > { %s462_s22 = scalar_lea.vmem %s2227_s1, %s1540_s30  ;;  %s467_s18 = scalar_lea.vmem %s2228_s2, %s1540_s30 }
  0x5e   : > { %s2079_s20 = scalar_lea.vmem %s2229_s3, %s1540_s30  ;;  %s2084_s17 = scalar_lea.vmem %s2230_s4, %s1540_s30 }
  0x5f   : > { %s2089_s16 = scalar_lea.vmem %s2231_s5, %s1540_s30 }
  0x62 PF: > { %v1729_v1 = vld [vmem:[%s467_s18] sm:$0xff]   ;;  %v1865_v2 = vmov 0.0   ;;  %v1731_v4 = vld [vmem:[%s467_s18 + $0x8] sm:$0xff]   ;;  %vm1866_vm1 = vmmov 0   ;;  %vm524_vm2 = vcmask 261120   ;;  %vm675_vm3 = vcmask 64512  }
  0x63   : > { %1587 = vmatprep.subr.bf16.mxu1 %v1865_v2  ;;  %1579 = vmatprep.subr.bf16.mxu0 %v1865_v2  ;;  %v1730_v3 = vld [vmem:[%s462_s22] sm:$0xff]   ;;  %v1732_v6 = vld [vmem:[%s462_s22 + $0x8] sm:$0xff]   ;;  %s1867_s7 = smov 112   ;;  %s1868_s8 = smov 120   ;;  %vm738_vm4 = vcmask 1043456   ;;  %vm1131_vm5 = vcmask 130048  }
  0x64   : > { %1588 = vmatpush3.bf16.msra.mxu1 %v1729_v1  ;;  %1591 = vmatprep.mubr.msk.bf16.mxu1 %vm1866_vm1, %v1865_v2  ;;  %v2100_v5 = vld [vmem:[#allocation2] sm:$0xff]  ;;  %s1869_s30 = smov 104   ;;  %v1734_v20 = vld [vmem:[%s2079_s20 + $0x8] sm:$0xff]   ;;  %s1871_s22 = smov 16   ;;  %vm1133_vm6 = vcmask 195584  }
  0x65   : > { %1589 = vmatprep.subr.bf16.mxu1 %v1865_v2  ;;  %1580 = vmatpush3.bf16.msra.mxu0 %v1730_v3  ;;  %v511_v7 = vpack.c.bf16 %v2100_v5, %v2100_v5  ;;  %v1733_v19 = vld [vmem:[%s2079_s20] sm:$0xff]   ;;  %s1870_s20 = smov 8   ;;  %s1872_s25 = smov 24  }
  0x66   : > { %1581 = vmatprep.subr.bf16.mxu0 %v1865_v2  ;;  %1583 = vmatprep.mubr.msk.bf16.mxu0 %vm1866_vm1, %v1865_v2  ;;  %s2249_s18 = scalar_lea.vmem [#allocation5], %s2045_s26  ;;  %p1536_p3 = scmp.ne.s32.totalorder %s1942_s13, 1 }
  0x68   : > { %1590 = vmatpush3.bf16.msra.mxu1 %v1731_v4 }
  0x69   : > { %1582 = vmatpush3.bf16.msra.mxu0 %v1732_v6  ;;  %1603 = vmatprep.subr.bf16.mxu1 %v1865_v2 }
  0x6a   : > { %1595 = vmatprep.subr.bf16.mxu0 %v1865_v2 }
  0x6b   : > { %1592 = vmatmul.mubr.msk.bf16.vlgmr.msra.gmra.mrb[0].mxu1 %vm524_vm2, %v511_v7 }
  0x6c   : > { %1584 = vmatmul.mubr.msk.bf16.vlgmr.msra.gmra.mrb[0].mxu0 %vm524_vm2, %v511_v7  ;;  %1605 = vmatprep.mubr.msk.bf16.mxu1 %vm1866_vm1, %v1865_v2 }
  0x6d   : > { %1599 = vmatprep.mubr.msk.bf16.mxu0 %vm1866_vm1, %v1865_v2  ;;  %1596 = vmatpush3.bf16.msra.mxu0 %v1733_v19 }
  0x6e   : > { %1597 = vmatprep.subr.bf16.mxu0 %v1865_v2 }
  0x71   : > { %1598 = vmatpush3.bf16.msra.mxu0 %v1734_v20 }
  0x72   : > { %1609 = vmatprep.subr.bf16.mxu0 %v1865_v2 }
  0x74   : > { %1600 = vmatmul.mubr.msk.bf16.vlgmr.msra.gmra.mrb[4].mxu0 %vm524_vm2, %v511_v7 }
  0x75   : > { %1611 = vmatprep.mubr.msk.bf16.mxu0 %vm1866_vm1, %v1865_v2 }
 0x13e   : > { %v614_v8 = vpop.f32.mrb[0].mxu1 }
 0x13f   : > { %v673_v9 = vpack.c.bf16 %v614_v8, %v614_v8  ;;  %v1593_v10 = vpop.f32.mrb[1].mxu1  ;;  %v562_v11 = vpop.f32.mrb[0].mxu0 }
 0x140   : > { %v617_v12 = vpop.f32.mrb[2].mxu1  ;;  %v1585_v13 = vpop.f32.mrb[1].mxu0  ;;  %v672_v15 = vpack.c.bf16 %v562_v11, %v562_v11 }
 0x141   : > { %898 = vrot.lane.b32.xlu1 %v673_v9, %s1867_s7  ;;  %786 = vrot.lane.b32.xlu0 %v673_v9, %s1868_s8  ;;  %v1594_v14 = vpop.f32.mrb[3].mxu1  ;;  %v680_v16 = vsel %vm675_vm3, %v673_v9, 0  ;;  %v565_v17 = vpop.f32.mrb[2].mxu0 }
 0x142   : > { %1604 = vmatpush3.bf16.xpose.msra.mxu1 %v680_v16  ;;  %v1586_v18 = vpop.f32.mrb[3].mxu0 }
 0x143   : > { %1615 = vmatprep.subr.bf16.mxu1 %v1865_v2 }
 0x145   : > { %896 = vrot.lane.b32.xlu1 %v672_v15, %s1867_s7  ;;  %783 = vrot.lane.b32.xlu0 %v672_v15, %s1868_s8 }
 0x147   : > { %v666_v36 = vpop.f32.mrb[4].mxu0 }
 0x148   : > { %v674_v37 = vpack.c.bf16 %v666_v36, %v666_v36  ;;  %v1601_v38 = vpop.f32.mrb[5].mxu0 }
 0x149   : > { %1007 = vrot.lane.b32.xlu1 %v672_v15, %s1869_s30  ;;  %1009 = vrot.lane.b32.xlu0 %v673_v9, %s1869_s30  ;;  %v669_v39 = vpop.f32.mrb[6].mxu0 }
 0x14a   : > { %1606 = vmatmul.mubr.msk.bf16.vlgmr.msra.gmra.mrb[4].mxu1 %vm675_vm3, %v672_v15  ;;  %v1602_v40 = vpop.f32.mrb[7].mxu0  ;;  %v740_v41 = vsel %vm738_vm4, %v674_v37, 0 }
 0x14b   : > { %1617 = vmatprep.mubr.msk.bf16.mxu1 %vm1866_vm1, %v1865_v2  ;;  %1610 = vmatpush3.bf16.msra.mxu0 %v740_v41 }
 0x14c   : > { %1621 = vmatprep.subr.bf16.mxu0 %v1865_v2 }
 0x1b3   : > { %v787_v21 = vpop.permute.xlu0 %786  ;;  %v899_v23 = vpop.permute.xlu1 %898 }
 0x1b4   : > { %v792_v22 = vsel %vm675_vm3, %v787_v21, 0  ;;  %v904_v25 = vsel %vm675_vm3, %v899_v23, 0 }
 0x1b5   : > { %1616 = vmatpush3.bf16.xpose.msra.mxu1 %v792_v22 }
 0x1b6   : > { %1627 = vmatprep.subr.bf16.mxu1 %v1865_v2 }
 0x1b7   : > { %v784_v24 = vpop.permute.xlu0 %783  ;;  %v897_v27 = vpop.permute.xlu1 %896 }
 0x1bb   : > { %v1010_v26 = vpop.permute.xlu0 %1009  ;;  %v1008_v29 = vpop.permute.xlu1 %1007 }
 0x1bc   : > { %1618 = vmatmul.mubr.msk.bf16.vlgmr.msra.gmra.mrb[8].mxu1 %vm675_vm3, %v784_v24  ;;  %v1015_v28 = vsel %vm675_vm3, %v1010_v26, 0 }
 0x1bd   : > { %1628 = vmatpush3.bf16.xpose.msra.mxu1 %v904_v25  ;;  %1629 = vmatprep.mubr.msk.bf16.mxu1 %vm1866_vm1, %v1865_v2 }
 0x1be   : > { %1639 = vmatprep.subr.bf16.mxu1 %v1865_v2 }
 0x1c4   : > { %1630 = vmatmul.mubr.msk.bf16.vlgmr.msra.gmra.mrb[12].mxu1 %vm675_vm3, %v897_v27 }
 0x1c5   : > { %1640 = vmatpush3.bf16.xpose.msra.mxu1 %v1015_v28  ;;  %1641 = vmatprep.mubr.msk.bf16.mxu1 %vm1866_vm1, %v1865_v2 }
 0x1c6   : > { %1651 = vmatprep.subr.bf16.mxu1 %v1865_v2 }
 0x1cc   : > { %1642 = vmatmul.mubr.msk.bf16.vlgmr.msra.gmra.mrb[16].mxu1 %vm675_vm3, %v1008_v29 }
 0x1cd   : > { %1655 = vmatprep.mubr.msk.bf16.mxu1 %vm1866_vm1, %v1865_v2 }
 0x21d   : > { %v716_v30 = vpop.f32.mrb[4].mxu1 }
 0x21e   : > { %v722_v31 = vmul.f32 0.35355338, %v716_v30  ;;  %v1607_v32 = vpop.f32.mrb[5].mxu1 }
 0x21f   : > { %v719_v33 = vpop.f32.mrb[6].mxu1 }
 0x220   : > { %v1608_v34 = vpop.f32.mrb[7].mxu1  ;;  %v723_v35 = vsel %vm675_vm3, %v722_v31, -inf }
 0x221   : > { %724 = vmax.xlane.f32.xlu0 %v723_v35 }
 0x28f   : > { %v828_v42 = vpop.f32.mrb[8].mxu1 }
 0x290   : > { %v834_v43 = vmul.f32 0.35355338, %v828_v42  ;;  %v1619_v44 = vpop.f32.mrb[9].mxu1 }
 0x291   : > { %v831_v45 = vpop.f32.mrb[10].mxu1  ;;  %v1735_v44 = vld [vmem:[%s2084_s17] sm:$0xff]  }
 0x292   : > { %v1620_v46 = vpop.f32.mrb[11].mxu1  ;;  %v835_v47 = vsel %vm675_vm3, %v834_v43, -inf  ;;  %1652 = vmatpush3.bf16.msra.mxu1 %v1735_v44 }
 0x293   : > { %836 = vmax.xlane.f32.xlu1 %v835_v47  ;;  %1653 = vmatprep.subr.bf16.mxu1 %v1865_v2 }
 0x297   : > { %v940_v48 = vpop.f32.mrb[12].mxu1 }
 0x298   : > { %v946_v49 = vmul.f32 0.35355338, %v940_v48  ;;  %v1631_v50 = vpop.f32.mrb[13].mxu1 }
 0x299   : > { %v943_v51 = vpop.f32.mrb[14].mxu1 }
 0x29a   : > { %v1632_v52 = vpop.f32.mrb[15].mxu1  ;;  %v947_v53 = vsel %vm675_vm3, %v946_v49, -inf }
 0x29b   : > { %948 = vmax.xlane.f32.xlu0 %v947_v53 }
 0x29f   : > { %v1051_v54 = vpop.f32.mrb[16].mxu1 }
 0x2a0   : > { %v1057_v55 = vmul.f32 0.35355338, %v1051_v54  ;;  %v1643_v56 = vpop.f32.mrb[17].mxu1 }
 0x2a1   : > { %v1054_v57 = vpop.f32.mrb[18].mxu1 }
 0x2a2   : > { %v1644_v58 = vpop.f32.mrb[19].mxu1  ;;  %v1058_v59 = vsel %vm675_vm3, %v1057_v55, -inf }
 0x2a3   : > { %1059 = vmax.xlane.f32.xlu0 %v1058_v59 }
 0x2ae   : > { %v725_v60 = vpop.xlane.xlu0 %724 }
 0x2af   : > { %v726_v61 = vsub.f32 %v722_v31, %v725_v60 }
 0x2b1   : > { %v727_v62 = vmul.f32 1.442695, %v726_v61 }
 0x2b3   : > { %1741 = vpow2.f32 %v727_v62 }
 0x2bd   : > { %v1742_v63 = vpop.eup %1741 }
 0x2be   : > { %v729_v0 = vsel %vm675_vm3, %v1742_v63, 0.0 }
 0x2bf   : > { %730 = vadd.xlane.f32.xlu1 %v729_v0 }
 0x2d0   : > { %848 = vrot.lane.b32.xlu1 %v674_v37, %s1868_s8 }
 0x320   : > { %v837_v1 = vpop.xlane.xlu1 %836 }
 0x321   : > { %v838_v3 = vsub.f32 %v834_v43, %v837_v1 }
 0x323   : > { %v839_v4 = vmul.f32 1.442695, %v838_v3 }
 0x325   : > { %1743 = vpow2.f32 %v839_v4 }
 0x328   : > { %v949_v6 = vpop.xlane.xlu0 %948 }
 0x329   : > { %v950_v7 = vsub.f32 %v946_v49, %v949_v6  ;;  %v1736_v49 = vld [vmem:[%s2084_s17 + $0x8] sm:$0xff]  }
 0x32a   : > { %1654 = vmatpush3.bf16.msra.mxu1 %v1736_v49 }
 0x32b   : > { %v951_v8 = vmul.f32 1.442695, %v950_v7  ;;  %1667 = vmatprep.subr.bf16.mxu1 %v1865_v2 }
 0x32d   : > { %1745 = vpow2.f32 %v951_v8 }
 0x32f   : > { %v1744_v9 = vpop.eup %1743 }
 0x330   : > { %v1060_v10 = vpop.xlane.xlu0 %1059  ;;  %v841_v11 = vsel %vm675_vm3, %v1744_v9, 0.0 }
 0x331   : > { %v1061_v12 = vsub.f32 %v1057_v55, %v1060_v10  ;;  %842 = vadd.xlane.f32.xlu0 %v841_v11 }
 0x333   : > { %v1062_v13 = vmul.f32 1.442695, %v1061_v12 }
 0x335   : > { %1747 = vpow2.f32 %v1062_v13 }
 0x337   : > { %v1746_v14 = vpop.eup %1745 }
 0x338   : > { %v953_v15 = vsel %vm675_vm3, %v1746_v14, 0.0 }
 0x339   : > { %954 = vadd.xlane.f32.xlu1 %v953_v15 }
 0x33f   : > { %v1748_v16 = vpop.eup %1747 }
 0x340   : > { %v1064_v17 = vsel %vm675_vm3, %v1748_v16, 0.0 }
 0x341   : > { %1065 = vadd.xlane.f32.xlu0 %v1064_v17 }
 0x34a   : > { %1070 = vrot.lane.b32.xlu1 %v674_v37, %s1869_s30 }
 0x34c   : > { %v731_v18 = vpop.xlane.xlu1 %730 }
 0x34d   : > { %1749 = vrcp.f32 %v731_v18 }
 0x350   : > { %v849_v20 = vpop.permute.xlu1 %848 }
 0x351   : > { %v854_v23 = vsel %vm738_vm4, %v849_v20, 0 }
 0x357   : > { %v1750_v19 = vpop.eup %1749  ;;  %959 = vrot.lane.b32.xlu0 %v674_v37, %s1867_s7 }
 0x358   : > { %v733_v21 = vmul.f32 %v1750_v19, %v1742_v63 }
 0x35a   : > { %v734_v22 = vpack.c.bf16 %v733_v21, %v733_v21  ;;  %v1739_v21 = vld [vmem:[%s2049_s29] sm:$0xff]  }
 0x35c   : > { %1612 = vmatmul.mubr.msk.bf16.vlgmr.msra.gmra.mrb[8].mxu0 %vm675_vm3, %v734_v22  ;;  %v1740_v22 = vld [vmem:[%s2049_s29 + $0x8] sm:$0xff]  }
 0x35d   : > { %1622 = vmatpush3.bf16.msra.mxu0 %v854_v23  ;;  %1623 = vmatprep.mubr.msk.bf16.mxu0 %vm1866_vm1, %v1865_v2 }
 0x35e   : > { %1633 = vmatprep.subr.bf16.mxu0 %v1865_v2 }
 0x3be   : > { %v843_v24 = vpop.xlane.xlu0 %842 }
 0x3bf   : > { %1751 = vrcp.f32 %v843_v24 }
 0x3c6   : > { %v955_v25 = vpop.xlane.xlu1 %954 }
 0x3c7   : > { %1753 = vrcp.f32 %v955_v25 }
 0x3c9   : > { %v1752_v26 = vpop.eup %1751 }
 0x3ca   : > { %v845_v27 = vmul.f32 %v1752_v26, %v1744_v9  ;;  %v1071_v34 = vpop.permute.xlu1 %1070 }
 0x3cb   : > { %v1076_v36 = vsel %vm738_vm4, %v1071_v34, 0 }
 0x3cc   : > { %v846_v28 = vpack.c.bf16 %v845_v27, %v845_v27 }
 0x3ce   : > { %v1066_v29 = vpop.xlane.xlu0 %1065  ;;  %1624 = vmatmul.mubr.msk.bf16.vlgmr.msra.gmra.mrb[12].mxu0 %vm675_vm3, %v846_v28 }
 0x3cf   : > { %1755 = vrcp.f32 %v1066_v29  ;;  %1635 = vmatprep.mubr.msk.bf16.mxu0 %vm1866_vm1, %v1865_v2 }
 0x3d1   : > { %v1754_v30 = vpop.eup %1753 }
 0x3d2   : > { %v957_v31 = vmul.f32 %v1754_v30, %v1746_v14  ;;  %v960_v32 = vpop.permute.xlu0 %959  ;;  %v1737_v14 = vld [vmem:[%s2089_s16] sm:$0xff]  }
 0x3d3   : > { %v965_v33 = vsel %vm738_vm4, %v960_v32, 0 }
 0x3d4   : > { %1634 = vmatpush3.bf16.msra.mxu0 %v965_v33  ;;  %v958_v35 = vpack.c.bf16 %v957_v31, %v957_v31  ;;  %v1532_v31 = vld [vmem:[%s2249_s18] ss:$0 sm:$0xff] }
 0x3d5   : > { %1645 = vmatprep.subr.bf16.mxu0 %v1865_v2 }
 0x3d7   : > { %1636 = vmatmul.mubr.msk.bf16.vlgmr.msra.gmra.mrb[16].mxu0 %vm675_vm3, %v958_v35 }
 0x3d8   : > { %1646 = vmatpush3.bf16.msra.mxu0 %v1076_v36  ;;  %1647 = vmatprep.mubr.msk.bf16.mxu0 %vm1866_vm1, %v1865_v2 }
 0x3d9   : > { %v1756_v37 = vpop.eup %1755  ;;  %1659 = vmatprep.subr.bf16.mxu0 %v1865_v2 }
 0x3da   : > { %v1068_v38 = vmul.f32 %v1756_v37, %v1748_v16 }
 0x3dc   : > { %v1069_v39 = vpack.c.bf16 %v1068_v38, %v1068_v38 }
 0x3df   : > { %1648 = vmatmul.mubr.msk.bf16.vlgmr.msra.gmra.mrb[20].mxu0 %vm675_vm3, %v1069_v39 }
 0x3e0   : > { %1663 = vmatprep.mubr.msk.bf16.mxu0 %vm1866_vm1, %v1865_v2  ;;  %1660 = vmatpush3.bf16.msra.mxu0 %v1737_v14 }
 0x3e1   : > { %1661 = vmatprep.subr.bf16.mxu0 %v1865_v2 }
 0x42f   : > { %v776_v40 = vpop.f32.mrb[8].mxu0 }
 0x430   : > { %v1613_v41 = vpop.f32.mrb[9].mxu0 }
 0x431   : > { %v779_v42 = vpop.f32.mrb[10].mxu0 }
 0x432   : > { %v1614_v43 = vpop.f32.mrb[11].mxu0 }
 0x4a1   : > { %v890_v45 = vpop.f32.mrb[12].mxu0 }
 0x4a2   : > { %1119 = vrot.lane.b32.xlu1 %v890_v45, %s1870_s20  ;;  %v1625_v46 = vpop.f32.mrb[13].mxu0 }
 0x4a3   : > { %v893_v47 = vpop.f32.mrb[14].mxu0 }
 0x4a4   : > { %v1626_v48 = vpop.f32.mrb[15].mxu0 }
 0x4aa   : > { %v1001_v50 = vpop.f32.mrb[16].mxu0 }
 0x4ab   : > { %1123 = vrot.lane.b32.xlu0 %v1001_v50, %s1871_s22  ;;  %v1637_v51 = vpop.f32.mrb[17].mxu0 }
 0x4ac   : > { %v1004_v52 = vpop.f32.mrb[18].mxu0 }
 0x4ad   : > { %v1638_v53 = vpop.f32.mrb[19].mxu0 }
 0x4b2   : > { %v1112_v54 = vpop.f32.mrb[20].mxu0 }
 0x4b3   : > { %1127 = vrot.lane.b32.xlu1 %v1112_v54, %s1872_s25  ;;  %v1649_v55 = vpop.f32.mrb[21].mxu0 }
 0x4b4   : > { %v1115_v56 = vpop.f32.mrb[22].mxu0 }
 0x4b5   : > { %v1650_v57 = vpop.f32.mrb[23].mxu0 }
 0x514   : > { %v1120_v58 = vpop.permute.xlu1 %1119 }
 0x515   : > { %v1130_v60 = vsel %vm675_vm3, %v776_v40, %v1120_v58 }
 0x51d   : > { %v1124_v59 = vpop.permute.xlu0 %1123 }
 0x51e   : > { %v1132_v61 = vsel %vm1131_vm5, %v1130_v60, %v1124_v59 }
 0x525   : > { %v1128_v62 = vpop.permute.xlu1 %1127 }
 0x526   : > { %v1134_v63 = vsel %vm1133_vm6, %v1132_v61, %v1128_v62 }
 0x527   : > { %v1135_v0 = vpack.c.bf16 %v1134_v63, %v1134_v63 }
 0x529   : > { %1656 = vmatmul.mubr.msk.bf16.vlgmr.msra.gmra.mrb[20].mxu1 %vm524_vm2, %v1135_v0 }
 0x52a   : > { %1671 = vmatprep.mubr.msk.bf16.mxu1 %vm1866_vm1, %v1865_v2  ;;  %1668 = vmatpush3.bf16.msra.mxu1 %v1739_v21 }
 0x52b   : > { %1669 = vmatprep.subr.bf16.mxu1 %v1865_v2 }
 0x52e   : > { %1670 = vmatpush3.bf16.msra.mxu1 %v1740_v22 }
 0x5fc   : > { %v1185_v1 = vpop.f32.mrb[20].mxu1 }
 0x5fd   : > { %v1186_v3 = vadd.f32 %v1185_v1, %v2100_v5  ;;  %v1657_v4 = vpop.f32.mrb[21].mxu1  ;;  %v1738_v5 = vld [vmem:[%s2089_s16 + $0x8] sm:$0xff]   ;;  %s2248_s16 = scalar_lea.vmem %s2232_s6, %s2063_s23 }
 0x5fe   : > { %v1188_v6 = vpop.f32.mrb[22].mxu1  ;;  %1662 = vmatpush3.bf16.msra.mxu0 %v1738_v5  ;;  %v1528_v23 = vld [vmem:[%s2248_s16] ss:$0 sm:$0xff] }
 0x5ff   : > { %v1658_v7 = vpop.f32.mrb[23].mxu1  ;;  %v1191_v8 = vsel %vm524_vm2, %v1186_v3, 0.0 }
 0x600   : > { %1192 = vadd.xlane.f32.xlu0 %v1191_v8 }
 0x68d   : > { %v1193_v9 = vpop.xlane.xlu0 %1192 }
 0x68e   : > { %v1195_v10 = vmul.f32 0.03125, %v1193_v9 }
 0x690   : > { %v1196_v11 = vsub.f32 %v1186_v3, %v1195_v10 }
 0x692   : > { %v1197_v12 = vmul.f32 %v1196_v11, %v1196_v11 }
 0x694   : > { %v1198_v13 = vsel %vm524_vm2, %v1197_v12, 0.0 }
 0x695   : > { %1199 = vadd.xlane.f32.xlu1 %v1198_v13 }
 0x722   : > { %v1200_v15 = vpop.xlane.xlu1 %1199 }
 0x723   : > { %v1201_v16 = vmul.f32 0.03125, %v1200_v15 }
 0x725   : > { %v1202_v17 = vadd.f32 1e-05, %v1201_v16 }
 0x727   : > { %1757 = vrsqrt.f32 %v1202_v17 }
 0x731   : > { %v1758_v18 = vpop.eup %1757 }
 0x732   : > { %v1204_v19 = vmul.f32 %v1758_v18, %v1196_v11 }
 0x734   : > { %v1215_v20 = vpack.c.bf16 %v1204_v19, %v1204_v19 }
 0x736   : > { %1664 = vmatmul.mubr.msk.bf16.vlgmr.msra.gmra.mrb[24].mxu0 %vm524_vm2, %v1215_v20 }
 0x809   : > { %v1271_v24 = vpop.f32.mrb[24].mxu0 }
 0x80a   : > { %v1272_v25 = vadd.f32 %v1528_v23, %v1271_v24  ;;  %v1665_v26 = vpop.f32.mrb[25].mxu0 }
 0x80b   : > { %v1274_v27 = vpop.f32.mrb[26].mxu0 }
 0x80c   : > { %v1277_v28 = vmax.f32 %v1272_v25, 0.0  ;;  %v1666_v29 = vpop.f32.mrb[27].mxu0 }
 0x80e   : > { %v1278_v30 = vpack.c.bf16 %v1277_v28, %v1277_v28 }
 0x810   : > { %1672 = vmatmul.mubr.msk.bf16.vlgmr.msra.gmra.mrb[24].mxu1 %vm524_vm2, %v1278_v30 }
 0x8e3   : > { %v1334_v32 = vpop.f32.mrb[24].mxu1 }
 0x8e4   : > { %v1335_v2 = vadd.f32 %v1532_v31, %v1334_v32  ;;  %v1673_v33 = vpop.f32.mrb[25].mxu1 }
 0x8e5   : > { %v1337_v34 = vpop.f32.mrb[26].mxu1 }
 0x8e6   : > { %v1674_v35 = vpop.f32.mrb[27].mxu1  ;;  %v1340_v36 = vadd.f32 %v1335_v2, %v1204_v19 }
 0x8e8   : > { %v1341_v37 = vsel %vm524_vm2, %v1340_v36, 0.0 }
 0x8e9   : > { %1342 = vadd.xlane.f32.xlu0 %v1341_v37 }
 0x976   : > { %v1343_v38 = vpop.xlane.xlu0 %1342 }
 0x977   : > { %v1344_v39 = vmul.f32 0.03125, %v1343_v38 }
 0x979   : > { %v1345_v40 = vsub.f32 %v1340_v36, %v1344_v39 }
 0x97b   : > { %v1346_v41 = vmul.f32 %v1345_v40, %v1345_v40 }
 0x97d   : > { %v1347_v42 = vsel %vm524_vm2, %v1346_v41, 0.0 }
 0x97e   : > { %1348 = vadd.xlane.f32.xlu0 %v1347_v42 }
 0xa0b   : > { %v1349_v43 = vpop.xlane.xlu0 %1348 }
 0xa0c   : > { %v1350_v44 = vmul.f32 0.03125, %v1349_v43 }
 0xa0e   : > { %v1351_v45 = vadd.f32 1e-05, %v1350_v44 }
 0xa10   : > { %1759 = vrsqrt.f32 %v1351_v45 }
 0xa17   : > { %1358 = sbr.rel (%p1536_p3) target bundleno = 2590 (0xa1e), region = 72 }
 0xa1a   : > { %v1760_v46 = vpop.eup %1759 }
 0xa1b   : > { %v1353_v47 = vmul.f32 %v1760_v46, %v1345_v40 }
 0xa1d   : > { %1354 = vst.msk [vmem:[#allocation2] sm:$0xff] %vm524_vm2, %v1353_v47  ;;  %1359 = vst.msk [vmem:[%s2235_s9] sm:$0xff] (!%p1536_p3), %vm524_vm2, %v1353_v47 }
 0xa1e PF: > { %s2250_s23 = sld [smem:[#allocation9_spill]]  ;;  %p22_p0 = scmp.ge.s32.totalorder %s1945_s14, 4  }
 0xa1f   : > { %s2251_s30 = smov %s1851_s10  ;;  %s2252_s10 = smov %s1855_s11 }
 0xa20   : > { %s2254_s12 = smov %s1945_s14  ;;  %24 = sbr.rel (!%p22_p0) target bundleno = 8 (0x8), region = 131 }
 0xa24   : > { %s2253_s11 = smov %s2250_s23 }
 0xa27   :  { %1371 = vsyncpa [#allocation4], 1 }
 0xa28   :  { %1373 = vsyncpa [#allocation4 + $0x1], 1 }
 0xa29   :  { %1374 = vsyncpa [#allocation6], 1 }
 0xa2a   :  { %1376 = vsyncpa [#allocation6 + $0x1], 1 }

// kernel: transformer_forward.3
= control target key start
LH: loop header
LB: loop body
LE: loop exit
PB: predicated region body
PF: predicated region fallthrough
CT: control target
= control target key end

     0   :  { %s3821_s0 = inlined_call_operand.vmem [shape: f32[8,32], index: 0, kind: input, shape index: {}]   ;;  %s3822_s1 = inlined_call_operand.vmem [shape: f32[8,32], index: 1, kind: input, shape index: {}]   ;;  %s3823_s2 = inlined_call_operand.vmem [shape: bf16[2,32,32], index: 2, kind: input, shape index: {}]   ;;  %s3824_s3 = inlined_call_operand.vmem [shape: bf16[2,32,32], index: 3, kind: input, shape index: {}]   ;;  %s3825_s4 = inlined_call_operand.vmem [shape: bf16[2,32,32], index: 4, kind: input, shape index: {}]   ;;  %s3826_s5 = inlined_call_operand.vmem [shape: bf16[2,32,32], index: 5, kind: input, shape index: {}]   ;;  %s3827_s6 = inlined_call_operand.vmem [shape: bf16[2,32,32], index: 6, kind: input, shape index: {}]   ;;  %s3828_s7 = inlined_call_operand.vmem [shape: bf16[2,32,32], index: 7, kind: input, shape index: {}]   ;;  %s3829_s8 = inlined_call_operand.vmem [shape: bf16[2,32,32], index: 8, kind: input, shape index: {}]   ;;  %s3830_s9 = inlined_call_operand.vmem [shape: bf16[2,32,32], index: 9, kind: input, shape index: {}]   ;;  %s3831_s10 = inlined_call_operand.vmem [shape: bf16[2,32,32], index: 10, kind: input, shape index: {}]   ;;  %s3832_s11 = inlined_call_operand.hbm [shape: f32[2,1,32], index: 11, kind: input, shape index: {}]   ;;  %s3833_s12 = inlined_call_operand.vmem [shape: bf16[2,32,32], index: 12, kind: input, shape index: {}]   ;;  %s3834_s13 = inlined_call_operand.hbm [shape: f32[2,1,32], index: 13, kind: input, shape index: {}]   ;;  %s3835_s14 = inlined_call_operand.hbm [shape: bf16[32,128], index: 14, kind: input, shape index: {}]   ;;  %s3836_s15 = inlined_call_operand.hbm [shape: f32[8,128], index: 15, kind: output, shape index: {}]  }
   0x1   :  { %3843 = sst [smem:[#allocation16_spill]] %s3821_s0 }
   0x2   :  { %3844 = sst [smem:[#allocation17_spill]] %s3822_s1 }
   0x3   :  { %3845 = sst [smem:[#allocation18_spill]] %s3823_s2 }
   0x4   :  { %3846 = sst [smem:[#allocation19_spill]] %s3824_s3 }
   0x5   :  { %3847 = sst [smem:[#allocation20_spill]] %s3825_s4 }
   0x6   :  { %3848 = sst [smem:[#allocation21_spill]] %s3826_s5 }
   0x7   :  { %3849 = sst [smem:[#allocation22_spill]] %s3831_s10 }
   0x8   :  { %3850 = sst [smem:[#allocation23_spill]] %s3832_s11 }
   0x9   :  { %3851 = sst [smem:[#allocation24_spill]] %s3833_s12 }
   0xa   :  { %3852 = sst [smem:[#allocation25_spill]] %s3835_s14 }
   0xb   :  { %3853 = sst [smem:[#allocation26_spill]] %s3836_s15 }
   0xc   :  { %20 = vsyncpa [#allocation4], 0 }
   0xd   :  { %22 = vsyncpa [#allocation4 + $0x1], 0 }
   0xe   :  { %23 = vsyncpa [#allocation7], 0 }
   0xf   :  { %25 = vsyncpa [#allocation7 + $0x1], 0 }
  0x10   :  { %26 = vsyncpa [#allocation5], 0  ;;  %s3334_s18 = smov 0   ;;  %s3336_s19 = smov 0  }
  0x11   :  { %s3338_s20 = smov 0   ;;  %s3340_s21 = smov 0  }
  0x12 LB: > { %s3353_s22 = sadd.s32 4294967295, %s3236_s21   ;;  %p328_p0 = scmp.ne.s32.totalorder %s3228_s19, %s3224_s18  ;;  %s3236_s21 = sphi %s3340_s21, %s3878_s21   ;;  %s3232_s20 = sphi %s3338_s20, %s3882_s20   ;;  %s3228_s19 = sphi %s3336_s19, %s3881_s19   ;;  %s3224_s18 = sphi %s3334_s18, %s3880_s18  }
  0x13   : > { %p3838_p1 = scmp.eq.s32.totalorder %s3353_s22, 0  ;;  %p2599_p2 = scmp.ge.s32.totalorder %s3236_s21, 1 }
  0x14   : > { %p433_p3 = scmp.lt.s32.totalorder %s3236_s21, 3  ;;  %s3238_s25 = smov [#allocation8]  }
  0x15   : > { %p3362_p5 = por %p3838_p1, %p328_p0  ;;  %s451_s26 = sshll.u32 %s3238_s25, 4  ;;  %s452_s26 = int_to_ptr.vmem [resolvable:$true] %s451_s26 }
  0x16   : > { %p3366_p6 = pnand %p2599_p2, %p433_p3  ;;  %s3379_s28 = sadd.s32 1, %s3236_s21  }
  0x17   : > { %s3854_s23 = scalar_select %p3362_p5, 1, 0 }
  0x18   : > { %s3855_s24 = scalar_select %p3366_p6, 1, 0 }
  0x19   : > { %p2954_p7 = pneg %p3366_p6  ;;  %3857 = sst [smem:[#allocation14_spill]] %s3379_s28 }
  0x1a   : > { %s315_s29 = sadd.s32 1, %s3232_s20  ;;  %s312_s30 = ssub.s32 %s3236_s21, %s3379_s28 }
  0x1b   : > { %p3374_p8 = pnand %p2954_p7, %p3838_p1  ;;  %s3858_s14 = sld [smem:[#allocation25_spill]] }
  0x1d   : > { %p3078_p10 = pneg %p3374_p8 }
  0x21   : > { %s3076_s18 = scalar_lea.hbm %s3858_s14, 256 }
  0x22   : > { %p3077_p9 = scmp.ne.s32.totalorder %s3858_s14, %s3076_s18  ;;  %p3083_p13 = scmp.lt.u32.totalorder %s3076_s18, %s3858_s14 }
  0x24   : > { %p3079_p11 = pnand %p3078_p10, %p3077_p9 }
  0x26   : > { %p3080_p12 = pneg %p3079_p11 }
  0x28   : > { %p3085_p0 = pnand %p3083_p13, %p3080_p12 }
  0x2a   : > { %3088 = shalt.err (!%p3085_p0)
}
  0x2b   : > { %s3089_s12 = scalar_lea.vmem %s452_s26, 256  ;;  %p3097_p4 = scmp.lt.s32.totalorder %s452_s26, %s452_s26 }
  0x2c   : > { %p3090_p2 = scmp.ne.s32.totalorder %s452_s26, %s3089_s12  ;;  %p3098_p1 = scmp.lt.s32.totalorder %s3089_s12, %s3089_s12 }
  0x2e   : > { %p3092_p3 = pnand %p3090_p2, %p3078_p10  ;;  %p3099_p5 = por %p3098_p1, %p3097_p4 }
  0x30   : > { %p3093_p7 = pneg %p3092_p3 }
  0x32   : > { %p3100_p6 = pnand %p3099_p5, %p3093_p7 }
  0x34   : > { %3103 = shalt.err (!%p3100_p6)
}
  0x35   : > { %s3239_s15 = smov 64   ;;  %s3240_s0 = smov 4  }
  0x36   : > { %2957 = dma.hbm_to_vmem [thread:$0]  (!%p3374_p8), %s3858_s14, 256, %s452_s26, [#allocation7], %s3239_s15, %s3239_s15, %s3240_s0  }
  0x37   : > { %p313_p9 = scmp.eq.s32.totalorder %s312_s30, 0  ;;  %p322_p1 = scmp.ne.s32.totalorder %s3232_s20, %s3228_s19 }
  0x38   : > { %p323_p4 = scmp.eq.s32.totalorder %s3236_s21, 0  ;;  %p2966_p5 = scmp.lt.s32.totalorder %s3236_s21, 2 }
  0x39   : > { %s3405_s12 = scalar_select %p313_p9, %s3232_s20, %s315_s29  }
  0x3a   : > { %p324_p6 = por %p323_p4, %p322_p1  ;;  %s3408_s17 = sand.u32 1, %s3232_s20  }
  0x3b   : > { %3859 = sst [smem:[#allocation15_spill]] %s3405_s12  ;;  %s2602_s18 = sshll.u32 %s3236_s21, 4 }
  0x3c   : > { %s540_s25 = scalar_lea.vmem [#allocation3], %s3408_s17  ;;  %s3860_s11 = sld [smem:[#allocation23_spill]] }
  0x3d   : > { %s547_s28 = sshll.u32 %s540_s25, 4  ;;  %p3419_p8 = pnand %p2966_p5, %p324_p6  ;;  %s3417_s28 = int_to_ptr.vmem [resolvable:$true] %s547_s28 }
  0x3e   : > { %s3426_s15 = scalar_lea.hbm %s3834_s13, %s2602_s18  ;;  %s562_s10 = sand.u32 1, %s3236_s21  }
  0x3f   : > { %s538_s0 = scalar_lea.sflag [#allocation4], %s3408_s17  ;;  %p3106_p11 = pneg %p3419_p8 }
  0x42   : > { %s3415_s1 = scalar_lea.hbm %s3860_s11, %s2602_s18  ;;  %s3109_s14 = scalar_lea.hbm %s3860_s11, 32 }
  0x43   : > { %s3104_s16 = scalar_lea.hbm %s3415_s1, 16  ;;  %p3110_p0 = scmp.lt.u32.totalorder %s3415_s1, %s3860_s11 }
  0x44   : > { %p3105_p10 = scmp.ne.s32.totalorder %s3415_s1, %s3104_s16  ;;  %p3111_p2 = scmp.lt.u32.totalorder %s3109_s14, %s3104_s16 }
  0x45   : > { %p3113_p7 = scmp.lt.u32.totalorder %s3104_s16, %s3415_s1 }
  0x46   : > { %p3107_p12 = pnand %p3106_p11, %p3105_p10  ;;  %p3112_p3 = por %p3111_p2, %p3110_p0 }
  0x48   : > { %p3108_p13 = pneg %p3107_p12  ;;  %p3114_p9 = por %p3113_p7, %p3112_p3 }
  0x4a   : > { %p3115_p1 = pnand %p3114_p9, %p3108_p13 }
  0x4c   : > { %3118 = shalt.err (!%p3115_p1)
}
  0x4d   : > { %s3119_s18 = scalar_lea.vmem %s3417_s28, 16  ;;  %s3241_s30 = smov [#allocation3]  }
  0x4e   : > { %p3120_p4 = scmp.ne.s32.totalorder %s3417_s28, %s3119_s18  ;;  %s3124_s25 = sshll.u32 %s3241_s30, 4  ;;  %s3125_s25 = int_to_ptr.vmem [resolvable:$false] %s3124_s25 }
  0x4f   : > { %s3126_s12 = scalar_lea.vmem %s3125_s25, 32  ;;  %p3127_p10 = scmp.lt.s32.totalorder %s3417_s28, %s3125_s25 }
  0x50   : > { %p3122_p5 = pnand %p3120_p4, %p3106_p11  ;;  %p3128_p12 = scmp.lt.s32.totalorder %s3126_s12, %s3119_s18 }
  0x52   : > { %p3123_p6 = pneg %p3122_p5  ;;  %p3129_p0 = por %p3128_p12, %p3127_p10 }
  0x54   : > { %p3130_p2 = pnand %p3129_p0, %p3123_p6 }
  0x56   : > { %3133 = shalt.err (!%p3130_p2)
}
  0x57   : > { %2961 = dma.hbm_to_vmem [thread:$0]  (!%p3419_p8), %s3415_s1, 16, %s3417_s28, %s538_s0  }
  0x58   : > { %s565_s14 = scalar_lea.vmem [#allocation6], %s3408_s17  ;;  %s563_s27 = scalar_lea.sflag [#allocation7], %s562_s10 }
  0x59   : > { %s572_s16 = sshll.u32 %s565_s14, 4  ;;  %s3134_s29 = scalar_lea.hbm %s3426_s15, 16  ;;  %s573_s16 = int_to_ptr.vmem [resolvable:$true] %s572_s16 }
  0x5a   : > { %p3135_p13 = scmp.ne.s32.totalorder %s3426_s15, %s3134_s29  ;;  %s3139_s25 = scalar_lea.hbm %s3834_s13, 32 }
  0x5b   : > { %p3140_p9 = scmp.lt.u32.totalorder %s3426_s15, %s3834_s13  ;;  %p3141_p1 = scmp.lt.u32.totalorder %s3139_s25, %s3134_s29 }
  0x5c   : > { %p3137_p3 = pnand %p3135_p13, %p3106_p11  ;;  %p3143_p5 = scmp.lt.u32.totalorder %s3134_s29, %s3426_s15 }
  0x5d   : > { %p3142_p4 = por %p3141_p1, %p3140_p9 }
  0x5e   : > { %p3138_p7 = pneg %p3137_p3 }
  0x5f   : > { %p3144_p6 = por %p3143_p5, %p3142_p4 }
  0x61   : > { %p3145_p10 = pnand %p3144_p6, %p3138_p7 }
  0x63   : > { %3148 = shalt.err (!%p3145_p10)
}
  0x64   : > { %s3149_s21 = scalar_lea.vmem %s573_s16, 16  ;;  %s3242_s28 = smov [#allocation6]  }
  0x65   : > { %p3150_p12 = scmp.ne.s32.totalorder %s573_s16, %s3149_s21  ;;  %s3154_s17 = sshll.u32 %s3242_s28, 4  ;;  %s3155_s17 = int_to_ptr.vmem [resolvable:$false] %s3154_s17 }
  0x66   : > { %s3156_s1 = scalar_lea.vmem %s3155_s17, 32  ;;  %p3157_p13 = scmp.lt.s32.totalorder %s573_s16, %s3155_s17 }
  0x67   : > { %p3152_p0 = pnand %p3150_p12, %p3106_p11  ;;  %p3158_p3 = scmp.lt.s32.totalorder %s3156_s1, %s3149_s21 }
  0x69   : > { %p3153_p2 = pneg %p3152_p0  ;;  %p3159_p1 = por %p3158_p3, %p3157_p13 }
  0x6b   : > { %p3160_p9 = pnand %p3159_p1, %p3153_p2 }
  0x6d   : > { %3163 = shalt.err (!%p3160_p9)
}
  0x6e   : > { %2964 = dma.hbm_to_vmem [thread:$0]  (!%p3419_p8), %s3426_s15, 16, %s573_s16, %s563_s27  }
  0x6f   : > { %p3862_p7 = scmp.ne.s32.totalorder %s3855_s24, 0 }
  0x70   : > { %s3480_s11 = sand.u32 (!%p3862_p7), 1, %s3228_s19   ;;  %p3863_p11 = scmp.ne.s32.totalorder (!%p3862_p7), %s3854_s23, 0 }
  0x71   : > { %581 = sbr.rel (%p3862_p7) target bundleno = 4617 (0x1209), region = 80  ;;  %s584_s10 = scalar_lea.sflag (!%p3862_p7), [#allocation4], %s3480_s11 }
  0x78   : > { %3207 = dma.done.wait (%p3863_p11), %s584_s10, 16  }
  0x79   : > { %3209 = vsyncadd (%p3863_p11), %s584_s10, 4294967280  ;;  %s591_s26 = sand.u32 1, %s3353_s22  }
  0x7a   : > { %s592_s15 = scalar_lea.sflag [#allocation7], %s591_s26 }
  0x7b   : > { %3211 = dma.done.wait (%p3863_p11), %s592_s15, 16  }
  0x7c   : > { %3213 = vsyncadd (%p3863_p11), %s592_s15, 4294967280  ;;  %p3864_p8 = scmp.eq.s32.totalorder %s3353_s22, 0 }
  0x7e   : > { %3215 = dma.done.wait (%p3864_p8), [#allocation7], 256   ;;  %p3865_p4 = pmov %p3864_p8 }
  0x7f   : > { %p693_p5 = scmp.lt.s32.totalorder %s3353_s22, 1  ;;  %s3866_s2 = sld [smem:[#allocation18_spill]] }
  0x80   : > { %3217 = vsyncadd (%p3865_p4), [#allocation7], 4294967040  ;;  %s3867_s3 = sld [smem:[#allocation19_spill]]  ;;  %s3868_s4 = sld [smem:[#allocation20_spill]] }
  0x81   : > { %s694_s14 = scalar_select %p693_p5, %s3353_s22, 1 }
  0x82   : > { %s3869_s5 = sld [smem:[#allocation21_spill]]  ;;  %s3870_s26 = sld [smem:[#allocation22_spill]] }
  0x83   : > { %s2683_s16 = sshll.u32 %s694_s14, 4  ;;  %s3871_s27 = sld [smem:[#allocation24_spill]] }
  0x84   : > { %s3519_s14 = scalar_lea.vmem %s3827_s6, %s2683_s16  ;;  %s3524_s30 = scalar_lea.vmem %s3828_s7, %s2683_s16 }
  0x85   : > { %s697_s18 = scalar_lea.vmem %s3866_s2, %s2683_s16  ;;  %s3529_s12 = scalar_lea.vmem %s3829_s8, %s2683_s16 }
  0x86   : > { %s702_s23 = scalar_lea.vmem %s3867_s3, %s2683_s16  ;;  %s3509_s28 = scalar_lea.vmem %s3868_s4, %s2683_s16 }
  0x87   : > { %s3534_s17 = scalar_lea.vmem %s3830_s9, %s2683_s16  ;;  %p3872_p6 = scmp.ne.s32.totalorder %s3353_s22, 0 }
  0x88   : > { %s3514_s10 = scalar_lea.vmem %s3869_s5, %s2683_s16  ;;  %s3539_s15 = scalar_lea.vmem %s3870_s26, %s2683_s16  ;;  %vm749_vm0 = vcmask (!%p3872_p6), 261120  }
  0x89   : > { %s3544_s29 = scalar_lea.vmem %s3871_s27, %s2683_s16  ;;  %747 = sbr.rel (%p3872_p6) target bundleno = 146 (0x92), region = 96 }
  0x8a   : > { %s3873_s5 = sld [smem:[#allocation17_spill]] (!%p3872_p6) }
  0x90   : > { %v748_v0 = vld [vmem:[%s3873_s5] sm:$0xff] }
  0x91   : > { %750 = vst.msk [vmem:[#allocation2] sm:$0xff] %vm749_vm0, %v748_v0 }
  0x92 PF: > { %v3016_v1 = vld [vmem:[%s702_s23] sm:$0xff]   ;;  %v3243_v2 = vmov 0.0   ;;  %v3018_v4 = vld [vmem:[%s702_s23 + $0x8] sm:$0xff]   ;;  %vm3244_vm1 = vmmov 0   ;;  %vm782_vm2 = vcmask 261120   ;;  %vm938_vm3 = vcmask 64512  }
  0x93   : > { %2766 = vmatprep.subr.bf16.mxu1 %v3243_v2  ;;  %2758 = vmatprep.subr.bf16.mxu0 %v3243_v2  ;;  %v3017_v3 = vld [vmem:[%s697_s18] sm:$0xff]   ;;  %v3019_v6 = vld [vmem:[%s697_s18 + $0x8] sm:$0xff]   ;;  %s3245_s2 = smov 112   ;;  %s3246_s3 = smov 120   ;;  %v930_v30 = vlaneseq  ;;  %vm1002_vm5 = vcmask 1043456   ;;  %vm1398_vm6 = vcmask 130048  }
  0x94   : > { %2767 = vmatpush3.bf16.msra.mxu1 %v3016_v1  ;;  %2770 = vmatprep.mubr.msk.bf16.mxu1 %vm3244_vm1, %v3243_v2  ;;  %s3247_s4 = smov 104   ;;  %v3020_v19 = vld [vmem:[%s3509_s28] sm:$0xff]   ;;  %v3021_v20 = vld [vmem:[%s3509_s28 + $0x8] sm:$0xff]   ;;  %s3248_s5 = smov 8   ;;  %vm1400_vm7 = vcmask 195584  }
  0x95   : > { %2768 = vmatprep.subr.bf16.mxu1 %v3243_v2  ;;  %2759 = vmatpush3.bf16.msra.mxu0 %v3017_v3  ;;  %v931_v31 = vshrl.u32 %v930_v30, 7  ;;  %v933_v32 = vand.u32 127, %v930_v30  ;;  %s3249_s0 = smov 16   ;;  %s3250_s16 = smov 24  }
  0x96   : > { %2760 = vmatprep.subr.bf16.mxu0 %v3243_v2  ;;  %2762 = vmatprep.mubr.msk.bf16.mxu0 %vm3244_vm1, %v3243_v2  ;;  %s3874_s28 = sld [smem:[#allocation16_spill]]  ;;  %p2675_p10 = scmp.ne.s32.totalorder %s3353_s22, 1 }
  0x97   : > { %vm934_vm4 = vcmp.le.s32.totalorder %v933_v32, %v931_v31  ;;  %vm3252_vm8 = vmmov (!%p2675_p10), 0  }
  0x98   : > { %v3556_v5 = vld [vmem:[#allocation2] sm:$0xff]  ;;  %2769 = vmatpush3.bf16.msra.mxu1 %v3018_v4 }
  0x99   : > { %v769_v7 = vpack.c.bf16 %v3556_v5, %v3556_v5  ;;  %2761 = vmatpush3.bf16.msra.mxu0 %v3019_v6  ;;  %2782 = vmatprep.subr.bf16.mxu1 %v3243_v2 }
  0x9a   : > { %2774 = vmatprep.subr.bf16.mxu0 %v3243_v2 }
  0x9b   : > { %2771 = vmatmul.mubr.msk.bf16.vlgmr.msra.gmra.mrb[0].mxu1 %vm782_vm2, %v769_v7 }
  0x9c   : > { %2763 = vmatmul.mubr.msk.bf16.vlgmr.msra.gmra.mrb[0].mxu0 %vm782_vm2, %v769_v7  ;;  %2784 = vmatprep.mubr.msk.bf16.mxu1 %vm3244_vm1, %v3243_v2 }
  0x9d   : > { %2778 = vmatprep.mubr.msk.bf16.mxu0 %vm3244_vm1, %v3243_v2  ;;  %2775 = vmatpush3.bf16.msra.mxu0 %v3020_v19 }
  0x9e   : > { %2776 = vmatprep.subr.bf16.mxu0 %v3243_v2 }
  0xa1   : > { %2777 = vmatpush3.bf16.msra.mxu0 %v3021_v20 }
  0xa2   : > { %2788 = vmatprep.subr.bf16.mxu0 %v3243_v2 }
  0xa4   : > { %2779 = vmatmul.mubr.msk.bf16.vlgmr.msra.gmra.mrb[4].mxu0 %vm782_vm2, %v769_v7 }
  0xa5   : > { %2790 = vmatprep.mubr.msk.bf16.mxu0 %vm3244_vm1, %v3243_v2 }
 0x16e   : > { %v872_v8 = vpop.f32.mrb[0].mxu1 }
 0x16f   : > { %v936_v9 = vpack.c.bf16 %v872_v8, %v872_v8  ;;  %v2772_v10 = vpop.f32.mrb[1].mxu1  ;;  %v820_v11 = vpop.f32.mrb[0].mxu0 }
 0x170   : > { %v875_v12 = vpop.f32.mrb[2].mxu1  ;;  %v2764_v13 = vpop.f32.mrb[1].mxu0  ;;  %v935_v15 = vpack.c.bf16 %v820_v11, %v820_v11 }
 0x171   : > { %1163 = vrot.lane.b32.xlu1 %v936_v9, %s3245_s2  ;;  %1050 = vrot.lane.b32.xlu0 %v936_v9, %s3246_s3  ;;  %v2773_v14 = vpop.f32.mrb[3].mxu1  ;;  %v943_v16 = vsel %vm938_vm3, %v936_v9, 0  ;;  %v823_v17 = vpop.f32.mrb[2].mxu0 }
 0x172   : > { %2783 = vmatpush3.bf16.xpose.msra.mxu1 %v943_v16  ;;  %v2765_v18 = vpop.f32.mrb[3].mxu0 }
 0x173   : > { %2794 = vmatprep.subr.bf16.mxu1 %v3243_v2 }
 0x175   : > { %1161 = vrot.lane.b32.xlu1 %v935_v15, %s3245_s2  ;;  %1047 = vrot.lane.b32.xlu0 %v935_v15, %s3246_s3 }
 0x177   : > { %v924_v40 = vpop.f32.mrb[4].mxu0 }
 0x178   : > { %v3606_v41 = vpack.c.bf16 %v924_v40, %v924_v40  ;;  %v2780_v42 = vpop.f32.mrb[5].mxu0 }
 0x179   : > { %1273 = vrot.lane.b32.xlu1 %v935_v15, %s3247_s4  ;;  %1275 = vrot.lane.b32.xlu0 %v936_v9, %s3247_s4  ;;  %v927_v43 = vpop.f32.mrb[6].mxu0 }
 0x17a   : > { %2785 = vmatmul.mubr.msk.bf16.vlgmr.msra.gmra.mrb[4].mxu1 %vm938_vm3, %v935_v15  ;;  %v2781_v44 = vpop.f32.mrb[7].mxu0  ;;  %v1004_v45 = vsel %vm1002_vm5, %v3606_v41, 0 }
 0x17b   : > { %2796 = vmatprep.mubr.msk.bf16.mxu1 %vm3244_vm1, %v3243_v2  ;;  %2789 = vmatpush3.bf16.msra.mxu0 %v1004_v45 }
 0x17c   : > { %2800 = vmatprep.subr.bf16.mxu0 %v3243_v2 }
 0x1e3   : > { %v1051_v21 = vpop.permute.xlu0 %1050  ;;  %v1164_v23 = vpop.permute.xlu1 %1163 }
 0x1e4   : > { %v1056_v22 = vsel %vm938_vm3, %v1051_v21, 0  ;;  %v1169_v25 = vsel %vm938_vm3, %v1164_v23, 0 }
 0x1e5   : > { %2795 = vmatpush3.bf16.xpose.msra.mxu1 %v1056_v22 }
 0x1e6   : > { %2806 = vmatprep.subr.bf16.mxu1 %v3243_v2 }
 0x1e7   : > { %v1048_v24 = vpop.permute.xlu0 %1047  ;;  %v1162_v27 = vpop.permute.xlu1 %1161 }
 0x1eb   : > { %v1276_v26 = vpop.permute.xlu0 %1275  ;;  %v1274_v29 = vpop.permute.xlu1 %1273 }
 0x1ec   : > { %2797 = vmatmul.mubr.msk.bf16.vlgmr.msra.gmra.mrb[8].mxu1 %vm938_vm3, %v1048_v24  ;;  %v1281_v28 = vsel %vm938_vm3, %v1276_v26, 0 }
 0x1ed   : > { %2807 = vmatpush3.bf16.xpose.msra.mxu1 %v1169_v25  ;;  %2808 = vmatprep.mubr.msk.bf16.mxu1 %vm3244_vm1, %v3243_v2 }
 0x1ee   : > { %2818 = vmatprep.subr.bf16.mxu1 %v3243_v2 }
 0x1f4   : > { %2809 = vmatmul.mubr.msk.bf16.vlgmr.msra.gmra.mrb[12].mxu1 %vm938_vm3, %v1162_v27 }
 0x1f5   : > { %2819 = vmatpush3.bf16.xpose.msra.mxu1 %v1281_v28  ;;  %2820 = vmatprep.mubr.msk.bf16.mxu1 %vm3244_vm1, %v3243_v2 }
 0x1f6   : > { %2830 = vmatprep.subr.bf16.mxu1 %v3243_v2 }
 0x1fc   : > { %2821 = vmatmul.mubr.msk.bf16.vlgmr.msra.gmra.mrb[16].mxu1 %vm938_vm3, %v1274_v29 }
 0x1fd   : > { %2834 = vmatprep.mubr.msk.bf16.mxu1 %vm3244_vm1, %v3243_v2 }
 0x24d   : > { %v979_v33 = vpop.f32.mrb[4].mxu1 }
 0x24e   : > { %v985_v34 = vmul.f32 0.35355338, %v979_v33  ;;  %v2786_v35 = vpop.f32.mrb[5].mxu1 }
 0x24f   : > { %v982_v36 = vpop.f32.mrb[6].mxu1 }
 0x250   : > { %v2787_v37 = vpop.f32.mrb[7].mxu1  ;;  %v986_v38 = vsel %vm934_vm4, %v985_v34, -1e+30 }
 0x251   : > { %v987_v39 = vsel %vm938_vm3, %v986_v38, -inf }
 0x252   : > { %988 = vmax.xlane.f32.xlu0 %v987_v39 }
 0x2bf   : > { %v1092_v46 = vpop.f32.mrb[8].mxu1 }
 0x2c0   : > { %v1098_v47 = vmul.f32 0.35355338, %v1092_v46  ;;  %v2798_v48 = vpop.f32.mrb[9].mxu1 }
 0x2c1   : > { %v1095_v49 = vpop.f32.mrb[10].mxu1 }
 0x2c2   : > { %v2799_v50 = vpop.f32.mrb[11].mxu1  ;;  %v1099_v51 = vsel %vm934_vm4, %v1098_v47, -1e+30 }
 0x2c3   : > { %v1100_v52 = vsel %vm938_vm3, %v1099_v51, -inf }
 0x2c4   : > { %1101 = vmax.xlane.f32.xlu1 %v1100_v52 }
 0x2c7   : > { %v1205_v53 = vpop.f32.mrb[12].mxu1 }
 0x2c8   : > { %v1211_v54 = vmul.f32 0.35355338, %v1205_v53  ;;  %v2810_v55 = vpop.f32.mrb[13].mxu1 }
 0x2c9   : > { %v1208_v56 = vpop.f32.mrb[14].mxu1 }
 0x2ca   : > { %v2811_v57 = vpop.f32.mrb[15].mxu1  ;;  %v1212_v58 = vsel %vm934_vm4, %v1211_v54, -1e+30  ;;  %v3023_v56 = vld [vmem:[%s3514_s10 + $0x8] sm:$0xff]  }
 0x2cb   : > { %v1213_v59 = vsel %vm938_vm3, %v1212_v58, -inf }
 0x2cc   : > { %1214 = vmax.xlane.f32.xlu0 %v1213_v59 }
 0x2cf   : > { %v1317_v60 = vpop.f32.mrb[16].mxu1 }
 0x2d0   : > { %v1323_v61 = vmul.f32 0.35355338, %v1317_v60  ;;  %v2822_v62 = vpop.f32.mrb[17].mxu1 }
 0x2d1   : > { %v1320_v63 = vpop.f32.mrb[18].mxu1 }
 0x2d2   : > { %v2823_v0 = vpop.f32.mrb[19].mxu1  ;;  %v1324_v1 = vsel %vm934_vm4, %v1323_v61, -1e+30 }
 0x2d3   : > { %v1325_v3 = vsel %vm938_vm3, %v1324_v1, -inf }
 0x2d4   : > { %1326 = vmax.xlane.f32.xlu0 %v1325_v3 }
 0x2df   : > { %v989_v4 = vpop.xlane.xlu0 %988 }
 0x2e0   : > { %v990_v6 = vsub.f32 %v986_v38, %v989_v4 }
 0x2e2   : > { %v991_v7 = vmul.f32 1.442695, %v990_v6 }
 0x2e4   : > { %3036 = vpow2.f32 %v991_v7 }
 0x2ee   : > { %v3037_v8 = vpop.eup %3036 }
 0x2ef   : > { %v993_v9 = vsel %vm938_vm3, %v3037_v8, 0.0 }
 0x2f0   : > { %994 = vadd.xlane.f32.xlu1 %v993_v9 }
 0x301   : > { %1113 = vrot.lane.b32.xlu1 %v3606_v41, %s3246_s3 }
 0x351   : > { %v1102_v10 = vpop.xlane.xlu1 %1101 }
 0x352   : > { %v1103_v11 = vsub.f32 %v1099_v51, %v1102_v10  ;;  %v3022_v51 = vld [vmem:[%s3514_s10] sm:$0xff]   ;;  %s3875_s10 = scalar_lea.vmem [#allocation3], %s3480_s11 }
 0x353   : > { %2831 = vmatpush3.bf16.msra.mxu1 %v3022_v51 }
 0x354   : > { %v1104_v12 = vmul.f32 1.442695, %v1103_v11  ;;  %2832 = vmatprep.subr.bf16.mxu1 %v3243_v2 }
 0x356   : > { %3038 = vpow2.f32 %v1104_v12 }
 0x357   : > { %2833 = vmatpush3.bf16.msra.mxu1 %v3023_v56 }
 0x358   : > { %2846 = vmatprep.subr.bf16.mxu1 %v3243_v2 }
 0x359   : > { %v1215_v13 = vpop.xlane.xlu0 %1214 }
 0x35a   : > { %v1216_v14 = vsub.f32 %v1212_v58, %v1215_v13 }
 0x35c   : > { %v1217_v15 = vmul.f32 1.442695, %v1216_v14 }
 0x35e   : > { %3040 = vpow2.f32 %v1217_v15 }
 0x360   : > { %v3039_v16 = vpop.eup %3038 }
 0x361   : > { %v1327_v17 = vpop.xlane.xlu0 %1326  ;;  %v1106_v18 = vsel %vm938_vm3, %v3039_v16, 0.0 }
 0x362   : > { %v1328_v19 = vsub.f32 %v1324_v1, %v1327_v17  ;;  %1107 = vadd.xlane.f32.xlu0 %v1106_v18 }
 0x364   : > { %v1329_v20 = vmul.f32 1.442695, %v1328_v19 }
 0x366   : > { %3042 = vpow2.f32 %v1329_v20 }
 0x368   : > { %v3041_v21 = vpop.eup %3040 }
 0x369   : > { %v1219_v22 = vsel %vm938_vm3, %v3041_v21, 0.0 }
 0x36a   : > { %1220 = vadd.xlane.f32.xlu1 %v1219_v22  ;;  %v751_v22 = vld [vmem:[%s3874_s28] sm:$0xff] }
 0x370   : > { %v3043_v23 = vpop.eup %3042 }
 0x371   : > { %v1331_v24 = vsel %vm938_vm3, %v3043_v23, 0.0 }
 0x372   : > { %1332 = vadd.xlane.f32.xlu0 %v1331_v24  ;;  %v3026_v24 = vld [vmem:[%s3519_s14] sm:$0xff]  }
 0x37b   : > { %1337 = vrot.lane.b32.xlu1 %v3606_v41, %s3247_s4 }
 0x37d   : > { %v995_v25 = vpop.xlane.xlu1 %994 }
 0x37e   : > { %3044 = vrcp.f32 %v995_v25  ;;  %v3027_v25 = vld [vmem:[%s3519_s14 + $0x8] sm:$0xff]   ;;  %s3876_s14 = scalar_lea.vmem [#allocation6], %s3480_s11 }
 0x381   : > { %v1114_v27 = vpop.permute.xlu1 %1113 }
 0x382   : > { %v1119_v30 = vsel %vm1002_vm5, %v1114_v27, 0 }
 0x388   : > { %v3045_v26 = vpop.eup %3044  ;;  %1225 = vrot.lane.b32.xlu0 %v3606_v41, %s3245_s2 }
 0x389   : > { %v997_v28 = vmul.f32 %v3045_v26, %v3037_v8 }
 0x38b   : > { %v998_v29 = vpack.c.bf16 %v997_v28, %v997_v28 }
 0x38d   : > { %2791 = vmatmul.mubr.msk.bf16.vlgmr.msra.gmra.mrb[8].mxu0 %vm938_vm3, %v998_v29 }
 0x38e   : > { %2801 = vmatpush3.bf16.msra.mxu0 %v1119_v30  ;;  %2802 = vmatprep.mubr.msk.bf16.mxu0 %vm3244_vm1, %v3243_v2 }
 0x38f   : > { %2812 = vmatprep.subr.bf16.mxu0 %v3243_v2 }
 0x3ef   : > { %v1108_v31 = vpop.xlane.xlu0 %1107 }
 0x3f0   : > { %3046 = vrcp.f32 %v1108_v31 }
 0x3f7   : > { %v1221_v32 = vpop.xlane.xlu1 %1220 }
 0x3f8   : > { %3048 = vrcp.f32 %v1221_v32 }
 0x3fa   : > { %v3047_v33 = vpop.eup %3046 }
 0x3fb   : > { %v1110_v34 = vmul.f32 %v3047_v33, %v3039_v16  ;;  %v1338_v41 = vpop.permute.xlu1 %1337  ;;  %v3024_v16 = vld [vmem:[%s3524_s30] sm:$0xff]  }
 0x3fc   : > { %v1343_v43 = vsel %vm1002_vm5, %v1338_v41, 0 }
 0x3fd   : > { %v1111_v35 = vpack.c.bf16 %v1110_v34, %v1110_v34 }
 0x3ff   : > { %v1333_v36 = vpop.xlane.xlu0 %1332  ;;  %2803 = vmatmul.mubr.msk.bf16.vlgmr.msra.gmra.mrb[12].mxu0 %vm938_vm3, %v1111_v35 }
 0x400   : > { %3050 = vrcp.f32 %v1333_v36  ;;  %2814 = vmatprep.mubr.msk.bf16.mxu0 %vm3244_vm1, %v3243_v2 }
 0x402   : > { %v3049_v37 = vpop.eup %3048 }
 0x403   : > { %v1223_v38 = vmul.f32 %v3049_v37, %v3041_v21  ;;  %v1226_v39 = vpop.permute.xlu0 %1225 }
 0x404   : > { %v1231_v40 = vsel %vm1002_vm5, %v1226_v39, 0 }
 0x405   : > { %2813 = vmatpush3.bf16.msra.mxu0 %v1231_v40  ;;  %v1224_v42 = vpack.c.bf16 %v1223_v38, %v1223_v38 }
 0x406   : > { %2824 = vmatprep.subr.bf16.mxu0 %v3243_v2 }
 0x408   : > { %2815 = vmatmul.mubr.msk.bf16.vlgmr.msra.gmra.mrb[16].mxu0 %vm938_vm3, %v1224_v42 }
 0x409   : > { %2825 = vmatpush3.bf16.msra.mxu0 %v1343_v43  ;;  %2826 = vmatprep.mubr.msk.bf16.mxu0 %vm3244_vm1, %v3243_v2 }
 0x40a   : > { %v3051_v44 = vpop.eup %3050  ;;  %2838 = vmatprep.subr.bf16.mxu0 %v3243_v2 }
 0x40b   : > { %v1335_v45 = vmul.f32 %v3051_v44, %v3043_v23  ;;  %v1489_v23 = vpack.c.bf16 %v751_v22, %v751_v22 }
 0x40d   : > { %v1336_v46 = vpack.c.bf16 %v1335_v45, %v1335_v45  ;;  %v3028_v45 = vld [vmem:[%s3529_s12] sm:$0xff]  }
 0x410   : > { %2827 = vmatmul.mubr.msk.bf16.vlgmr.msra.gmra.mrb[20].mxu0 %vm938_vm3, %v1336_v46  ;;  %v3029_v46 = vld [vmem:[%s3529_s12 + $0x8] sm:$0xff]  }
 0x411   : > { %2842 = vmatprep.mubr.msk.bf16.mxu0 %vm3244_vm1, %v3243_v2  ;;  %2839 = vmatpush3.bf16.msra.mxu0 %v3026_v24 }
 0x412   : > { %2840 = vmatprep.subr.bf16.mxu0 %v3243_v2 }
 0x415   : > { %2841 = vmatpush3.bf16.msra.mxu0 %v3027_v25 }
 0x416   : > { %2854 = vmatprep.subr.bf16.mxu0 %v3243_v2 }
 0x460   : > { %v1040_v47 = vpop.f32.mrb[8].mxu0 }
 0x461   : > { %v2792_v48 = vpop.f32.mrb[9].mxu0 }
 0x462   : > { %v1043_v49 = vpop.f32.mrb[10].mxu0 }
 0x463   : > { %v2793_v50 = vpop.f32.mrb[11].mxu0 }
 0x4d2   : > { %v1155_v52 = vpop.f32.mrb[12].mxu0 }
 0x4d3   : > { %1386 = vrot.lane.b32.xlu1 %v1155_v52, %s3248_s5  ;;  %v2804_v53 = vpop.f32.mrb[13].mxu0 }
 0x4d4   : > { %v1158_v54 = vpop.f32.mrb[14].mxu0 }
 0x4d5   : > { %v2805_v55 = vpop.f32.mrb[15].mxu0 }
 0x4db   : > { %v1267_v57 = vpop.f32.mrb[16].mxu0 }
 0x4dc   : > { %1390 = vrot.lane.b32.xlu0 %v1267_v57, %s3249_s0  ;;  %v2816_v58 = vpop.f32.mrb[17].mxu0 }
 0x4dd   : > { %v1270_v59 = vpop.f32.mrb[18].mxu0 }
 0x4de   : > { %v2817_v60 = vpop.f32.mrb[19].mxu0 }
 0x4e3   : > { %v1379_v61 = vpop.f32.mrb[20].mxu0 }
 0x4e4   : > { %1394 = vrot.lane.b32.xlu1 %v1379_v61, %s3250_s16  ;;  %v2828_v62 = vpop.f32.mrb[21].mxu0 }
 0x4e5   : > { %v1382_v63 = vpop.f32.mrb[22].mxu0 }
 0x4e6   : > { %v2829_v0 = vpop.f32.mrb[23].mxu0 }
 0x545   : > { %v1387_v1 = vpop.permute.xlu1 %1386 }
 0x546   : > { %v1397_v4 = vsel %vm938_vm3, %v1040_v47, %v1387_v1 }
 0x54e   : > { %v1391_v3 = vpop.permute.xlu0 %1390 }
 0x54f   : > { %v1399_v6 = vsel %vm1398_vm6, %v1397_v4, %v1391_v3 }
 0x556   : > { %v1395_v7 = vpop.permute.xlu1 %1394 }
 0x557   : > { %v1401_v8 = vsel %vm1400_vm7, %v1399_v6, %v1395_v7 }
 0x558   : > { %v1402_v9 = vpack.c.bf16 %v1401_v8, %v1401_v8 }
 0x55a   : > { %2835 = vmatmul.mubr.msk.bf16.vlgmr.msra.gmra.mrb[20].mxu1 %vm782_vm2, %v1402_v9 }
 0x55b   : > { %2850 = vmatprep.mubr.msk.bf16.mxu1 %vm3244_vm1, %v3243_v2  ;;  %2847 = vmatpush3.bf16.msra.mxu1 %v3024_v16 }
 0x55c   : > { %2848 = vmatprep.subr.bf16.mxu1 %v3243_v2 }
 0x62d   : > { %v1452_v10 = vpop.f32.mrb[20].mxu1 }
 0x62e   : > { %v1453_v11 = vadd.f32 %v1452_v10, %v3556_v5  ;;  %v2836_v12 = vpop.f32.mrb[21].mxu1  ;;  %v3025_v5 = vld [vmem:[%s3524_s30 + $0x8] sm:$0xff]  }
 0x62f   : > { %v1455_v13 = vpop.f32.mrb[22].mxu1  ;;  %2849 = vmatpush3.bf16.msra.mxu1 %v3025_v5 }
 0x630   : > { %v2837_v14 = vpop.f32.mrb[23].mxu1  ;;  %v1458_v15 = vsel %vm782_vm2, %v1453_v11, 0.0  ;;  %2862 = vmatprep.subr.bf16.mxu1 %v3243_v2 }
 0x631   : > { %1459 = vadd.xlane.f32.xlu0 %v1458_v15 }
 0x632   : > { %2851 = vmatmul.mubr.msk.bf16.vlgmr.msra.gmra.mrb[24].mxu1 %vm782_vm2, %v1489_v23 }
 0x633   : > { %2864 = vmatprep.mubr.msk.bf16.mxu1 %vm3244_vm1, %v3243_v2 }
 0x6be   : > { %v1460_v17 = vpop.xlane.xlu0 %1459 }
 0x6bf   : > { %v1462_v18 = vmul.f32 0.03125, %v1460_v17 }
 0x6c1   : > { %v1463_v19 = vsub.f32 %v1453_v11, %v1462_v18 }
 0x6c3   : > { %v1464_v20 = vmul.f32 %v1463_v19, %v1463_v19 }
 0x6c5   : > { %v1465_v21 = vsel %vm782_vm2, %v1464_v20, 0.0 }
 0x6c6   : > { %1466 = vadd.xlane.f32.xlu1 %v1465_v21 }
 0x705   : > { %v1594_v32 = vpop.f32.mrb[24].mxu1 }
 0x706   : > { %v1653_v33 = vpack.c.bf16 %v1594_v32, %v1594_v32  ;;  %v2852_v34 = vpop.f32.mrb[25].mxu1 }
 0x707   : > { %v1597_v35 = vpop.f32.mrb[26].mxu1 }
 0x708   : > { %1764 = vrot.lane.b32.xlu0 %v1653_v33, %s3246_s3  ;;  %v2853_v36 = vpop.f32.mrb[27].mxu1  ;;  %v1659_v37 = vsel %vm938_vm3, %v1653_v33, 0 }
 0x709   : > { %2863 = vmatpush3.bf16.xpose.msra.mxu1 %v1659_v37 }
 0x70a   : > { %2874 = vmatprep.subr.bf16.mxu1 %v3243_v2 }
 0x70c   : > { %1876 = vrot.lane.b32.xlu0 %v1653_v33, %s3245_s2 }
 0x710   : > { %1987 = vrot.lane.b32.xlu0 %v1653_v33, %s3247_s4 }
 0x753   : > { %v1467_v26 = vpop.xlane.xlu1 %1466 }
 0x754   : > { %v1468_v27 = vmul.f32 0.03125, %v1467_v26 }
 0x756   : > { %v1469_v28 = vadd.f32 1e-05, %v1468_v27 }
 0x758   : > { %3052 = vrsqrt.f32 %v1469_v28 }
 0x762   : > { %v3053_v29 = vpop.eup %3052 }
 0x763   : > { %v3675_v30 = vmul.f32 %v3053_v29, %v1463_v19 }
 0x765   : > { %v1488_v31 = vpack.c.bf16 %v3675_v30, %v3675_v30 }
 0x767   : > { %2843 = vmatmul.mubr.msk.bf16.vlgmr.msra.gmra.mrb[24].mxu0 %vm782_vm2, %v1488_v31 }
 0x768   : > { %2858 = vmatprep.mubr.msk.bf16.mxu0 %vm3244_vm1, %v3243_v2  ;;  %2855 = vmatpush3.bf16.msra.mxu0 %v3028_v45 }
 0x769   : > { %2856 = vmatprep.subr.bf16.mxu0 %v3243_v2 }
 0x76c   : > { %2857 = vmatpush3.bf16.msra.mxu0 %v3029_v46 }
 0x76d   : > { %2868 = vmatprep.subr.bf16.mxu0 %v3243_v2 }
 0x76f   : > { %2859 = vmatmul.mubr.msk.bf16.vlgmr.msra.gmra.mrb[28].mxu0 %vm782_vm2, %v1489_v23 }
 0x770   : > { %2870 = vmatprep.mubr.msk.bf16.mxu0 %vm3244_vm1, %v3243_v2 }
 0x77a   : > { %v1765_v39 = vpop.permute.xlu0 %1764 }
 0x77b   : > { %v1770_v42 = vsel %vm938_vm3, %v1765_v39, 0 }
 0x77e   : > { %v1877_v47 = vpop.permute.xlu0 %1876 }
 0x77f   : > { %v1882_v49 = vsel %vm938_vm3, %v1877_v47, 0 }
 0x782   : > { %v1988_v50 = vpop.permute.xlu0 %1987 }
 0x783   : > { %v1993_v52 = vsel %vm938_vm3, %v1988_v50, 0 }
 0x83a   : > { %v1539_v38 = vpop.f32.mrb[24].mxu0 }
 0x83b   : > { %v1652_v40 = vpack.c.bf16 %v1539_v38, %v1539_v38  ;;  %v2844_v41 = vpop.f32.mrb[25].mxu0 }
 0x83c   : > { %v1542_v43 = vpop.f32.mrb[26].mxu0 }
 0x83d   : > { %1761 = vrot.lane.b32.xlu1 %v1652_v40, %s3246_s3  ;;  %v2845_v44 = vpop.f32.mrb[27].mxu0  ;;  %2865 = vmatmul.mubr.msk.bf16.vlgmr.msra.gmra.mrb[28].mxu1 %vm938_vm3, %v1652_v40 }
 0x83e   : > { %2875 = vmatpush3.bf16.xpose.msra.mxu1 %v1770_v42  ;;  %2876 = vmatprep.mubr.msk.bf16.mxu1 %vm3244_vm1, %v3243_v2 }
 0x83f   : > { %2886 = vmatprep.subr.bf16.mxu1 %v3243_v2 }
 0x841   : > { %1874 = vrot.lane.b32.xlu1 %v1652_v40, %s3245_s2 }
 0x842   : > { %v1646_v60 = vpop.f32.mrb[28].mxu0 }
 0x843   : > { %v3716_v61 = vpack.c.bf16 %v1646_v60, %v1646_v60  ;;  %v2860_v62 = vpop.f32.mrb[29].mxu0 }
 0x844   : > { %v1649_v63 = vpop.f32.mrb[30].mxu0 }
 0x845   : > { %1985 = vrot.lane.b32.xlu1 %v1652_v40, %s3247_s4  ;;  %v2861_v0 = vpop.f32.mrb[31].mxu0  ;;  %v1718_v1 = vsel %vm1002_vm5, %v3716_v61, 0 }
 0x846   : > { %2869 = vmatpush3.bf16.msra.mxu0 %v1718_v1 }
 0x847   : > { %2880 = vmatprep.subr.bf16.mxu0 %v3243_v2 }
 0x8af   : > { %v1762_v48 = vpop.permute.xlu1 %1761 }
 0x8b0   : > { %2877 = vmatmul.mubr.msk.bf16.vlgmr.msra.gmra.mrb[32].mxu1 %vm938_vm3, %v1762_v48 }
 0x8b1   : > { %2887 = vmatpush3.bf16.xpose.msra.mxu1 %v1882_v49  ;;  %2888 = vmatprep.mubr.msk.bf16.mxu1 %vm3244_vm1, %v3243_v2 }
 0x8b2   : > { %2898 = vmatprep.subr.bf16.mxu1 %v3243_v2 }
 0x8b3   : > { %v1875_v51 = vpop.permute.xlu1 %1874 }
 0x8b7   : > { %v1986_v53 = vpop.permute.xlu1 %1985 }
 0x8b8   : > { %2889 = vmatmul.mubr.msk.bf16.vlgmr.msra.gmra.mrb[36].mxu1 %vm938_vm3, %v1875_v51 }
 0x8b9   : > { %2899 = vmatpush3.bf16.xpose.msra.mxu1 %v1993_v52  ;;  %2900 = vmatprep.mubr.msk.bf16.mxu1 %vm3244_vm1, %v3243_v2 }
 0x8ba   : > { %2910 = vmatprep.subr.bf16.mxu1 %v3243_v2 }
 0x8c0   : > { %2901 = vmatmul.mubr.msk.bf16.vlgmr.msra.gmra.mrb[40].mxu1 %vm938_vm3, %v1986_v53 }
 0x8c1   : > { %2914 = vmatprep.mubr.msk.bf16.mxu1 %vm3244_vm1, %v3243_v2 }
 0x910   : > { %v1695_v54 = vpop.f32.mrb[28].mxu1 }
 0x911   : > { %v1701_v55 = vmul.f32 0.35355338, %v1695_v54  ;;  %v2866_v56 = vpop.f32.mrb[29].mxu1 }
 0x912   : > { %v1698_v57 = vpop.f32.mrb[30].mxu1 }
 0x913   : > { %v2867_v58 = vpop.f32.mrb[31].mxu1  ;;  %v1702_v59 = vsel %vm938_vm3, %v1701_v55, -inf }
 0x914   : > { %1703 = vmax.xlane.f32.xlu0 %v1702_v59 }
 0x983   : > { %v1806_v3 = vpop.f32.mrb[32].mxu1 }
 0x984   : > { %v1812_v4 = vmul.f32 0.35355338, %v1806_v3  ;;  %v2878_v6 = vpop.f32.mrb[33].mxu1 }
 0x985   : > { %v1809_v7 = vpop.f32.mrb[34].mxu1  ;;  %v3030_v6 = vld [vmem:[%s3534_s17] sm:$0xff]  }
 0x986   : > { %v2879_v8 = vpop.f32.mrb[35].mxu1  ;;  %v1813_v9 = vsel %vm938_vm3, %v1812_v4, -inf  ;;  %2911 = vmatpush3.bf16.msra.mxu1 %v3030_v6 }
 0x987   : > { %1814 = vmax.xlane.f32.xlu1 %v1813_v9  ;;  %2912 = vmatprep.subr.bf16.mxu1 %v3243_v2 }
 0x98b   : > { %v1918_v10 = vpop.f32.mrb[36].mxu1 }
 0x98c   : > { %v1924_v11 = vmul.f32 0.35355338, %v1918_v10  ;;  %v2890_v12 = vpop.f32.mrb[37].mxu1 }
 0x98d   : > { %v1921_v13 = vpop.f32.mrb[38].mxu1 }
 0x98e   : > { %v2891_v14 = vpop.f32.mrb[39].mxu1  ;;  %v1925_v15 = vsel %vm938_vm3, %v1924_v11, -inf }
 0x98f   : > { %1926 = vmax.xlane.f32.xlu0 %v1925_v15 }
 0x993   : > { %v2029_v16 = vpop.f32.mrb[40].mxu1 }
 0x994   : > { %v2035_v17 = vmul.f32 0.35355338, %v2029_v16  ;;  %v2902_v18 = vpop.f32.mrb[41].mxu1 }
 0x995   : > { %v2032_v19 = vpop.f32.mrb[42].mxu1 }
 0x996   : > { %v2903_v20 = vpop.f32.mrb[43].mxu1  ;;  %v2036_v21 = vsel %vm938_vm3, %v2035_v17, -inf }
 0x997   : > { %2037 = vmax.xlane.f32.xlu0 %v2036_v21 }
 0x9a1   : > { %v1704_v5 = vpop.xlane.xlu0 %1703 }
 0x9a2   : > { %v1705_v22 = vsub.f32 %v1701_v55, %v1704_v5 }
 0x9a4   : > { %v1706_v23 = vmul.f32 1.442695, %v1705_v22 }
 0x9a6   : > { %3054 = vpow2.f32 %v1706_v23 }
 0x9b0   : > { %v3055_v24 = vpop.eup %3054 }
 0x9b1   : > { %v1708_v25 = vsel %vm938_vm3, %v3055_v24, 0.0 }
 0x9b2   : > { %1709 = vadd.xlane.f32.xlu1 %v1708_v25 }
 0x9c3   : > { %1826 = vrot.lane.b32.xlu1 %v3716_v61, %s3246_s3 }
 0xa14   : > { %v1815_v26 = vpop.xlane.xlu1 %1814 }
 0xa15   : > { %v1816_v27 = vsub.f32 %v1812_v4, %v1815_v26 }
 0xa17   : > { %v1817_v28 = vmul.f32 1.442695, %v1816_v27 }
 0xa19   : > { %3056 = vpow2.f32 %v1817_v28 }
 0xa1c   : > { %v1927_v29 = vpop.xlane.xlu0 %1926 }
 0xa1d   : > { %v1928_v31 = vsub.f32 %v1924_v11, %v1927_v29  ;;  %v3031_v11 = vld [vmem:[%s3534_s17 + $0x8] sm:$0xff]  }
 0xa1e   : > { %2913 = vmatpush3.bf16.msra.mxu1 %v3031_v11  ;;  %v3251_v11 = vmov (!%p2675_p10), 0.0  }
 0xa1f   : > { %v1929_v32 = vmul.f32 1.442695, %v1928_v31  ;;  %2926 = vmatprep.subr.bf16.mxu1 %v3243_v2 }
 0xa21   : > { %3058 = vpow2.f32 %v1929_v32 }
 0xa23   : > { %v3057_v33 = vpop.eup %3056 }
 0xa24   : > { %v2038_v34 = vpop.xlane.xlu0 %2037  ;;  %v1819_v35 = vsel %vm938_vm3, %v3057_v33, 0.0 }
 0xa25   : > { %v2039_v36 = vsub.f32 %v2035_v17, %v2038_v34  ;;  %1820 = vadd.xlane.f32.xlu0 %v1819_v35 }
 0xa27   : > { %v2040_v37 = vmul.f32 1.442695, %v2039_v36 }
 0xa29   : > { %3060 = vpow2.f32 %v2040_v37 }
 0xa2b   : > { %v3059_v38 = vpop.eup %3058 }
 0xa2c   : > { %v1931_v39 = vsel %vm938_vm3, %v3059_v38, 0.0 }
 0xa2d   : > { %1932 = vadd.xlane.f32.xlu1 %v1931_v39 }
 0xa33   : > { %v3061_v40 = vpop.eup %3060 }
 0xa34   : > { %v2042_v41 = vsel %vm938_vm3, %v3061_v40, 0.0 }
 0xa35   : > { %2043 = vadd.xlane.f32.xlu0 %v2042_v41 }
 0xa3e   : > { %2048 = vrot.lane.b32.xlu1 %v3716_v61, %s3247_s4 }
 0xa3f   : > { %v1710_v42 = vpop.xlane.xlu1 %1709 }
 0xa40   : > { %3062 = vrcp.f32 %v1710_v42 }
 0xa43   : > { %v1827_v44 = vpop.permute.xlu1 %1826 }
 0xa44   : > { %v1832_v47 = vsel %vm1002_vm5, %v1827_v44, 0 }
 0xa4a   : > { %v3063_v43 = vpop.eup %3062 }
 0xa4b   : > { %v1712_v45 = vmul.f32 %v3063_v43, %v3055_v24  ;;  %1937 = vrot.lane.b32.xlu0 %v3716_v61, %s3245_s2 }
 0xa4d   : > { %v1713_v46 = vpack.c.bf16 %v1712_v45, %v1712_v45  ;;  %v3034_v45 = vld [vmem:[%s3544_s29] sm:$0xff]  }
 0xa4f   : > { %2871 = vmatmul.mubr.msk.bf16.vlgmr.msra.gmra.mrb[32].mxu0 %vm938_vm3, %v1713_v46  ;;  %v3035_v46 = vld [vmem:[%s3544_s29 + $0x8] sm:$0xff]  }
 0xa50   : > { %2881 = vmatpush3.bf16.msra.mxu0 %v1832_v47  ;;  %2882 = vmatprep.mubr.msk.bf16.mxu0 %vm3244_vm1, %v3243_v2  ;;  %v2667_v47 = vld [vmem:[%s3875_s10] ss:$0 sm:$0xff] }
 0xa51   : > { %2892 = vmatprep.subr.bf16.mxu0 %v3243_v2 }
 0xab2   : > { %v1821_v48 = vpop.xlane.xlu0 %1820 }
 0xab3   : > { %3064 = vrcp.f32 %v1821_v48 }
 0xaba   : > { %v1933_v49 = vpop.xlane.xlu1 %1932 }
 0xabb   : > { %3066 = vrcp.f32 %v1933_v49 }
 0xabd   : > { %v3065_v50 = vpop.eup %3064 }
 0xabe   : > { %v1823_v51 = vmul.f32 %v3065_v50, %v3057_v33  ;;  %v2049_v58 = vpop.permute.xlu1 %2048 }
 0xabf   : > { %v2054_v60 = vsel %vm1002_vm5, %v2049_v58, 0 }
 0xac0   : > { %v1824_v52 = vpack.c.bf16 %v1823_v51, %v1823_v51 }
 0xac2   : > { %2883 = vmatmul.mubr.msk.bf16.vlgmr.msra.gmra.mrb[36].mxu0 %vm938_vm3, %v1824_v52  ;;  %v2044_v53 = vpop.xlane.xlu0 %2043 }
 0xac3   : > { %3068 = vrcp.f32 %v2044_v53  ;;  %2894 = vmatprep.mubr.msk.bf16.mxu0 %vm3244_vm1, %v3243_v2 }
 0xac5   : > { %v3067_v54 = vpop.eup %3066 }
 0xac6   : > { %v1935_v55 = vmul.f32 %v3067_v54, %v3059_v38  ;;  %v1938_v56 = vpop.permute.xlu0 %1937  ;;  %v3032_v38 = vld [vmem:[%s3539_s15] sm:$0xff]  }
 0xac7   : > { %v1943_v57 = vsel %vm1002_vm5, %v1938_v56, 0 }
 0xac8   : > { %2893 = vmatpush3.bf16.msra.mxu0 %v1943_v57  ;;  %v1936_v59 = vpack.c.bf16 %v1935_v55, %v1935_v55  ;;  %v2671_v55 = vld [vmem:[%s3876_s14] ss:$0 sm:$0xff] }
 0xac9   : > { %2904 = vmatprep.subr.bf16.mxu0 %v3243_v2 }
 0xacb   : > { %2895 = vmatmul.mubr.msk.bf16.vlgmr.msra.gmra.mrb[40].mxu0 %vm938_vm3, %v1936_v59 }
 0xacc   : > { %2905 = vmatpush3.bf16.msra.mxu0 %v2054_v60  ;;  %2906 = vmatprep.mubr.msk.bf16.mxu0 %vm3244_vm1, %v3243_v2 }
 0xacd   : > { %v3069_v61 = vpop.eup %3068  ;;  %2918 = vmatprep.subr.bf16.mxu0 %v3243_v2 }
 0xace   : > { %v2046_v62 = vmul.f32 %v3069_v61, %v3061_v40 }
 0xad0   : > { %v2047_v63 = vpack.c.bf16 %v2046_v62, %v2046_v62 }
 0xad3   : > { %2907 = vmatmul.mubr.msk.bf16.vlgmr.msra.gmra.mrb[44].mxu0 %vm938_vm3, %v2047_v63 }
 0xad4   : > { %2922 = vmatprep.mubr.msk.bf16.mxu0 %vm3244_vm1, %v3243_v2  ;;  %2919 = vmatpush3.bf16.msra.mxu0 %v3032_v38 }
 0xad5   : > { %2920 = vmatprep.subr.bf16.mxu0 %v3243_v2 }
 0xb22   : > { %v1754_v0 = vpop.f32.mrb[32].mxu0 }
 0xb23   : > { %v2872_v1 = vpop.f32.mrb[33].mxu0 }
 0xb24   : > { %v1757_v3 = vpop.f32.mrb[34].mxu0 }
 0xb25   : > { %v2873_v4 = vpop.f32.mrb[35].mxu0 }
 0xb95   : > { %v1868_v7 = vpop.f32.mrb[36].mxu0 }
 0xb96   : > { %2097 = vrot.lane.b32.xlu1 %v1868_v7, %s3248_s5  ;;  %v2884_v8 = vpop.f32.mrb[37].mxu0 }
 0xb97   : > { %v1871_v9 = vpop.f32.mrb[38].mxu0 }
 0xb98   : > { %v2885_v10 = vpop.f32.mrb[39].mxu0 }
 0xb99   : > { %v3074_v10 = vld [vmem:[#allocation8] sm:$0xff] (!%p2675_p10)  }
 0xb9e   : > { %v1979_v12 = vpop.f32.mrb[40].mxu0 }
 0xb9f   : > { %2101 = vrot.lane.b32.xlu0 %v1979_v12, %s3249_s0  ;;  %v2896_v13 = vpop.f32.mrb[41].mxu0  ;;  %v3075_v12 = vld [vmem:[#allocation8 + $0x8] sm:$0xff] (!%p2675_p10)  }
 0xba0   : > { %v1982_v14 = vpop.f32.mrb[42].mxu0 }
 0xba1   : > { %v2897_v15 = vpop.f32.mrb[43].mxu0 }
 0xba6   : > { %v2090_v16 = vpop.f32.mrb[44].mxu0 }
 0xba7   : > { %2105 = vrot.lane.b32.xlu1 %v2090_v16, %s3250_s16  ;;  %v2908_v17 = vpop.f32.mrb[45].mxu0 }
 0xba8   : > { %v2093_v18 = vpop.f32.mrb[46].mxu0 }
 0xba9   : > { %v2909_v19 = vpop.f32.mrb[47].mxu0 }
 0xc08   : > { %v2098_v20 = vpop.permute.xlu1 %2097 }
 0xc09   : > { %v2108_v5 = vsel %vm938_vm3, %v1754_v0, %v2098_v20 }
 0xc11   : > { %v2102_v21 = vpop.permute.xlu0 %2101 }
 0xc12   : > { %v2109_v22 = vsel %vm1398_vm6, %v2108_v5, %v2102_v21 }
 0xc19   : > { %v2106_v23 = vpop.permute.xlu1 %2105 }
 0xc1a   : > { %v2110_v24 = vsel %vm1400_vm7, %v2109_v22, %v2106_v23 }
 0xc1b   : > { %v2111_v25 = vpack.c.bf16 %v2110_v24, %v2110_v24 }
 0xc1d   : > { %2915 = vmatmul.mubr.msk.bf16.vlgmr.msra.gmra.mrb[44].mxu1 %vm782_vm2, %v2111_v25 }
 0xc1e   : > { %2930 = vmatprep.mubr.msk.bf16.mxu1 %vm3244_vm1, %v3243_v2  ;;  %2927 = vmatpush3.bf16.msra.mxu1 %v3034_v45 }
 0xc1f   : > { %2928 = vmatprep.subr.bf16.mxu1 %v3243_v2 }
 0xc22   : > { %2929 = vmatpush3.bf16.msra.mxu1 %v3035_v46 }
 0xcf0   : > { %v2161_v26 = vpop.f32.mrb[44].mxu1 }
 0xcf1   : > { %v2162_v27 = vadd.f32 %v2161_v26, %v3675_v30  ;;  %v2916_v28 = vpop.f32.mrb[45].mxu1  ;;  %v3033_v30 = vld [vmem:[%s3539_s15 + $0x8] sm:$0xff]  }
 0xcf2   : > { %v2164_v29 = vpop.f32.mrb[46].mxu1  ;;  %2921 = vmatpush3.bf16.msra.mxu0 %v3033_v30 }
 0xcf3   : > { %v2917_v31 = vpop.f32.mrb[47].mxu1  ;;  %v2167_v32 = vsel %vm782_vm2, %v2162_v27, 0.0  ;;  %2934 = vmatprep.subr.bf16.mxu0 (!%p2675_p10), %v3251_v11 }
 0xcf4   : > { %2168 = vadd.xlane.f32.xlu0 %v2167_v32 }
 0xd81   : > { %v2169_v33 = vpop.xlane.xlu0 %2168 }
 0xd82   : > { %v2170_v34 = vmul.f32 0.03125, %v2169_v33 }
 0xd84   : > { %v2171_v35 = vsub.f32 %v2162_v27, %v2170_v34 }
 0xd86   : > { %v2172_v36 = vmul.f32 %v2171_v35, %v2171_v35 }
 0xd88   : > { %v2173_v37 = vsel %vm782_vm2, %v2172_v36, 0.0 }
 0xd89   : > { %2174 = vadd.xlane.f32.xlu1 %v2173_v37 }
 0xe16   : > { %v2175_v39 = vpop.xlane.xlu1 %2174 }
 0xe17   : > { %v2176_v40 = vmul.f32 0.03125, %v2175_v39 }
 0xe19   : > { %v2177_v41 = vadd.f32 1e-05, %v2176_v40 }
 0xe1b   : > { %3070 = vrsqrt.f32 %v2177_v41 }
 0xe25   : > { %v3071_v42 = vpop.eup %3070 }
 0xe26   : > { %v2179_v43 = vmul.f32 %v3071_v42, %v2171_v35 }
 0xe28   : > { %v2190_v44 = vpack.c.bf16 %v2179_v43, %v2179_v43 }
 0xe2a   : > { %2923 = vmatmul.mubr.msk.bf16.vlgmr.msra.gmra.mrb[48].mxu0 %vm782_vm2, %v2190_v44 }
 0xe2b   : > { %2935 = vmatpush3.bf16.msra.mxu0 (!%p2675_p10), %v3074_v10  ;;  %2938 = vmatprep.mubr.msk.bf16.mxu0 (!%p2675_p10), %vm3252_vm8, %v3251_v11 }
 0xe2c   : > { %2936 = vmatprep.subr.bf16.mxu0 (!%p2675_p10), %v3251_v11 }
 0xe2f   : > { %2937 = vmatpush3.bf16.msra.mxu0 (!%p2675_p10), %v3075_v12 }
 0xefd   : > { %v2246_v48 = vpop.f32.mrb[48].mxu0 }
 0xefe   : > { %v2247_v49 = vadd.f32 %v2667_v47, %v2246_v48  ;;  %v2924_v50 = vpop.f32.mrb[49].mxu0 }
 0xeff   : > { %v2249_v51 = vpop.f32.mrb[50].mxu0 }
 0xf00   : > { %v2252_v52 = vmax.f32 %v2247_v49, 0.0  ;;  %v2925_v53 = vpop.f32.mrb[51].mxu0 }
 0xf02   : > { %v2253_v54 = vpack.c.bf16 %v2252_v52, %v2252_v52 }
 0xf04   : > { %2931 = vmatmul.mubr.msk.bf16.vlgmr.msra.gmra.mrb[48].mxu1 %vm782_vm2, %v2253_v54 }
 0xfd7   : > { %v2309_v56 = vpop.f32.mrb[48].mxu1 }
 0xfd8   : > { %v2310_v57 = vadd.f32 %v2671_v55, %v2309_v56  ;;  %v2932_v58 = vpop.f32.mrb[49].mxu1 }
 0xfd9   : > { %v2312_v59 = vpop.f32.mrb[50].mxu1 }
 0xfda   : > { %v2933_v2 = vpop.f32.mrb[51].mxu1  ;;  %v2315_v60 = vadd.f32 %v2310_v57, %v2179_v43 }
 0xfdc   : > { %v2316_v61 = vsel %vm782_vm2, %v2315_v60, 0.0 }
 0xfdd   : > { %2317 = vadd.xlane.f32.xlu0 %v2316_v61 }
0x106a   : > { %v2318_v62 = vpop.xlane.xlu0 %2317 }
0x106b   : > { %v2319_v63 = vmul.f32 0.03125, %v2318_v62 }
0x106d   : > { %v2320_v0 = vsub.f32 %v2315_v60, %v2319_v63 }
0x106f   : > { %v2321_v1 = vmul.f32 %v2320_v0, %v2320_v0 }
0x1071   : > { %v2322_v3 = vsel %vm782_vm2, %v2321_v1, 0.0 }
0x1072   : > { %2323 = vadd.xlane.f32.xlu0 %v2322_v3 }
0x10ff   : > { %v2324_v4 = vpop.xlane.xlu0 %2323 }
0x1100   : > { %v2325_v6 = vmul.f32 0.03125, %v2324_v4 }
0x1102   : > { %v2326_v7 = vadd.f32 1e-05, %v2325_v6 }
0x1104   : > { %3072 = vrsqrt.f32 %v2326_v7 }
0x110b   : > { %2333 = sbr.rel (%p2675_p10) target bundleno = 4586 (0x11ea), region = 100 }
0x110e   : > { %v3073_v8 = vpop.eup %3072 }
0x110f   : > { %v2328_v9 = vmul.f32 %v3073_v8, %v2320_v0 }
0x1111   : > { %2329 = vst.msk [vmem:[#allocation2] sm:$0xff] %vm782_vm2, %v2328_v9  ;;  %v2334_v13 = vpack.c.bf16 (!%p2675_p10), %v2328_v9, %v2328_v9 }
0x1113   : > { %2939 = vmatmul.mubr.msk.bf16.vlgmr.msra.gmra.mrb[0].mxu0 %vm782_vm2, %v2334_v13 }
0x11e6   : > { %v2388_v14 = vpop.f32.mrb[0].mxu0 }
0x11e7   : > { %2394 = vst [vmem:[#allocation9] sm:$0xff] %v2388_v14  ;;  %v2940_v15 = vpop.f32.mrb[1].mxu0 }
0x11e8   : > { %v2391_v16 = vpop.f32.mrb[2].mxu0 }
0x11e9   : > { %v2941_v17 = vpop.f32.mrb[3].mxu0 }
0x11ea PF: > { %p2968_p12 = scmp.eq.s32.totalorder %s3353_s22, 1  ;;  %s3253_s11 = smov [#allocation9]  }
0x11eb   : > { %s2402_s30 = sshll.u32 %s3253_s11, 4  ;;  %s2403_s30 = int_to_ptr.vmem [resolvable:$true] %s2402_s30 }
0x11ec   : > { %s3164_s12 = scalar_lea.vmem %s2403_s30, 128  ;;  %p3171_p3 = scmp.lt.s32.totalorder %s2403_s30, %s2403_s30 }
0x11ed   : > { %p3165_p0 = scmp.ne.s32.totalorder %s2403_s30, %s3164_s12  ;;  %p3172_p1 = scmp.lt.s32.totalorder %s3164_s12, %s3164_s12 }
0x11ef   : > { %p3166_p2 = pnand %p3165_p0, %p2968_p12  ;;  %p3173_p9 = por %p3172_p1, %p3171_p3 }
0x11f1   : > { %p3167_p13 = pneg %p3166_p2 }
0x11f3   : > { %p3174_p7 = pnand %p3173_p9, %p3167_p13 }
0x11f5   : > { %3177 = shalt.err (!%p3174_p7)
}
0x11f6   : > { %s3877_s1 = sld [smem:[#allocation26_spill]] }
0x11fc   : > { %s3178_s26 = scalar_lea.hbm %s3877_s1, 128 }
0x11fd   : > { %p3179_p11 = scmp.ne.s32.totalorder %s3877_s1, %s3178_s26  ;;  %p3184_p5 = scmp.lt.u32.totalorder %s3178_s26, %s3877_s1 }
0x11ff   : > { %p3180_p8 = pnand %p3179_p11, %p2968_p12 }
0x1201   : > { %p3181_p4 = pneg %p3180_p8 }
0x1203   : > { %p3186_p6 = pnand %p3184_p5, %p3181_p4 }
0x1205   : > { %3189 = shalt.err (!%p3186_p6)
}
0x1206   : > { %2951 = dma.vmem_to_hbm [thread:$0]  (%p2968_p12), %s2403_s30, 128, %s3877_s1, [#allocation5]  }
0x1207   : > { %3219 = dma.done.wait (%p2968_p12), [#allocation5], 128  }
0x1208   : > { %3221 = vsyncadd (%p2968_p12), [#allocation5], 4294967168 }
0x1209 PF: > { %s3878_s21 = sld [smem:[#allocation14_spill]]  ;;  %s3879_s3 = sld [smem:[#allocation15_spill]] }
0x120a   : > { %s3880_s18 = smov %s3228_s19  ;;  %s3881_s19 = smov %s3232_s20 }
0x120f   : > { %p29_p10 = scmp.ge.s32.totalorder %s3878_s21, 4   ;;  %s3882_s20 = smov %s3879_s3 }
0x1211   :  { %31 = sbr.rel (!%p29_p10) target bundleno = 18 (0x12), region = 172 }
0x1218   :  { %2415 = vsyncpa [#allocation4], 1 }
0x1219   :  { %2417 = vsyncpa [#allocation4 + $0x1], 1 }
0x121a   :  { %2418 = vsyncpa [#allocation7], 1 }
0x121b   :  { %2420 = vsyncpa [#allocation7 + $0x1], 1 }
0x121c   :  { %2421 = vsyncpa [#allocation5], 1 }
0x121d   :  { %2423 = vsyncpa [#allocation5 + $0x1], 1 }

</bundles_post_ra>
